<compile_context>
chip_gen: v7x
topology: tpu7x:2x2x1
jax: 0.10.0
libtpu: 0.0.40
codegen_flags: <defaults>
</compile_context>

<pallas_src>
import functools

import jax
import jax.numpy as jnp
from jax.experimental import pallas as pl
from jax.experimental.pallas import tpu as pltpu

EPS = 1e-4


# -----------------------------------------------------------------------------
# Hardware / tile sizing helpers
# -----------------------------------------------------------------------------
def _physical_vmem_bytes():
    try:
        return int(pltpu.get_tpu_info().vmem_capacity_bytes)
    except Exception:
        return 64 * 1024 * 1024        # conservative fallback (v7x per-TC VMEM)


def _choose_tm(M):
    """Largest 128-multiple row tile that leaves >= 2 m-tiles (megacore)."""
    for c in (512, 256, 128):
        if M % c == 0 and M // c >= 2:
            return c
    for c in (512, 256, 128, 64, 32, 16, 8):
        if M % c == 0:
            return c
    return M


def _encoder_vmem_bytes_est(tm, d, th, w_bytes, x_bytes, o_bytes):
    """VMEM footprint estimate: double-buffered pipeline blocks + scratch +
    in-kernel temporaries (hcat f32, gated f32 + bf16 copy)."""
    blocks = (tm * d * x_bytes                 # x tile
              + tm * d * o_bytes               # out tile
              + d * (2 * th) * w_bytes         # w13 slab
              + th * d * w_bytes               # w2 slab
              + 3 * d * 4)                     # g1, g2, (g_final)
    scratch = tm * d * 4 + tm * d * 2          # acc f32 + n2 bf16
    interm = tm * (2 * th) * 4 + tm * th * 4 + tm * th * 2
    return 2 * blocks + scratch + interm


def _encoder_vmem_limit(tm, d, th, w_bytes, x_bytes, o_bytes):
    est = _encoder_vmem_bytes_est(tm, d, th, w_bytes, x_bytes, o_bytes)
    phys = _physical_vmem_bytes()
    return int(min(0.9 * phys, max(4 * 1024 * 1024, 1.25 * est)))


def _choose_th(d_model, hidden, *, w_bytes=2, tm_hint=256):
    """Largest hidden-block tile whose kernel footprint fits ~70% of VMEM."""
    budget = int(0.7 * _physical_vmem_bytes())
    for th in (2048, 1024, 512, 256, 128):
        if hidden % th != 0:
            continue
        if _encoder_vmem_bytes_est(tm_hint, d_model, th, w_bytes, 2, 2) <= budget:
            return th
    for th in (128, 256, 512, 1024, 2048):
        if hidden % th == 0:
            return th
    return hidden


def _rms_mul(x, g):
    # Exactly as the reference RMS_Norm.forward: x * (sqrt(mean(x^2)) + eps) * g
    norm = jnp.sqrt(jnp.mean(x * x, axis=-1, keepdims=True)) + EPS
    return x * norm * g


# -----------------------------------------------------------------------------
# Fused EncoderBlock kernel (per M tile; hidden dim tiled as reduction axis h):
#   n1  = rms(x, g1)                       (== mha_out, attention unavailable)
#   n2  = rms(n1, g2)
#   out = n1 + sum_h (silu(n2 @ W1_h) * (n2 @ W3_h)) @ W2_h
#   (optionally: out = rms(out, g_final) for the last layer)
# -----------------------------------------------------------------------------
def _encoder_block_kernel(*refs, th, fuse_final):
    if fuse_final:
        (x_ref, g1_ref, g2_ref, w13_ref, w2_ref, gf_ref,
         o_ref, acc_s, n2_s) = refs
    else:
        (x_ref, g1_ref, g2_ref, w13_ref, w2_ref,
         o_ref, acc_s, n2_s) = refs
        gf_ref = None
    h_idx = pl.program_id(1)

    @pl.when(h_idx == 0)
    def _init():
        x = x_ref[...].astype(jnp.float32)
        n1 = _rms_mul(x, g1_ref[...])              # norm1 (== mha_out residual)
        n2 = _rms_mul(n1, g2_ref[...])             # norm2
        acc_s[...] = n1                            # residual folded into acc
        n2_s[...] = n2.astype(n2_s.dtype)          # bf16 MXU LHS, stays resident

    # One wide matmul covering both gate projections of this hidden block.
    hcat = jnp.dot(n2_s[...], w13_ref[0], preferred_element_type=jnp.float32)
    h1 = hcat[:, :th]
    h3 = hcat[:, th:]
    gated = (h1 * jax.nn.sigmoid(h1)) * h3         # SiLU gate in f32 (safe on v5e)
    acc_s[...] += jnp.dot(gated.astype(w2_ref.dtype), w2_ref[0],
                          preferred_element_type=jnp.float32)

    @pl.when(h_idx == pl.num_programs(1) - 1)
    def _finalize():
        y = acc_s[...]
        if fuse_final:
            y = _rms_mul(y, gf_ref[...])           # fused final RMS_Norm
        o_ref[...] = y.astype(o_ref.dtype)


def encoder_block(x2d, g1, g2, w13, w2, *, tm, g_final=None, out_dtype=None):
    M, D = x2d.shape
    n_h, _, th2 = w13.shape
    th = th2 // 2
    assert M % tm == 0
    fuse_final = g_final is not None
    if out_dtype is None:
        out_dtype = x2d.dtype

    kernel = functools.partial(_encoder_block_kernel, th=th,
                               fuse_final=fuse_final)
    in_specs = [
        pl.BlockSpec((tm, D), lambda m, h: (m, 0)),
        pl.BlockSpec((1, D), lambda m, h: (0, 0)),
        pl.BlockSpec((1, D), lambda m, h: (0, 0)),
        pl.BlockSpec((1, D, 2 * th), lambda m, h: (h, 0, 0)),
        pl.BlockSpec((1, th, D), lambda m, h: (h, 0, 0)),
    ]
    args = [x2d, g1.reshape(1, D), g2.reshape(1, D), w13, w2]
    if fuse_final:
        in_specs.append(pl.BlockSpec((1, D), lambda m, h: (0, 0)))
        args.append(g_final.reshape(1, D))

    vmem_limit = _encoder_vmem_limit(
        tm, D, th,
        jnp.dtype(w13.dtype).itemsize,
        jnp.dtype(x2d.dtype).itemsize,
        jnp.dtype(out_dtype).itemsize)

    return pl.pallas_call(
        kernel,
        out_shape=jax.ShapeDtypeStruct((M, D), out_dtype),
        grid=(M // tm, n_h),                        # reduction axis last
        in_specs=in_specs,
        out_specs=pl.BlockSpec((tm, D), lambda m, h: (m, 0)),
        scratch_shapes=[
            pltpu.VMEM((tm, D), jnp.float32),       # acc (residual + FFN out)
            pltpu.VMEM((tm, D), jnp.bfloat16),      # n2 (MXU LHS)
        ],
        compiler_params=pltpu.CompilerParams(
            dimension_semantics=("parallel", "arbitrary"),
            vmem_limit_bytes=vmem_limit,
        ),
    )(*args)


# -----------------------------------------------------------------------------
# Parameters (deterministic, synthetic) + hidden-dim block packing
# -----------------------------------------------------------------------------
def init_raw_params(key, vocab_size, d_model, n_layers):
    keys = jax.random.split(key, 1 + 3 * n_layers)
    emb = jax.random.normal(keys[0], (vocab_size, d_model), jnp.float32)
    d_scale = 1.0 / jnp.sqrt(jnp.float32(d_model))
    h_scale = 1.0 / jnp.sqrt(jnp.float32(4 * d_model))
    layers = []
    for l in range(n_layers):
        k1, k2, k3 = keys[1 + 3 * l: 4 + 3 * l]
        layers.append({
            "g1": jnp.ones((d_model,), jnp.float32),
            "g2": jnp.ones((d_model,), jnp.float32),
            # Weights stored [in, out] (transposed vs. nn.Linear), bf16 for MXU.
            "w1": (jax.random.normal(k1, (d_model, 4 * d_model), jnp.float32)
                   * d_scale).astype(jnp.bfloat16),
            "w3": (jax.random.normal(k2, (d_model, 4 * d_model), jnp.float32)
                   * d_scale).astype(jnp.bfloat16),
            "w2": (jax.random.normal(k3, (4 * d_model, d_model), jnp.float32)
                   * h_scale).astype(jnp.bfloat16),
        })
    return {"embedding": emb, "layers": layers,
            "final_g": jnp.ones((d_model,), jnp.float32)}


def pack_params(raw, th=None):
    """Pack w1/w3 into [n_h, D, 2*TH] (one wide matmul per hidden block) and
    w2 into [n_h, TH, D]. TH is chosen VMEM-aware when not given."""
    d_model = raw["embedding"].shape[1]
    hidden = 4 * d_model
    if th is None:
        th = _choose_th(d_model, hidden,
                        w_bytes=jnp.dtype(raw["layers"][0]["w1"].dtype).itemsize)
    assert hidden % th == 0
    n_h = hidden // th
    packed = []
    for layer in raw["layers"]:
        w1b = layer["w1"].reshape(d_model, n_h, th).transpose(1, 0, 2)
        w3b = layer["w3"].reshape(d_model, n_h, th).transpose(1, 0, 2)
        packed.append({
            "g1": layer["g1"],
            "g2": layer["g2"],
            "w13": jnp.concatenate([w1b, w3b], axis=-1),      # [n_h, D, 2*TH]
            "w2": layer["w2"].reshape(n_h, th, d_model),       # [n_h, TH, D]
        })
    return {"embedding": raw["embedding"], "layers": packed,
            "final_g": raw["final_g"]}


# -----------------------------------------------------------------------------
# Full model forward (bf16 residual stream between layers; final layer fuses
# the final RMS_Norm and emits f32).
# -----------------------------------------------------------------------------
@functools.partial(jax.jit, static_argnames=("tm",))
def model_forward(token_ids, params, *, tm=None):
    B, L = token_ids.shape
    D = params["embedding"].shape[1]
    M = B * L
    if tm is None:
        tm = _choose_tm(M)
    # Embedding lookup (glue, plain JAX gather); bf16 residual stream.
    x2d = jnp.take(params["embedding"], token_ids, axis=0).reshape(M, D)
    x2d = x2d.astype(jnp.bfloat16)
    n_layers = len(params["layers"])
    for i, layer in enumerate(params["layers"]):
        is_last = (i == n_layers - 1)
        # TODO(synk): MHA(normed, image_enc, image_enc) branch unavailable
        # (MHA / ImageEncoder undefined in the reference); only the residual
        # `+ normed_embeddings` term of mha_out is realizable.
        x2d = encoder_block(
            x2d, layer["g1"], layer["g2"], layer["w13"], layer["w2"],
            tm=tm,
            g_final=params["final_g"] if is_last else None,
            out_dtype=jnp.float32 if is_last else jnp.bfloat16)
    return x2d.reshape(B, L, D)


# -----------------------------------------------------------------------------
# Pure-JAX reference (same precision policy) for a correctness check
# -----------------------------------------------------------------------------
def reference_forward(token_ids, raw):
    D = raw["embedding"].shape[1]
    x = jnp.take(raw["embedding"], token_ids, axis=0).reshape(-1, D)
    x = x.astype(jnp.bfloat16)
    n_layers = len(raw["layers"])
    for i, layer in enumerate(raw["layers"]):
        xf = x.astype(jnp.float32)
        n1 = _rms_mul(xf, layer["g1"])
        n2 = _rms_mul(n1, layer["g2"]).astype(jnp.bfloat16)
        h1 = jnp.dot(n2, layer["w1"], preferred_element_type=jnp.float32)
        h3 = jnp.dot(n2, layer["w3"], preferred_element_type=jnp.float32)
        gated = ((h1 * jax.nn.sigmoid(h1)) * h3).astype(jnp.bfloat16)
        y = jnp.dot(gated, layer["w2"], preferred_element_type=jnp.float32) + n1
        if i == n_layers - 1:
            x = y                                  # last layer stays f32
        else:
            x = y.astype(jnp.bfloat16)
    out = _rms_mul(x.astype(jnp.float32), raw["final_g"])
    return out.reshape(token_ids.shape + (D,))


if __name__ == "__main__":
    B, L = 2, 128          # M = 256 -> tm = 128 (two m-tiles, megacore-friendly)
    D_MODEL = 128          # lane-aligned (multiple of 128)
    VOCAB = 256
    N_LAYERS = 2
    TH = 256               # hidden = 512 -> 2 reduction steps (exercises h axis)

    key = jax.random.PRNGKey(0)
    k_tok, k_par = jax.random.split(key)
    token_ids = jax.random.randint(k_tok, (B, L), 0, VOCAB, dtype=jnp.int32)

    raw = init_raw_params(k_par, VOCAB, D_MODEL, N_LAYERS)
    params = pack_params(raw, th=TH)

    out = model_forward(token_ids, params)
    jax.block_until_ready(out)
    assert out.shape == (B, L, D_MODEL)

    ref = reference_forward(token_ids, raw)
    assert jnp.allclose(out, ref, rtol=5e-2, atol=5e-2), (
        "max abs diff = %f" % float(jnp.max(jnp.abs(out - ref))))

    print("KERNEL_OK")
</pallas_src>

<mosaic_0001>
module attributes {stable_mosaic.version = 11 : i64} {
  func.func @_encoder_block_kernel(%arg0: i32, %arg1: i32, %arg2: memref<128x128xbf16, #tpu.memory_space<vmem>>, %arg3: memref<1x128xf32, #tpu.memory_space<vmem>>, %arg4: memref<1x128xf32, #tpu.memory_space<vmem>>, %arg5: memref<1x128x512xbf16, #tpu.memory_space<vmem>>, %arg6: memref<1x256x128xbf16, #tpu.memory_space<vmem>>, %arg7: memref<128x128xbf16, #tpu.memory_space<vmem>>, %arg8: memref<128x128xf32, #tpu.memory_space<vmem>>, %arg9: memref<128x128xbf16, #tpu.memory_space<vmem>>) attributes {dimension_semantics = [#tpu.dimension_semantics<parallel>, #tpu.dimension_semantics<arbitrary>], iteration_bounds = array<i64: 2, 2>, scalar_prefetch = 0 : i64, scratch_operands = 2 : i64, tpu.core_type = #tpu.core_type<tc>, window_params = [{transform_indices = @transform_0, window_bounds = array<i64: 128, 128>}, {pipeline_mode = #tpu.pipeline_mode<synchronous>, transform_indices = @transform_1, window_bounds = array<i64: 1, 128>}, {pipeline_mode = #tpu.pipeline_mode<synchronous>, transform_indices = @transform_2, window_bounds = array<i64: 1, 128>}, {transform_indices = @transform_3, window_bounds = array<i64: 1, 128, 512>}, {transform_indices = @transform_4, window_bounds = array<i64: 1, 256, 128>}, {transform_indices = @transform_5, window_bounds = array<i64: 128, 128>}]} {
    %c0_i32 = arith.constant 0 : i32
    %0 = arith.cmpi eq, %arg1, %c0_i32 : i32
    %1 = arith.extui %0 : i1 to i32
    %c0_i32_0 = arith.constant 0 : i32
    %2 = arith.cmpi ne, %1, %c0_i32_0 : i32
    scf.if %2 {
      %c0_15 = arith.constant 0 : index
      %c0_16 = arith.constant 0 : index
      %26 = vector.load %arg2[%c0_15, %c0_16] : memref<128x128xbf16, #tpu.memory_space<vmem>>, vector<128x128xbf16>
      %27 = arith.extf %26 : vector<128x128xbf16> to vector<128x128xf32>
      %c0_17 = arith.constant 0 : index
      %c0_18 = arith.constant 0 : index
      %28 = vector.load %arg3[%c0_17, %c0_18] : memref<1x128xf32, #tpu.memory_space<vmem>>, vector<1x128xf32>
      %29 = arith.mulf %27, %27 : vector<128x128xf32>
      %cst_19 = arith.constant dense<0.000000e+00> : vector<128xf32>
      %30 = vector.multi_reduction <add>, %29, %cst_19 [1] : vector<128x128xf32> to vector<128xf32>
      %31 = vector.shape_cast %30 : vector<128xf32> to vector<128x1xf32>
      %cst_20 = arith.constant 1.280000e+02 : f32
      %32 = vector.broadcast %cst_20 : f32 to vector<128x1xf32>
      %33 = arith.divf %31, %32 : vector<128x1xf32>
      %34 = math.sqrt %33 : vector<128x1xf32>
      %cst_21 = arith.constant 9.99999974E-5 : f32
      %35 = vector.broadcast %cst_21 : f32 to vector<128x1xf32>
      %36 = arith.addf %34, %35 : vector<128x1xf32>
      %37 = vector.broadcast %36 : vector<128x1xf32> to vector<128x128xf32>
      %38 = arith.mulf %27, %37 : vector<128x128xf32>
      %39 = vector.broadcast %28 : vector<1x128xf32> to vector<128x128xf32>
      %40 = arith.mulf %38, %39 : vector<128x128xf32>
      %c0_22 = arith.constant 0 : index
      %c0_23 = arith.constant 0 : index
      %41 = vector.load %arg4[%c0_22, %c0_23] : memref<1x128xf32, #tpu.memory_space<vmem>>, vector<1x128xf32>
      %42 = arith.mulf %40, %40 : vector<128x128xf32>
      %cst_24 = arith.constant dense<0.000000e+00> : vector<128xf32>
      %43 = vector.multi_reduction <add>, %42, %cst_24 [1] : vector<128x128xf32> to vector<128xf32>
      %44 = vector.shape_cast %43 : vector<128xf32> to vector<128x1xf32>
      %cst_25 = arith.constant 1.280000e+02 : f32
      %45 = vector.broadcast %cst_25 : f32 to vector<128x1xf32>
      %46 = arith.divf %44, %45 : vector<128x1xf32>
      %47 = math.sqrt %46 : vector<128x1xf32>
      %cst_26 = arith.constant 9.99999974E-5 : f32
      %48 = vector.broadcast %cst_26 : f32 to vector<128x1xf32>
      %49 = arith.addf %47, %48 : vector<128x1xf32>
      %50 = vector.broadcast %49 : vector<128x1xf32> to vector<128x128xf32>
      %51 = arith.mulf %40, %50 : vector<128x128xf32>
      %52 = vector.broadcast %41 : vector<1x128xf32> to vector<128x128xf32>
      %53 = arith.mulf %51, %52 : vector<128x128xf32>
      %c0_27 = arith.constant 0 : index
      %c0_28 = arith.constant 0 : index
      %54 = vector.load %arg8[%c0_27, %c0_28] : memref<128x128xf32, #tpu.memory_space<vmem>>, vector<128x128xf32>
      tpu.vector_store %arg8[%c0_27, %c0_28], %40 {strides = array<i32>} : memref<128x128xf32, #tpu.memory_space<vmem>>, vector<128x128xf32>,
      %55 = arith.truncf %53 : vector<128x128xf32> to vector<128x128xbf16>
      %c0_29 = arith.constant 0 : index
      %c0_30 = arith.constant 0 : index
      %56 = vector.load %arg9[%c0_29, %c0_30] : memref<128x128xbf16, #tpu.memory_space<vmem>>, vector<128x128xbf16>
      tpu.vector_store %arg9[%c0_29, %c0_30], %55 {strides = array<i32>} : memref<128x128xbf16, #tpu.memory_space<vmem>>, vector<128x128xbf16>,
    } else {
    }
    %c0 = arith.constant 0 : index
    %c0_1 = arith.constant 0 : index
    %3 = vector.load %arg9[%c0, %c0_1] : memref<128x128xbf16, #tpu.memory_space<vmem>>, vector<128x128xbf16>
    %c0_2 = arith.constant 0 : index
    %c0_3 = arith.constant 0 : index
    %c0_4 = arith.constant 0 : index
    %4 = vector.load %arg5[%c0_2, %c0_3, %c0_4] : memref<1x128x512xbf16, #tpu.memory_space<vmem>>, vector<1x128x512xbf16>
    %5 = vector.shape_cast %4 : vector<1x128x512xbf16> to vector<128x512xbf16>
    %cst = arith.constant dense<0.000000e+00> : vector<128x512xf32>
    %6 = tpu.matmul %3, %5, %cst {dimension_numbers = #tpu.dot_dimension_numbers<[1], [0], [0], [1], [0, 0, 1, 1], [], []>} : vector<128x128xbf16>, vector<128x512xbf16>, vector<128x512xf32> -> vector<128x512xf32>
    %7 = vector.extract_strided_slice %6 {offsets = [0, 0], sizes = [128, 256], strides = [1, 1]} : vector<128x512xf32> to vector<128x256xf32>
    %8 = vector.extract_strided_slice %6 {offsets = [0, 256], sizes = [128, 256], strides = [1, 1]} : vector<128x512xf32> to vector<128x256xf32>
    %9 = arith.negf %7 : vector<128x256xf32>
    %10 = math.exp %9 : vector<128x256xf32>
    %cst_5 = arith.constant 1.000000e+00 : f32
    %11 = vector.broadcast %cst_5 : f32 to vector<128x256xf32>
    %12 = arith.addf %11, %10 : vector<128x256xf32>
    %13 = arith.divf %11, %12 : vector<128x256xf32>
    %14 = arith.mulf %7, %13 : vector<128x256xf32>
    %15 = arith.mulf %14, %8 : vector<128x256xf32>
    %c0_6 = arith.constant 0 : index
    %c0_7 = arith.constant 0 : index
    %16 = vector.load %arg8[%c0_6, %c0_7] : memref<128x128xf32, #tpu.memory_space<vmem>>, vector<128x128xf32>
    %17 = arith.truncf %15 : vector<128x256xf32> to vector<128x256xbf16>
    %c0_8 = arith.constant 0 : index
    %c0_9 = arith.constant 0 : index
    %c0_10 = arith.constant 0 : index
    %18 = vector.load %arg6[%c0_8, %c0_9, %c0_10] : memref<1x256x128xbf16, #tpu.memory_space<vmem>>, vector<1x256x128xbf16>
    %19 = vector.shape_cast %18 : vector<1x256x128xbf16> to vector<256x128xbf16>
    %cst_11 = arith.constant dense<0.000000e+00> : vector<128x128xf32>
    %20 = tpu.matmul %17, %19, %cst_11 {dimension_numbers = #tpu.dot_dimension_numbers<[1], [0], [0], [1], [0, 0, 1, 1], [], []>} : vector<128x256xbf16>, vector<256x128xbf16>, vector<128x128xf32> -> vector<128x128xf32>
    %21 = arith.addf %16, %20 : vector<128x128xf32>
    %c0_12 = arith.constant 0 : index
    %c0_13 = arith.constant 0 : index
    %22 = vector.load %arg8[%c0_12, %c0_13] : memref<128x128xf32, #tpu.memory_space<vmem>>, vector<128x128xf32>
    tpu.vector_store %arg8[%c0_12, %c0_13], %21 {strides = array<i32>} : memref<128x128xf32, #tpu.memory_space<vmem>>, vector<128x128xf32>,
    %c1_i32 = arith.constant 1 : i32
    %23 = arith.cmpi eq, %arg1, %c1_i32 : i32
    %24 = arith.extui %23 : i1 to i32
    %c0_i32_14 = arith.constant 0 : i32
    %25 = arith.cmpi ne, %24, %c0_i32_14 : i32
    scf.if %25 {
      %c0_15 = arith.constant 0 : index
      %c0_16 = arith.constant 0 : index
      %26 = vector.load %arg8[%c0_15, %c0_16] : memref<128x128xf32, #tpu.memory_space<vmem>>, vector<128x128xf32>
      %27 = arith.truncf %26 : vector<128x128xf32> to vector<128x128xbf16>
      %c0_17 = arith.constant 0 : index
      %c0_18 = arith.constant 0 : index
      %28 = vector.load %arg7[%c0_17, %c0_18] : memref<128x128xbf16, #tpu.memory_space<vmem>>, vector<128x128xbf16>
      tpu.vector_store %arg7[%c0_17, %c0_18], %27 {strides = array<i32>} : memref<128x128xbf16, #tpu.memory_space<vmem>>, vector<128x128xbf16>,
    } else {
    }
    return
  }
  func.func @transform_0(%arg0: i32, %arg1: i32) -> (i32, i32) {
    %c0_i32 = arith.constant 0 : i32
    %c0_i32_0 = arith.constant 0 : i32
    return %arg0, %c0_i32 : i32, i32
  }
  func.func @transform_1(%arg0: i32, %arg1: i32) -> (i32, i32) {
    %c0_i32 = arith.constant 0 : i32
    %c0_i32_0 = arith.constant 0 : i32
    %c0_i32_1 = arith.constant 0 : i32
    return %c0_i32, %c0_i32_0 : i32, i32
  }
  func.func @transform_2(%arg0: i32, %arg1: i32) -> (i32, i32) {
    %c0_i32 = arith.constant 0 : i32
    %c0_i32_0 = arith.constant 0 : i32
    %c0_i32_1 = arith.constant 0 : i32
    return %c0_i32, %c0_i32_0 : i32, i32
  }
  func.func @transform_3(%arg0: i32, %arg1: i32) -> (i32, i32, i32) {
    %c0_i32 = arith.constant 0 : i32
    %c0_i32_0 = arith.constant 0 : i32
    %c0_i32_1 = arith.constant 0 : i32
    return %arg1, %c0_i32, %c0_i32_0 : i32, i32, i32
  }
  func.func @transform_4(%arg0: i32, %arg1: i32) -> (i32, i32, i32) {
    %c0_i32 = arith.constant 0 : i32
    %c0_i32_0 = arith.constant 0 : i32
    %c0_i32_1 = arith.constant 0 : i32
    return %arg1, %c0_i32, %c0_i32_0 : i32, i32, i32
  }
  func.func @transform_5(%arg0: i32, %arg1: i32) -> (i32, i32) {
    %c0_i32 = arith.constant 0 : i32
    %c0_i32_0 = arith.constant 0 : i32
    return %arg0, %c0_i32 : i32, i32
  }
}

module attributes {stable_mosaic.version = 11 : i64} {
  func.func @_encoder_block_kernel(%arg0: i32, %arg1: i32, %arg2: memref<128x128xbf16, #tpu.memory_space<vmem>>, %arg3: memref<1x128xf32, #tpu.memory_space<vmem>>, %arg4: memref<1x128xf32, #tpu.memory_space<vmem>>, %arg5: memref<1x128x512xbf16, #tpu.memory_space<vmem>>, %arg6: memref<1x256x128xbf16, #tpu.memory_space<vmem>>, %arg7: memref<1x128xf32, #tpu.memory_space<vmem>>, %arg8: memref<128x128xf32, #tpu.memory_space<vmem>>, %arg9: memref<128x128xf32, #tpu.memory_space<vmem>>, %arg10: memref<128x128xbf16, #tpu.memory_space<vmem>>) attributes {dimension_semantics = [#tpu.dimension_semantics<parallel>, #tpu.dimension_semantics<arbitrary>], iteration_bounds = array<i64: 2, 2>, scalar_prefetch = 0 : i64, scratch_operands = 2 : i64, tpu.core_type = #tpu.core_type<tc>, window_params = [{transform_indices = @transform_0, window_bounds = array<i64: 128, 128>}, {pipeline_mode = #tpu.pipeline_mode<synchronous>, transform_indices = @transform_1, window_bounds = array<i64: 1, 128>}, {pipeline_mode = #tpu.pipeline_mode<synchronous>, transform_indices = @transform_2, window_bounds = array<i64: 1, 128>}, {transform_indices = @transform_3, window_bounds = array<i64: 1, 128, 512>}, {transform_indices = @transform_4, window_bounds = array<i64: 1, 256, 128>}, {pipeline_mode = #tpu.pipeline_mode<synchronous>, transform_indices = @transform_5, window_bounds = array<i64: 1, 128>}, {transform_indices = @transform_6, window_bounds = array<i64: 128, 128>}]} {
    %c0_i32 = arith.constant 0 : i32
    %0 = arith.cmpi eq, %arg1, %c0_i32 : i32
    %1 = arith.extui %0 : i1 to i32
    %c0_i32_0 = arith.constant 0 : i32
    %2 = arith.cmpi ne, %1, %c0_i32_0 : i32
    scf.if %2 {
      %c0_15 = arith.constant 0 : index
      %c0_16 = arith.constant 0 : index
      %26 = vector.load %arg2[%c0_15, %c0_16] : memref<128x128xbf16, #tpu.memory_space<vmem>>, vector<128x128xbf16>
      %27 = arith.extf %26 : vector<128x128xbf16> to vector<128x128xf32>
      %c0_17 = arith.constant 0 : index
      %c0_18 = arith.constant 0 : index
      %28 = vector.load %arg3[%c0_17, %c0_18] : memref<1x128xf32, #tpu.memory_space<vmem>>, vector<1x128xf32>
      %29 = arith.mulf %27, %27 : vector<128x128xf32>
      %cst_19 = arith.constant dense<0.000000e+00> : vector<128xf32>
      %30 = vector.multi_reduction <add>, %29, %cst_19 [1] : vector<128x128xf32> to vector<128xf32>
      %31 = vector.shape_cast %30 : vector<128xf32> to vector<128x1xf32>
      %cst_20 = arith.constant 1.280000e+02 : f32
      %32 = vector.broadcast %cst_20 : f32 to vector<128x1xf32>
      %33 = arith.divf %31, %32 : vector<128x1xf32>
      %34 = math.sqrt %33 : vector<128x1xf32>
      %cst_21 = arith.constant 9.99999974E-5 : f32
      %35 = vector.broadcast %cst_21 : f32 to vector<128x1xf32>
      %36 = arith.addf %34, %35 : vector<128x1xf32>
      %37 = vector.broadcast %36 : vector<128x1xf32> to vector<128x128xf32>
      %38 = arith.mulf %27, %37 : vector<128x128xf32>
      %39 = vector.broadcast %28 : vector<1x128xf32> to vector<128x128xf32>
      %40 = arith.mulf %38, %39 : vector<128x128xf32>
      %c0_22 = arith.constant 0 : index
      %c0_23 = arith.constant 0 : index
      %41 = vector.load %arg4[%c0_22, %c0_23] : memref<1x128xf32, #tpu.memory_space<vmem>>, vector<1x128xf32>
      %42 = arith.mulf %40, %40 : vector<128x128xf32>
      %cst_24 = arith.constant dense<0.000000e+00> : vector<128xf32>
      %43 = vector.multi_reduction <add>, %42, %cst_24 [1] : vector<128x128xf32> to vector<128xf32>
      %44 = vector.shape_cast %43 : vector<128xf32> to vector<128x1xf32>
      %cst_25 = arith.constant 1.280000e+02 : f32
      %45 = vector.broadcast %cst_25 : f32 to vector<128x1xf32>
      %46 = arith.divf %44, %45 : vector<128x1xf32>
      %47 = math.sqrt %46 : vector<128x1xf32>
      %cst_26 = arith.constant 9.99999974E-5 : f32
      %48 = vector.broadcast %cst_26 : f32 to vector<128x1xf32>
      %49 = arith.addf %47, %48 : vector<128x1xf32>
      %50 = vector.broadcast %49 : vector<128x1xf32> to vector<128x128xf32>
      %51 = arith.mulf %40, %50 : vector<128x128xf32>
      %52 = vector.broadcast %41 : vector<1x128xf32> to vector<128x128xf32>
      %53 = arith.mulf %51, %52 : vector<128x128xf32>
      %c0_27 = arith.constant 0 : index
      %c0_28 = arith.constant 0 : index
      %54 = vector.load %arg9[%c0_27, %c0_28] : memref<128x128xf32, #tpu.memory_space<vmem>>, vector<128x128xf32>
      tpu.vector_store %arg9[%c0_27, %c0_28], %40 {strides = array<i32>} : memref<128x128xf32, #tpu.memory_space<vmem>>, vector<128x128xf32>,
      %55 = arith.truncf %53 : vector<128x128xf32> to vector<128x128xbf16>
      %c0_29 = arith.constant 0 : index
      %c0_30 = arith.constant 0 : index
      %56 = vector.load %arg10[%c0_29, %c0_30] : memref<128x128xbf16, #tpu.memory_space<vmem>>, vector<128x128xbf16>
      tpu.vector_store %arg10[%c0_29, %c0_30], %55 {strides = array<i32>} : memref<128x128xbf16, #tpu.memory_space<vmem>>, vector<128x128xbf16>,
    } else {
    }
    %c0 = arith.constant 0 : index
    %c0_1 = arith.constant 0 : index
    %3 = vector.load %arg10[%c0, %c0_1] : memref<128x128xbf16, #tpu.memory_space<vmem>>, vector<128x128xbf16>
    %c0_2 = arith.constant 0 : index
    %c0_3 = arith.constant 0 : index
    %c0_4 = arith.constant 0 : index
    %4 = vector.load %arg5[%c0_2, %c0_3, %c0_4] : memref<1x128x512xbf16, #tpu.memory_space<vmem>>, vector<1x128x512xbf16>
    %5 = vector.shape_cast %4 : vector<1x128x512xbf16> to vector<128x512xbf16>
    %cst = arith.constant dense<0.000000e+00> : vector<128x512xf32>
    %6 = tpu.matmul %3, %5, %cst {dimension_numbers = #tpu.dot_dimension_numbers<[1], [0], [0], [1], [0, 0, 1, 1], [], []>} : vector<128x128xbf16>, vector<128x512xbf16>, vector<128x512xf32> -> vector<128x512xf32>
    %7 = vector.extract_strided_slice %6 {offsets = [0, 0], sizes = [128, 256], strides = [1, 1]} : vector<128x512xf32> to vector<128x256xf32>
    %8 = vector.extract_strided_slice %6 {offsets = [0, 256], sizes = [128, 256], strides = [1, 1]} : vector<128x512xf32> to vector<128x256xf32>
    %9 = arith.negf %7 : vector<128x256xf32>
    %10 = math.exp %9 : vector<128x256xf32>
    %cst_5 = arith.constant 1.000000e+00 : f32
    %11 = vector.broadcast %cst_5 : f32 to vector<128x256xf32>
    %12 = arith.addf %11, %10 : vector<128x256xf32>
    %13 = arith.divf %11, %12 : vector<128x256xf32>
    %14 = arith.mulf %7, %13 : vector<128x256xf32>
    %15 = arith.mulf %14, %8 : vector<128x256xf32>
    %c0_6 = arith.constant 0 : index
    %c0_7 = arith.constant 0 : index
    %16 = vector.load %arg9[%c0_6, %c0_7] : memref<128x128xf32, #tpu.memory_space<vmem>>, vector<128x128xf32>
    %17 = arith.truncf %15 : vector<128x256xf32> to vector<128x256xbf16>
    %c0_8 = arith.constant 0 : index
    %c0_9 = arith.constant 0 : index
    %c0_10 = arith.constant 0 : index
    %18 = vector.load %arg6[%c0_8, %c0_9, %c0_10] : memref<1x256x128xbf16, #tpu.memory_space<vmem>>, vector<1x256x128xbf16>
    %19 = vector.shape_cast %18 : vector<1x256x128xbf16> to vector<256x128xbf16>
    %cst_11 = arith.constant dense<0.000000e+00> : vector<128x128xf32>
    %20 = tpu.matmul %17, %19, %cst_11 {dimension_numbers = #tpu.dot_dimension_numbers<[1], [0], [0], [1], [0, 0, 1, 1], [], []>} : vector<128x256xbf16>, vector<256x128xbf16>, vector<128x128xf32> -> vector<128x128xf32>
    %21 = arith.addf %16, %20 : vector<128x128xf32>
    %c0_12 = arith.constant 0 : index
    %c0_13 = arith.constant 0 : index
    %22 = vector.load %arg9[%c0_12, %c0_13] : memref<128x128xf32, #tpu.memory_space<vmem>>, vector<128x128xf32>
    tpu.vector_store %arg9[%c0_12, %c0_13], %21 {strides = array<i32>} : memref<128x128xf32, #tpu.memory_space<vmem>>, vector<128x128xf32>,
    %c1_i32 = arith.constant 1 : i32
    %23 = arith.cmpi eq, %arg1, %c1_i32 : i32
    %24 = arith.extui %23 : i1 to i32
    %c0_i32_14 = arith.constant 0 : i32
    %25 = arith.cmpi ne, %24, %c0_i32_14 : i32
    scf.if %25 {
      %c0_15 = arith.constant 0 : index
      %c0_16 = arith.constant 0 : index
      %26 = vector.load %arg9[%c0_15, %c0_16] : memref<128x128xf32, #tpu.memory_space<vmem>>, vector<128x128xf32>
      %c0_17 = arith.constant 0 : index
      %c0_18 = arith.constant 0 : index
      %27 = vector.load %arg7[%c0_17, %c0_18] : memref<1x128xf32, #tpu.memory_space<vmem>>, vector<1x128xf32>
      %28 = arith.mulf %26, %26 : vector<128x128xf32>
      %cst_19 = arith.constant dense<0.000000e+00> : vector<128xf32>
      %29 = vector.multi_reduction <add>, %28, %cst_19 [1] : vector<128x128xf32> to vector<128xf32>
      %30 = vector.shape_cast %29 : vector<128xf32> to vector<128x1xf32>
      %cst_20 = arith.constant 1.280000e+02 : f32
      %31 = vector.broadcast %cst_20 : f32 to vector<128x1xf32>
      %32 = arith.divf %30, %31 : vector<128x1xf32>
      %33 = math.sqrt %32 : vector<128x1xf32>
      %cst_21 = arith.constant 9.99999974E-5 : f32
      %34 = vector.broadcast %cst_21 : f32 to vector<128x1xf32>
      %35 = arith.addf %33, %34 : vector<128x1xf32>
      %36 = vector.broadcast %35 : vector<128x1xf32> to vector<128x128xf32>
      %37 = arith.mulf %26, %36 : vector<128x128xf32>
      %38 = vector.broadcast %27 : vector<1x128xf32> to vector<128x128xf32>
      %39 = arith.mulf %37, %38 : vector<128x128xf32>
      %c0_22 = arith.constant 0 : index
      %c0_23 = arith.constant 0 : index
      %40 = vector.load %arg8[%c0_22, %c0_23] : memref<128x128xf32, #tpu.memory_space<vmem>>, vector<128x128xf32>
      tpu.vector_store %arg8[%c0_22, %c0_23], %39 {strides = array<i32>} : memref<128x128xf32, #tpu.memory_space<vmem>>, vector<128x128xf32>,
    } else {
    }
    return
  }
  func.func @transform_0(%arg0: i32, %arg1: i32) -> (i32, i32) {
    %c0_i32 = arith.constant 0 : i32
    %c0_i32_0 = arith.constant 0 : i32
    return %arg0, %c0_i32 : i32, i32
  }
  func.func @transform_1(%arg0: i32, %arg1: i32) -> (i32, i32) {
    %c0_i32 = arith.constant 0 : i32
    %c0_i32_0 = arith.constant 0 : i32
    %c0_i32_1 = arith.constant 0 : i32
    return %c0_i32, %c0_i32_0 : i32, i32
  }
  func.func @transform_2(%arg0: i32, %arg1: i32) -> (i32, i32) {
    %c0_i32 = arith.constant 0 : i32
    %c0_i32_0 = arith.constant 0 : i32
    %c0_i32_1 = arith.constant 0 : i32
    return %c0_i32, %c0_i32_0 : i32, i32
  }
  func.func @transform_3(%arg0: i32, %arg1: i32) -> (i32, i32, i32) {
    %c0_i32 = arith.constant 0 : i32
    %c0_i32_0 = arith.constant 0 : i32
    %c0_i32_1 = arith.constant 0 : i32
    return %arg1, %c0_i32, %c0_i32_0 : i32, i32, i32
  }
  func.func @transform_4(%arg0: i32, %arg1: i32) -> (i32, i32, i32) {
    %c0_i32 = arith.constant 0 : i32
    %c0_i32_0 = arith.constant 0 : i32
    %c0_i32_1 = arith.constant 0 : i32
    return %arg1, %c0_i32, %c0_i32_0 : i32, i32, i32
  }
  func.func @transform_5(%arg0: i32, %arg1: i32) -> (i32, i32) {
    %c0_i32 = arith.constant 0 : i32
    %c0_i32_0 = arith.constant 0 : i32
    %c0_i32_1 = arith.constant 0 : i32
    return %c0_i32, %c0_i32_0 : i32, i32
  }
  func.func @transform_6(%arg0: i32, %arg1: i32) -> (i32, i32) {
    %c0_i32 = arith.constant 0 : i32
    %c0_i32_0 = arith.constant 0 : i32
    return %arg0, %c0_i32 : i32, i32
  }
}

</mosaic_0001>

<bundles_post_ra>
// kernel: model_forward.3
= control target key start
LH: loop header
LB: loop body
LE: loop exit
PB: predicated region body
PF: predicated region fallthrough
CT: control target
= control target key end

     0   :  { %11 = vsyncpa [#allocation5], 0  ;;  %s4064_s0 = inlined_call_operand.vmem [shape: bf16[256,128], index: 0, kind: input, shape index: {}]   ;;  %s4065_s1 = inlined_call_operand.vmem [shape: f32[1,128], index: 1, kind: input, shape index: {}]   ;;  %s4066_s2 = inlined_call_operand.vmem [shape: f32[1,128], index: 2, kind: input, shape index: {}]   ;;  %s4067_s3 = inlined_call_operand.vmem [shape: bf16[2,128,512], index: 3, kind: input, shape index: {}]   ;;  %s4068_s4 = inlined_call_operand.vmem [shape: bf16[2,256,128], index: 4, kind: input, shape index: {}]   ;;  %s4069_s5 = inlined_call_operand.vmem [shape: f32[1,128], index: 5, kind: input, shape index: {}]   ;;  %s4070_s6 = inlined_call_operand.hbm [shape: f32[256,128], index: 6, kind: output, shape index: {}]  }
   0x1   :  { %13 = vsyncpa [#allocation5 + $0x1], 0  ;;  %s2908_s21 = smov 0   ;;  %s2910_s22 = smov 0  }
   0x2   :  { %s2912_s23 = smov 0   ;;  %s2914_s24 = smov 0  }
   0x3   :  { %s2916_s25 = smov 0   ;;  %s2918_s26 = smov 0  }
   0x4   :  { %s2920_s27 = smov 0   ;;  %s2922_s28 = smov 0  }
   0x5 LB: > { %4075 = sst [smem:[#allocation7_spill]] %s2859_s26  ;;  %s2187_s29 = sadd.s32 4294967295, %s2867_s28   ;;  %s2867_s28 = sphi %s2922_s28, %s19_s28   ;;  %s2863_s27 = sphi %s2920_s27, %s4087_s27   ;;  %s2859_s26 = sphi %s2918_s26, %s4086_s26   ;;  %s2855_s25 = sphi %s2916_s25, %s4085_s25   ;;  %s2851_s24 = sphi %s2914_s24, %s4084_s24   ;;  %s2847_s23 = sphi %s2912_s23, %s4090_s23   ;;  %s2843_s22 = sphi %s2910_s22, %s4089_s22   ;;  %s2839_s21 = sphi %s2908_s21, %s4088_s21  }
   0x6   : > { %4076 = sst [smem:[#allocation8_spill]] %s2863_s27  ;;  %s2188_s30 = sadd.s32 4294967294, %s2867_s28  }
   0x7   : > { %s28_s7 = sadd.s32 1, %s2859_s26  ;;  %s31_s8 = sadd.s32 1, %s2863_s27 }
   0x8   : > { %p29_p0 = scmp.ge.s32.totalorder %s28_s7, 2  ;;  %p189_p1 = scmp.ne.s32.totalorder %s2847_s23, %s2843_s22 }
   0x9   : > { %p190_p2 = scmp.eq.s32.totalorder %s2187_s29, 3  ;;  %p195_p4 = scmp.ne.s32.totalorder %s2843_s22, %s2839_s21 }
   0xa   : > { %s4092_s7 = smov (%p29_p0, %s28_s7), 0  ;;  %s4094_s8 = smov (!%p29_p0, %s31_s8), %s2863_s27 }
   0xb   : > { %4077 = sst [smem:[#allocation9_spill]] %s4092_s7  ;;  %p2957_p3 = por %p190_p2, %p189_p1 }
   0xc   : > { %p33_p5 = scmp.ge.s32.totalorder %s4094_s8, 2  ;;  %p196_p6 = scmp.eq.s32.totalorder %s2188_s30, 3 }
   0xd   : > { %p2191_p7 = scmp.ge.s32.totalorder %s2867_s28, 1  ;;  %p248_p8 = scmp.lt.s32.totalorder %s2867_s28, 5 }
   0xe   : > { %s4096_s8 = smov (%p33_p5, %s4094_s8), 0  ;;  %p2967_p9 = por %p196_p6, %p195_p4 }
   0xf   : > { %4079 = sst [smem:[#allocation10_spill]] %s4096_s8  ;;  %p249_p10 = pnand %p2191_p7, %p248_p8 }
  0x10   : > { %s176_s11 = ssub.s32 %s2863_s27, %s4096_s8  ;;  %s179_s12 = sadd.s32 1, %s2847_s23 }
  0x11   : > { %p177_p11 = scmp.eq.s32.totalorder %s176_s11, 0  ;;  %252 = sbr.rel (%p249_p10) target bundleno = 1196 (0x4ac), region = 44 }
  0x12   : > { %s4074_s14 = sand.u32 (!%p249_p10), 1, %s2843_s22   ;;  %s2193_s15 = sshll.u32 (!%p249_p10), %s2855_s25, 4 }
  0x13   : > { %s2975_s13 = scalar_select %p177_p11, %s2847_s23, %s179_s12  }
  0x14   : > { %s2192_s16 = sshll.u32 (!%p249_p10), %s4074_s14, 7  ;;  %p289_p12 = scmp.lt.s32.totalorder (!%p249_p10), %s2193_s15, 31 }
  0x15   : > { %4081 = sst [smem:[#allocation11_spill]] %s2975_s13  ;;  %p294_p13 = scmp.lt.s32.totalorder (!%p249_p10), %s2851_s24, 1 }
  0x16   : > { %s2998_s13 = scalar_lea.vmem (!%p249_p10), [#allocation4], %s2192_s16  ;;  %p2199_p0 = scmp.ne.s32.totalorder (!%p249_p10), %s2851_s24, 0 }
  0x18   : > { %s4098_s15 = smov (!%p289_p12, %s2193_s15), 31  ;;  %309 = sbr.rel (%p2199_p0) target bundleno = 407 (0x197), region = 48 }
  0x19   : > { %s295_s17 = scalar_select %p294_p13, %s2851_s24, 1 }
  0x1a   : > { %s2194_s18 = sshll.u32 %s4098_s15, 2 }
  0x1b   : > { %s2986_s29 = scalar_lea.vmem %s4064_s0, %s2194_s18  ;;  %s2289_s30 = sshll.u32 %s295_s17, 8 }
  0x1c   : > { %s2991_s8 = scalar_lea.vmem %s4067_s3, %s2289_s30  ;;  %s2290_s7 = sshll.u32 %s295_s17, 7  ;;  %v2324_v0 = vld [vmem:[%s2986_s29 + $0x8] sm:$0xff] (!%p2199_p0)   ;;  %v2293_v1 = vld [vmem:[%s2986_s29] sm:$0xff] (!%p2199_p0)   ;;  %v2325_v6 = vld [vmem:[%s2986_s29 + $0x10] sm:$0xff] (!%p2199_p0)  }
  0x1d   : > { %s2996_s14 = scalar_lea.vmem %s4068_s4, %s2290_s7  ;;  %v3003_v2 = vunpack.c.l.bf16 (!%p2199_p0), %v2324_v0  ;;  %v3005_v3 = vunpack.c.l.bf16 (!%p2199_p0), %v2293_v1  ;;  %v3007_v4 = vunpack.c.h.bf16 (!%p2199_p0), %v2324_v0  ;;  %v3009_v5 = vunpack.c.h.bf16 (!%p2199_p0), %v2293_v1  ;;  %v2326_v13 = vld [vmem:[%s2986_s29 + $0x18] sm:$0xff] (!%p2199_p0)   ;;  %v2327_v18 = vld [vmem:[%s2986_s29 + $0x20] sm:$0xff] (!%p2199_p0)   ;;  %v2328_v23 = vld [vmem:[%s2986_s29 + $0x28] sm:$0xff] (!%p2199_p0)  }
  0x1e   : > { %v3020_v11 = vunpack.c.h.bf16 (!%p2199_p0), %v2325_v6  ;;  %v3022_v12 = vunpack.c.l.bf16 (!%p2199_p0), %v2325_v6  ;;  %v3029_v16 = vunpack.c.h.bf16 (!%p2199_p0), %v2326_v13  ;;  %v3031_v17 = vunpack.c.l.bf16 (!%p2199_p0), %v2326_v13  ;;  %v2329_v28 = vld [vmem:[%s2986_s29 + $0x30] sm:$0xff] (!%p2199_p0)   ;;  %v2330_v33 = vld [vmem:[%s2986_s29 + $0x38] sm:$0xff] (!%p2199_p0)  }
  0x1f   : > { %v345_v7 = vmul.f32 %v3003_v2, %v3003_v2  ;;  %v343_v8 = vmul.f32 %v3005_v3, %v3005_v3  ;;  %v346_v9 = vmul.f32 %v3007_v4, %v3007_v4  ;;  %v344_v10 = vmul.f32 %v3009_v5, %v3009_v5 }
  0x20   : > { %v348_v14 = vmul.f32 %v3020_v11, %v3020_v11  ;;  %v347_v15 = vmul.f32 %v3022_v12, %v3022_v12  ;;  %v350_v19 = vmul.f32 %v3029_v16, %v3029_v16  ;;  %v349_v20 = vmul.f32 %v3031_v17, %v3031_v17 }
  0x21   : > { %363 = vadd.xlane.f32.xlu1 %v345_v7  ;;  %359 = vadd.xlane.f32.xlu0 %v343_v8  ;;  %v3038_v21 = vunpack.c.h.bf16 %v2327_v18  ;;  %v3040_v22 = vunpack.c.l.bf16 %v2327_v18  ;;  %v3047_v26 = vunpack.c.h.bf16 %v2328_v23  ;;  %v3049_v27 = vunpack.c.l.bf16 %v2328_v23 }
  0x22   : > { %v3056_v31 = vunpack.c.h.bf16 %v2329_v28  ;;  %v3058_v32 = vunpack.c.l.bf16 %v2329_v28  ;;  %v3065_v36 = vunpack.c.h.bf16 %v2330_v33  ;;  %v3067_v37 = vunpack.c.l.bf16 %v2330_v33 }
  0x23   : > { %v352_v24 = vmul.f32 %v3038_v21, %v3038_v21  ;;  %v351_v25 = vmul.f32 %v3040_v22, %v3040_v22  ;;  %v354_v29 = vmul.f32 %v3047_v26, %v3047_v26  ;;  %v353_v30 = vmul.f32 %v3049_v27, %v3049_v27 }
  0x24   : > { %v356_v34 = vmul.f32 %v3056_v31, %v3056_v31  ;;  %v355_v35 = vmul.f32 %v3058_v32, %v3058_v32  ;;  %v358_v38 = vmul.f32 %v3065_v36, %v3065_v36  ;;  %v357_v39 = vmul.f32 %v3067_v37, %v3067_v37 }
  0x25   : > { %365 = vadd.xlane.f32.xlu1 %v346_v9  ;;  %361 = vadd.xlane.f32.xlu0 %v344_v10 }
  0x29   : > { %369 = vadd.xlane.f32.xlu1 %v348_v14  ;;  %367 = vadd.xlane.f32.xlu0 %v347_v15 }
  0x2d   : > { %373 = vadd.xlane.f32.xlu1 %v350_v19  ;;  %371 = vadd.xlane.f32.xlu0 %v349_v20 }
  0x31   : > { %377 = vadd.xlane.f32.xlu1 %v352_v24  ;;  %375 = vadd.xlane.f32.xlu0 %v351_v25  ;;  %v3116_v24 = vld [vmem:[%s4065_s1] ss:$0 sm:$0xff] }
  0x35   : > { %381 = vadd.xlane.f32.xlu1 %v354_v29  ;;  %379 = vadd.xlane.f32.xlu0 %v353_v30 }
  0x39   : > { %385 = vadd.xlane.f32.xlu1 %v356_v34  ;;  %383 = vadd.xlane.f32.xlu0 %v355_v35 }
  0x3d   : > { %389 = vadd.xlane.f32.xlu1 %v358_v38  ;;  %387 = vadd.xlane.f32.xlu0 %v357_v39 }
  0xae   : > { %v364_v40 = vpop.xlane.xlu1 %363  ;;  %v360_v41 = vpop.xlane.xlu0 %359 }
  0xaf   : > { %v394_v42 = vmul.f32 0.0078125, %v364_v40  ;;  %v392_v43 = vmul.f32 0.0078125, %v360_v41 }
  0xb1   : > { %2485 = vrsqrt.f32 %v394_v42  ;;  %vm410_vm0 = vcmp.eq.f32.partialorder %v392_v43, inf  ;;  %vm412_vm1 = vcmp.eq.f32.partialorder %v392_v43, 0.0  ;;  %v413_v54 = vand.u32 2147483648, %v392_v43 }
  0xb2   : > { %2487 = vrsqrt.f32 %v392_v43  ;;  %v366_v44 = vpop.xlane.xlu1 %365  ;;  %v362_v45 = vpop.xlane.xlu0 %361  ;;  %vm424_vm2 = vcmp.eq.f32.partialorder %v394_v42, inf  ;;  %vm426_vm3 = vcmp.eq.f32.partialorder %v394_v42, 0.0  ;;  %v427_v58 = vand.u32 2147483648, %v394_v42 }
  0xb3   : > { %v3073_v46 = vmul.f32 0.0078125, %v366_v44  ;;  %v3075_v47 = vmul.f32 0.0078125, %v362_v45 }
  0xb5   : > { %2489 = vrsqrt.f32 %v3073_v46  ;;  %vm417_vm4 = vcmp.eq.f32.partialorder %v3075_v47, inf  ;;  %vm419_vm5 = vcmp.eq.f32.partialorder %v3075_v47, 0.0  ;;  %v420_v61 = vand.u32 2147483648, %v3075_v47 }
  0xb6   : > { %2491 = vrsqrt.f32 %v3075_v47  ;;  %v370_v48 = vpop.xlane.xlu1 %369  ;;  %v368_v49 = vpop.xlane.xlu0 %367  ;;  %vm431_vm6 = vcmp.eq.f32.partialorder %v3073_v46, inf  ;;  %vm433_vm7 = vcmp.eq.f32.partialorder %v3073_v46, 0.0  ;;  %v434_v63 = vand.u32 2147483648, %v3073_v46 }
  0xb7   : > { %v3079_v50 = vmul.f32 0.0078125, %v370_v48  ;;  %v3081_v51 = vmul.f32 0.0078125, %v368_v49 }
  0xb9   : > { %2493 = vrsqrt.f32 %v3079_v50  ;;  %v441_v7 = vand.u32 2147483648, %v3081_v51  ;;  %vm445_vm8 = vcmp.eq.f32.partialorder %v3079_v50, inf  ;;  %vm438_vm9 = vcmp.eq.f32.partialorder %v3081_v51, inf }
  0xba   : > { %2495 = vrsqrt.f32 %v3081_v51  ;;  %v374_v52 = vpop.xlane.xlu1 %373  ;;  %v372_v53 = vpop.xlane.xlu0 %371  ;;  %vm447_vm10 = vcmp.eq.f32.partialorder %v3079_v50, 0.0  ;;  %vm440_vm11 = vcmp.eq.f32.partialorder %v3081_v51, 0.0  ;;  %v448_v23 = vand.u32 2147483648, %v3079_v50 }
  0xbb   : > { %v2486_v55 = vpop.eup %2485  ;;  %v3085_v56 = vmul.f32 0.0078125, %v374_v52  ;;  %v3087_v57 = vmul.f32 0.0078125, %v372_v53 }
  0xbc   : > { %v2488_v59 = vpop.eup %2487  ;;  %v423_v60 = vmul.f32 %v2486_v55, %v394_v42 }
  0xbd   : > { %2497 = vrsqrt.f32 %v3085_v56  ;;  %v409_v62 = vmul.f32 %v2488_v59, %v392_v43  ;;  %v455_v29 = vand.u32 2147483648, %v3087_v57  ;;  %v462_v38 = vand.u32 2147483648, %v3085_v56 }
  0xbe   : > { %2499 = vrsqrt.f32 %v3087_v57  ;;  %v378_v0 = vpop.xlane.xlu1 %377  ;;  %v376_v1 = vpop.xlane.xlu0 %375  ;;  %v425_v6 = vsel %vm424_vm2, %v394_v42, %v423_v60  ;;  %vm452_vm12 = vcmp.eq.f32.partialorder %v3087_v57, inf  ;;  %vm459_vm13 = vcmp.eq.f32.partialorder %v3085_v56, inf }
  0xbf   : > { %v2490_v8 = vpop.eup %2489  ;;  %v3100_v9 = vmul.f32 0.0078125, %v378_v0  ;;  %v3102_v10 = vmul.f32 0.0078125, %v376_v1  ;;  %v411_v13 = vsel %vm410_vm0, %v392_v43, %v409_v62  ;;  %v428_v14 = vsel %vm426_vm3, %v427_v58, %v425_v6 }
  0xc0   : > { %v2492_v15 = vpop.eup %2491  ;;  %v414_v18 = vsel %vm412_vm1, %v413_v54, %v411_v13  ;;  %v522_v19 = vadd.f32 0.0001, %v428_v14  ;;  %v430_v20 = vmul.f32 %v2490_v8, %v3073_v46  ;;  %vm454_vm14 = vcmp.eq.f32.partialorder %v3087_v57, 0.0 }
  0xc1   : > { %2501 = vrsqrt.f32 %v3100_v9  ;;  %v520_v25 = vadd.f32 0.0001, %v414_v18  ;;  %v416_v28 = vmul.f32 %v2492_v15, %v3075_v47  ;;  %vm461_vm15 = vcmp.eq.f32.partialorder %v3085_v56, 0.0 }
  0xc2   : > { %2503 = vrsqrt.f32 %v3102_v10  ;;  %v382_v30 = vpop.xlane.xlu1 %381  ;;  %v380_v33 = vpop.xlane.xlu0 %379  ;;  %v538_v34 = vmul.f32 %v3003_v2, %v522_v19  ;;  %v432_v35 = vsel %vm431_vm6, %v3073_v46, %v430_v20  ;;  %vm466_vm0 = vcmp.eq.f32.partialorder %v3102_v10, inf }
  0xc3   : > { %v2494_v39 = vpop.eup %2493  ;;  %v3126_v40 = vmul.f32 0.0078125, %v382_v30  ;;  %v3128_v41 = vmul.f32 0.0078125, %v380_v33  ;;  %v536_v42 = vmul.f32 %v3005_v3, %v520_v25  ;;  %v418_v43 = vsel %vm417_vm4, %v3075_v47, %v416_v28 }
  0xc4   : > { %v2496_v2 = vpop.eup %2495  ;;  %v3137_v44 = vmul.f32 %v3116_v24, %v538_v34  ;;  %v421_v45 = vsel %vm419_vm5, %v420_v61, %v418_v43  ;;  %v435_v48 = vsel %vm433_vm7, %v434_v63, %v432_v35  ;;  %v444_v3 = vmul.f32 %v2494_v39, %v3079_v50 }
  0xc5   : > { %2505 = vrsqrt.f32 %v3126_v40  ;;  %v3148_v49 = vmul.f32 %v3116_v24, %v536_v42  ;;  %v521_v52 = vadd.f32 0.0001, %v421_v45  ;;  %v523_v53 = vadd.f32 0.0001, %v435_v48 }
  0xc6   : > { %2507 = vrsqrt.f32 %v3128_v41  ;;  %v386_v47 = vpop.xlane.xlu1 %385  ;;  %v384_v54 = vpop.xlane.xlu0 %383  ;;  %v577_v46 = vmul.f32 %v3137_v44, %v3137_v44  ;;  %807 = vst [vmem:[#allocation2 + $0x10] sm:$0xff] %v3137_v44  ;;  %v437_v55 = vmul.f32 %v2496_v2, %v3081_v51  ;;  %v446_v58 = vsel %vm445_vm8, %v3079_v50, %v444_v3 }
  0xc7   : > { %v2498_v59 = vpop.eup %2497  ;;  %v3158_v60 = vmul.f32 0.0078125, %v386_v47  ;;  %v3160_v61 = vmul.f32 0.0078125, %v384_v54  ;;  %v575_v62 = vmul.f32 %v3148_v49, %v3148_v49  ;;  %805 = vst [vmem:[#allocation2] sm:$0xff] %v3148_v49  ;;  %v537_v63 = vmul.f32 %v3009_v5, %v521_v52 }
  0xc8   : > { %v2500_v0 = vpop.eup %2499  ;;  %v539_v1 = vmul.f32 %v3007_v4, %v523_v53  ;;  %v439_v6 = vsel %vm438_vm9, %v3081_v51, %v437_v55  ;;  %v449_v8 = vsel %vm447_vm10, %v448_v23, %v446_v58  ;;  %v458_v13 = vmul.f32 %v2498_v59, %v3085_v56 }
  0xc9   : > { %2509 = vrsqrt.f32 %v3158_v60  ;;  %591 = vadd.xlane.f32.xlu0 %v575_v62  ;;  %v3176_v14 = vmul.f32 %v3116_v24, %v537_v63  ;;  %v442_v4 = vsel %vm440_vm11, %v441_v7, %v439_v6  ;;  %v525_v5 = vadd.f32 0.0001, %v449_v8 }
  0xca   : > { %2511 = vrsqrt.f32 %v3160_v61  ;;  %v390_v50 = vpop.xlane.xlu1 %389  ;;  %v388_v15 = vpop.xlane.xlu0 %387  ;;  %v3184_v18 = vmul.f32 %v3116_v24, %v539_v1  ;;  %v524_v19 = vadd.f32 0.0001, %v442_v4  ;;  %v451_v20 = vmul.f32 %v2500_v0, %v3087_v57 }
  0xcb   : > { %v2502_v23 = vpop.eup %2501  ;;  %v3187_v25 = vmul.f32 0.0078125, %v390_v50  ;;  %v3189_v28 = vmul.f32 0.0078125, %v388_v15  ;;  %v576_v51 = vmul.f32 %v3176_v14, %v3176_v14  ;;  %806 = vst [vmem:[#allocation2 + $0x8] sm:$0xff] %v3176_v14  ;;  %v541_v7 = vmul.f32 %v3020_v11, %v525_v5 }
  0xcc   : > { %v2504_v30 = vpop.eup %2503  ;;  %v578_v33 = vmul.f32 %v3184_v18, %v3184_v18  ;;  %808 = vst [vmem:[#allocation2 + $0x18] sm:$0xff] %v3184_v18  ;;  %v540_v34 = vmul.f32 %v3022_v12, %v524_v19  ;;  %v453_v35 = vsel %vm452_vm12, %v3087_v57, %v451_v20  ;;  %v460_v39 = vsel %vm459_vm13, %v3085_v56, %v458_v13 }
  0xcd   : > { %2513 = vrsqrt.f32 %v3187_v25  ;;  %595 = vadd.xlane.f32.xlu0 %v577_v46  ;;  %593 = vadd.xlane.f32.xlu1 %v576_v51  ;;  %v3207_v11 = vmul.f32 %v3116_v24, %v541_v7  ;;  %v456_v12 = vsel %vm454_vm14, %v455_v29, %v453_v35  ;;  %v463_v42 = vsel %vm461_vm15, %v462_v38, %v460_v39 }
  0xce   : > { %2515 = vrsqrt.f32 %v3189_v28  ;;  %v3219_v43 = vmul.f32 %v3116_v24, %v540_v34  ;;  %v526_v2 = vadd.f32 0.0001, %v456_v12  ;;  %v527_v45 = vadd.f32 0.0001, %v463_v42 }
  0xcf   : > { %v2506_v48 = vpop.eup %2505  ;;  %v580_v3 = vmul.f32 %v3207_v11, %v3207_v11  ;;  %810 = vst [vmem:[#allocation2 + $0x28] sm:$0xff] %v3207_v11  ;;  %v465_v57 = vmul.f32 %v2504_v30, %v3102_v10  ;;  %vm468_vm1 = vcmp.eq.f32.partialorder %v3102_v10, 0.0  ;;  %v469_v56 = vand.u32 2147483648, %v3102_v10 }
  0xd0   : > { %v2508_v29 = vpop.eup %2507  ;;  %v579_v38 = vmul.f32 %v3219_v43, %v3219_v43  ;;  %809 = vst [vmem:[#allocation2 + $0x20] sm:$0xff] %v3219_v43  ;;  %v542_v52 = vmul.f32 %v3031_v17, %v526_v2  ;;  %v543_v53 = vmul.f32 %v3029_v16, %v527_v45  ;;  %v472_v47 = vmul.f32 %v2502_v23, %v3100_v9 }
  0xd1   : > { %597 = vadd.xlane.f32.xlu1 %v578_v33  ;;  %v467_v54 = vsel %vm466_vm0, %v3102_v10, %v465_v57  ;;  %vm473_vm2 = vcmp.eq.f32.partialorder %v3100_v9, inf  ;;  %vm475_vm3 = vcmp.eq.f32.partialorder %v3100_v9, 0.0  ;;  %v476_v46 = vand.u32 2147483648, %v3100_v9 }
  0xd2   : > { %599 = vadd.xlane.f32.xlu0 %v579_v38  ;;  %v3240_v55 = vmul.f32 %v3116_v24, %v542_v52  ;;  %v3243_v17 = vmul.f32 %v3116_v24, %v543_v53  ;;  %v470_v16 = vsel %vm468_vm1, %v469_v56, %v467_v54  ;;  %v474_v58 = vsel %vm473_vm2, %v3100_v9, %v472_v47 }
  0xd3   : > { %v2510_v59 = vpop.eup %2509  ;;  %v528_v62 = vadd.f32 0.0001, %v470_v16  ;;  %v477_v63 = vsel %vm475_vm3, %v476_v46, %v474_v58  ;;  %v479_v0 = vmul.f32 %v2508_v29, %v3128_v41  ;;  %vm480_vm4 = vcmp.eq.f32.partialorder %v3128_v41, inf }
  0xd4   : > { %v2512_v1 = vpop.eup %2511  ;;  %v581_v6 = vmul.f32 %v3240_v55, %v3240_v55  ;;  %811 = vst [vmem:[#allocation2 + $0x30] sm:$0xff] %v3240_v55  ;;  %v582_v8 = vmul.f32 %v3243_v17, %v3243_v17  ;;  %812 = vst [vmem:[#allocation2 + $0x38] sm:$0xff] %v3243_v17  ;;  %v529_v10 = vadd.f32 0.0001, %v477_v63  ;;  %vm482_vm5 = vcmp.eq.f32.partialorder %v3128_v41, 0.0 }
  0xd5   : > { %601 = vadd.xlane.f32.xlu1 %v580_v3  ;;  %v544_v9 = vmul.f32 %v3040_v22, %v528_v62  ;;  %v481_v13 = vsel %vm480_vm4, %v3128_v41, %v479_v0  ;;  %v483_v4 = vand.u32 2147483648, %v3128_v41  ;;  %v486_v5 = vmul.f32 %v2506_v48, %v3126_v40 }
  0xd6   : > { %603 = vadd.xlane.f32.xlu0 %v581_v6  ;;  %v545_v50 = vmul.f32 %v3038_v21, %v529_v10  ;;  %vm487_vm6 = vcmp.eq.f32.partialorder %v3126_v40, inf  ;;  %vm489_vm7 = vcmp.eq.f32.partialorder %v3126_v40, 0.0  ;;  %v490_v15 = vand.u32 2147483648, %v3126_v40 }
  0xd7   : > { %v2514_v19 = vpop.eup %2513  ;;  %v3266_v20 = vmul.f32 %v3116_v24, %v544_v9  ;;  %v484_v22 = vsel %vm482_vm5, %v483_v4, %v481_v13  ;;  %v488_v23 = vsel %vm487_vm6, %v3126_v40, %v486_v5  ;;  %v493_v41 = vmul.f32 %v2512_v1, %v3160_v61 }
  0xd8   : > { %v2516_v51 = vpop.eup %2515  ;;  %v3271_v7 = vmul.f32 %v3116_v24, %v545_v50  ;;  %v530_v21 = vadd.f32 0.0001, %v484_v22  ;;  %v491_v30 = vsel %vm489_vm7, %v490_v15, %v488_v23  ;;  %vm494_vm8 = vcmp.eq.f32.partialorder %v3160_v61, inf }
  0xd9   : > { %605 = vadd.xlane.f32.xlu1 %v582_v8  ;;  %v583_v33 = vmul.f32 %v3266_v20, %v3266_v20  ;;  %813 = vst [vmem:[#allocation2 + $0x40] sm:$0xff] %v3266_v20  ;;  %v531_v34 = vadd.f32 0.0001, %v491_v30  ;;  %v495_v35 = vsel %vm494_vm8, %v3160_v61, %v493_v41  ;;  %vm496_vm9 = vcmp.eq.f32.partialorder %v3160_v61, 0.0 }
  0xda   : > { %v584_v40 = vmul.f32 %v3271_v7, %v3271_v7  ;;  %814 = vst [vmem:[#allocation2 + $0x48] sm:$0xff] %v3271_v7  ;;  %v546_v39 = vmul.f32 %v3049_v27, %v530_v21  ;;  %v497_v12 = vand.u32 2147483648, %v3160_v61  ;;  %v500_v42 = vmul.f32 %v2510_v59, %v3158_v60 }
  0xdb   : > { %607 = vadd.xlane.f32.xlu0 %v583_v33  ;;  %v547_v2 = vmul.f32 %v3047_v26, %v531_v34  ;;  %vm501_vm10 = vcmp.eq.f32.partialorder %v3158_v60, inf  ;;  %vm503_vm11 = vcmp.eq.f32.partialorder %v3158_v60, 0.0  ;;  %v504_v45 = vand.u32 2147483648, %v3158_v60 }
  0xdc   : > { %v3290_v48 = vmul.f32 %v3116_v24, %v546_v39  ;;  %v498_v3 = vsel %vm496_vm9, %v497_v12, %v495_v35  ;;  %v502_v57 = vsel %vm501_vm10, %v3158_v60, %v500_v42  ;;  %v507_v27 = vmul.f32 %v2516_v51, %v3189_v28 }
  0xdd   : > { %609 = vadd.xlane.f32.xlu1 %v584_v40  ;;  %v3295_v61 = vmul.f32 %v3116_v24, %v547_v2  ;;  %v532_v56 = vadd.f32 0.0001, %v498_v3  ;;  %v505_v26 = vsel %vm503_vm11, %v504_v45, %v502_v57  ;;  %vm508_vm12 = vcmp.eq.f32.partialorder %v3189_v28, inf }
  0xde   : > { %v585_v29 = vmul.f32 %v3290_v48, %v3290_v48  ;;  %815 = vst [vmem:[#allocation2 + $0x50] sm:$0xff] %v3290_v48  ;;  %v533_v38 = vadd.f32 0.0001, %v505_v26  ;;  %v509_v52 = vsel %vm508_vm12, %v3189_v28, %v507_v27  ;;  %v511_v47 = vand.u32 2147483648, %v3189_v28 }
  0xdf   : > { %v586_v60 = vmul.f32 %v3295_v61, %v3295_v61  ;;  %816 = vst [vmem:[#allocation2 + $0x58] sm:$0xff] %v3295_v61  ;;  %v548_v53 = vmul.f32 %v3058_v32, %v532_v56  ;;  %v514_v54 = vmul.f32 %v2514_v19, %v3187_v25  ;;  %vm510_vm13 = vcmp.eq.f32.partialorder %v3189_v28, 0.0 }
  0xe0   : > { %611 = vadd.xlane.f32.xlu0 %v585_v29  ;;  %v549_v46 = vmul.f32 %v3056_v31, %v533_v38  ;;  %vm515_vm14 = vcmp.eq.f32.partialorder %v3187_v25, inf  ;;  %v518_v16 = vand.u32 2147483648, %v3187_v25  ;;  %v512_v59 = vsel %vm510_vm13, %v511_v47, %v509_v52 }
  0xe1   : > { %613 = vadd.xlane.f32.xlu1 %v586_v60  ;;  %v3313_v58 = vmul.f32 %v3116_v24, %v548_v53  ;;  %v516_v32 = vsel %vm515_vm14, %v3187_v25, %v514_v54  ;;  %vm517_vm15 = vcmp.eq.f32.partialorder %v3187_v25, 0.0  ;;  %v534_v63 = vadd.f32 0.0001, %v512_v59 }
  0xe2   : > { %v3318_v62 = vmul.f32 %v3116_v24, %v549_v46  ;;  %v519_v31 = vsel %vm517_vm15, %v518_v16, %v516_v32  ;;  %v3370_v16 = vld [vmem:[%s4066_s2] ss:$0 sm:$0xff] }
  0xe3   : > { %v587_v28 = vmul.f32 %v3313_v58, %v3313_v58  ;;  %817 = vst [vmem:[#allocation2 + $0x60] sm:$0xff] %v3313_v58  ;;  %v535_v0 = vadd.f32 0.0001, %v519_v31  ;;  %v550_v6 = vmul.f32 %v3067_v37, %v534_v63 }
  0xe4   : > { %v588_v1 = vmul.f32 %v3318_v62, %v3318_v62  ;;  %818 = vst [vmem:[#allocation2 + $0x68] sm:$0xff] %v3318_v62 }
  0xe5   : > { %615 = vadd.xlane.f32.xlu0 %v587_v28  ;;  %v551_v25 = vmul.f32 %v3065_v36, %v535_v0  ;;  %v3329_v8 = vmul.f32 %v3116_v24, %v550_v6 }
  0xe6   : > { %617 = vadd.xlane.f32.xlu1 %v588_v1 }
  0xe7   : > { %v3332_v10 = vmul.f32 %v3116_v24, %v551_v25  ;;  %v589_v9 = vmul.f32 %v3329_v8, %v3329_v8  ;;  %819 = vst [vmem:[#allocation2 + $0x70] sm:$0xff] %v3329_v8 }
  0xe9   : > { %v590_v13 = vmul.f32 %v3332_v10, %v3332_v10  ;;  %820 = vst [vmem:[#allocation2 + $0x78] sm:$0xff] %v3332_v10  ;;  %619 = vadd.xlane.f32.xlu0 %v589_v9 }
  0xeb   : > { %621 = vadd.xlane.f32.xlu1 %v590_v13 }
 0x156   : > { %v592_v36 = vpop.xlane.xlu0 %591 }
 0x157   : > { %v623_v37 = vmul.f32 0.0078125, %v592_v36 }
 0x159   : > { %2517 = vrsqrt.f32 %v623_v37  ;;  %vm641_vm0 = vcmp.eq.f32.partialorder %v623_v37, inf  ;;  %vm643_vm1 = vcmp.eq.f32.partialorder %v623_v37, 0.0  ;;  %v644_v34 = vand.u32 2147483648, %v623_v37 }
 0x15a   : > { %v594_v4 = vpop.xlane.xlu1 %593  ;;  %v596_v5 = vpop.xlane.xlu0 %595 }
 0x15b   : > { %v624_v50 = vmul.f32 0.0078125, %v594_v4  ;;  %v625_v24 = vmul.f32 0.0078125, %v596_v5 }
 0x15d   : > { %2519 = vrsqrt.f32 %v624_v50  ;;  %vm648_vm2 = vcmp.eq.f32.partialorder %v624_v50, inf  ;;  %vm650_vm3 = vcmp.eq.f32.partialorder %v624_v50, 0.0  ;;  %v651_v40 = vand.u32 2147483648, %v624_v50 }
 0x15e   : > { %2521 = vrsqrt.f32 %v625_v24  ;;  %v598_v15 = vpop.xlane.xlu1 %597  ;;  %vm655_vm4 = vcmp.eq.f32.partialorder %v625_v24, inf  ;;  %vm657_vm5 = vcmp.eq.f32.partialorder %v625_v24, 0.0  ;;  %v658_v12 = vand.u32 2147483648, %v625_v24 }
 0x15f   : > { %v3340_v19 = vmul.f32 0.0078125, %v598_v15  ;;  %v600_v22 = vpop.xlane.xlu0 %599 }
 0x160   : > { %v3342_v23 = vmul.f32 0.0078125, %v600_v22 }
 0x161   : > { %2523 = vrsqrt.f32 %v3340_v19  ;;  %vm662_vm6 = vcmp.eq.f32.partialorder %v3340_v19, inf  ;;  %vm664_vm7 = vcmp.eq.f32.partialorder %v3340_v19, 0.0  ;;  %v665_v26 = vand.u32 2147483648, %v3340_v19 }
 0x162   : > { %2525 = vrsqrt.f32 %v3342_v23  ;;  %v602_v41 = vpop.xlane.xlu1 %601  ;;  %vm669_vm8 = vcmp.eq.f32.partialorder %v3342_v23, inf  ;;  %vm671_vm9 = vcmp.eq.f32.partialorder %v3342_v23, 0.0  ;;  %v672_v52 = vand.u32 2147483648, %v3342_v23 }
 0x163   : > { %v2518_v51 = vpop.eup %2517  ;;  %v3346_v21 = vmul.f32 0.0078125, %v602_v41  ;;  %v604_v30 = vpop.xlane.xlu0 %603 }
 0x164   : > { %v640_v33 = vmul.f32 %v2518_v51, %v623_v37  ;;  %v3348_v35 = vmul.f32 0.0078125, %v604_v30 }
 0x165   : > { %2527 = vrsqrt.f32 %v3346_v21  ;;  %vm676_vm10 = vcmp.eq.f32.partialorder %v3346_v21, inf  ;;  %vm678_vm11 = vcmp.eq.f32.partialorder %v3346_v21, 0.0  ;;  %v679_v1 = vand.u32 2147483648, %v3346_v21 }
 0x166   : > { %v642_v39 = vsel %vm641_vm0, %v623_v37, %v640_v33  ;;  %2529 = vrsqrt.f32 %v3348_v35  ;;  %v606_v42 = vpop.xlane.xlu1 %605  ;;  %vm683_vm12 = vcmp.eq.f32.partialorder %v3348_v35, inf  ;;  %vm685_vm13 = vcmp.eq.f32.partialorder %v3348_v35, 0.0 }
 0x167   : > { %v2520_v2 = vpop.eup %2519  ;;  %v645_v45 = vsel %vm643_vm1, %v644_v34, %v642_v39  ;;  %v3355_v3 = vmul.f32 0.0078125, %v606_v42 }
 0x168   : > { %v2522_v57 = vpop.eup %2521  ;;  %v751_v27 = vadd.f32 0.0001, %v645_v45  ;;  %v647_v56 = vmul.f32 %v2520_v2, %v624_v50  ;;  %v608_v29 = vpop.xlane.xlu0 %607 }
 0x169   : > { %v654_v38 = vmul.f32 %v2522_v57, %v625_v24  ;;  %2531 = vrsqrt.f32 %v3355_v3  ;;  %v3365_v47 = vmul.f32 0.0078125, %v608_v29  ;;  %vm690_vm14 = vcmp.eq.f32.partialorder %v3355_v3, inf }
 0x16a   : > { %v767_v60 = vmul.f32 %v751_v27, %v3148_v49  ;;  %v649_v53 = vsel %vm648_vm2, %v624_v50, %v647_v56  ;;  %v610_v54 = vpop.xlane.xlu1 %609  ;;  %vm692_vm15 = vcmp.eq.f32.partialorder %v3355_v3, 0.0 }
 0x16b   : > { %v2524_v46 = vpop.eup %2523  ;;  %v652_v59 = vsel %vm650_vm3, %v651_v40, %v649_v53  ;;  %v656_v32 = vsel %vm655_vm4, %v625_v24, %v654_v38  ;;  %v3375_v49 = vmul.f32 0.0078125, %v610_v54  ;;  %2533 = vrsqrt.f32 %v3365_v47 }
 0x16c   : > { %v2526_v63 = vpop.eup %2525  ;;  %v752_v31 = vadd.f32 0.0001, %v652_v59  ;;  %v659_v28 = vsel %vm657_vm5, %v658_v12, %v656_v32  ;;  %v661_v0 = vmul.f32 %v2524_v46, %v3340_v19  ;;  %v789_v9 = vmul.f32 %v3370_v16, %v767_v60 }
 0x16d   : > { %v753_v6 = vadd.f32 0.0001, %v659_v28  ;;  %v668_v25 = vmul.f32 %v2526_v63, %v3342_v23  ;;  %v612_v37 = vpop.xlane.xlu0 %611  ;;  %2535 = vrsqrt.f32 %v3375_v49  ;;  %vm697_vm0 = vcmp.eq.f32.partialorder %v3365_v47, inf }
 0x16e   : > { %v768_v13 = vmul.f32 %v752_v31, %v3176_v14  ;;  %v663_v36 = vsel %vm662_vm6, %v3340_v19, %v661_v0  ;;  %v686_v19 = vand.u32 2147483648, %v3348_v35  ;;  %v3420_v38 = vmul.f32 0.0078125, %v612_v37 }
 0x16f   : > { %v2528_v4 = vpop.eup %2527  ;;  %v769_v5 = vmul.f32 %v753_v6, %v3137_v44  ;;  %v666_v50 = vsel %vm664_vm7, %v665_v26, %v663_v36  ;;  %v670_v24 = vsel %vm669_vm8, %v3342_v23, %v668_v25  ;;  %v614_v23 = vpop.xlane.xlu1 %613  ;;  %vm699_vm1 = vcmp.eq.f32.partialorder %v3365_v47, 0.0 }
 0x170   : > { %v2530_v14 = vpop.eup %2529  ;;  %v790_v15 = vmul.f32 %v3370_v16, %v768_v13  ;;  %v754_v22 = vadd.f32 0.0001, %v666_v50  ;;  %v673_v41 = vsel %vm671_vm9, %v672_v52, %v670_v24  ;;  %v675_v51 = vmul.f32 %v2528_v4, %v3346_v21 }
 0x171   : > { %v755_v30 = vadd.f32 0.0001, %v673_v41  ;;  %v682_v44 = vmul.f32 %v2530_v14, %v3348_v35  ;;  %v791_v12 = vmul.f32 %v3370_v16, %v769_v5  ;;  %2537 = vrsqrt.f32 %v3420_v38 }
 0x172   : > { %v821_v33 = vpack.c.bf16 %v790_v15, %v789_v9  ;;  %v770_v34 = vmul.f32 %v754_v22, %v3184_v18  ;;  %v677_v40 = vsel %vm676_vm10, %v3346_v21, %v675_v51  ;;  %v616_v26 = vpop.xlane.xlu0 %615  ;;  %v3422_v21 = vmul.f32 0.0078125, %v614_v23 }
 0x173   : > { %v2532_v39 = vpop.eup %2531  ;;  %v771_v42 = vmul.f32 %v755_v30, %v3219_v43  ;;  %v680_v2 = vsel %vm678_vm11, %v679_v1, %v677_v40  ;;  %v684_v45 = vsel %vm683_vm12, %v3348_v35, %v682_v44  ;;  %v693_v43 = vand.u32 2147483648, %v3355_v3  ;;  %v618_v28 = vpop.xlane.xlu1 %617 }
 0x174   : > { %829 = vst [vmem:[#allocation3] sm:$0xff] %v821_v33  ;;  %v792_v18 = vmul.f32 %v3370_v16, %v770_v34  ;;  %v756_v57 = vadd.f32 0.0001, %v680_v2  ;;  %v687_v27 = vsel %vm685_vm13, %v686_v19, %v684_v45  ;;  %v689_v56 = vmul.f32 %v2532_v39, %v3355_v3 }
 0x175   : > { %v757_v29 = vadd.f32 0.0001, %v687_v27  ;;  %v2534_v35 = vpop.eup %2533  ;;  %v793_v54 = vmul.f32 %v3370_v16, %v771_v42  ;;  %v3433_v59 = vmul.f32 0.0078125, %v616_v26  ;;  %v700_v1 = vand.u32 2147483648, %v3365_v47 }
 0x176   : > { %v822_v52 = vpack.c.bf16 %v792_v18, %v791_v12  ;;  %v772_v60 = vmul.f32 %v756_v57, %v3207_v11  ;;  %v691_v53 = vsel %vm690_vm14, %v3355_v3, %v689_v56  ;;  %v696_v31 = vmul.f32 %v2534_v35, %v3365_v47  ;;  %v620_v36 = vpop.xlane.xlu0 %619 }
 0x177   : > { %v694_v46 = vsel %vm692_vm15, %v693_v43, %v691_v53  ;;  %v773_v11 = vmul.f32 %v757_v29, %v3240_v55  ;;  %v2536_v0 = vpop.eup %2535  ;;  %vm704_vm2 = vcmp.eq.f32.partialorder %v3375_v49, inf  ;;  %2539 = vrsqrt.f32 %v3422_v21 }
 0x178   : > { %830 = vst [vmem:[#allocation3 + $0x8] sm:$0xff] %v822_v52  ;;  %v794_v32 = vmul.f32 %v3370_v16, %v772_v60  ;;  %v758_v63 = vadd.f32 0.0001, %v694_v46  ;;  %v698_v55 = vsel %vm697_vm0, %v3365_v47, %v696_v31  ;;  %v703_v25 = vmul.f32 %v2536_v0, %v3375_v49  ;;  %v622_v41 = vpop.xlane.xlu1 %621 }
 0x179   : > { %v701_v9 = vsel %vm699_vm1, %v700_v1, %v698_v55  ;;  %vm706_vm3 = vcmp.eq.f32.partialorder %v3375_v49, 0.0  ;;  %v707_v13 = vand.u32 2147483648, %v3375_v49  ;;  %2541 = vrsqrt.f32 %v3433_v59 }
 0x17a   : > { %v823_v3 = vpack.c.bf16 %v794_v32, %v793_v54  ;;  %v774_v6 = vmul.f32 %v758_v63, %v3243_v17  ;;  %v795_v37 = vmul.f32 %v3370_v16, %v773_v11  ;;  %v759_v17 = vadd.f32 0.0001, %v701_v9 }
 0x17b   : > { %v705_v5 = vsel %vm704_vm2, %v3375_v49, %v703_v25  ;;  %v636_v47 = vmul.f32 0.0078125, %v618_v28  ;;  %v637_v22 = vmul.f32 0.0078125, %v620_v36  ;;  %v2538_v30 = vpop.eup %2537  ;;  %v3455_v44 = vmul.f32 0.0078125, %v622_v41 }
 0x17c   : > { %831 = vst [vmem:[#allocation3 + $0x10] sm:$0xff] %v823_v3  ;;  %v796_v4 = vmul.f32 %v3370_v16, %v774_v6  ;;  %v708_v50 = vsel %vm706_vm3, %v707_v13, %v705_v5  ;;  %v775_v14 = vmul.f32 %v759_v17, %v3266_v20  ;;  %v710_v33 = vmul.f32 %v2538_v30, %v3420_v38 }
 0x17d   : > { %v760_v15 = vadd.f32 0.0001, %v708_v50  ;;  %2543 = vrsqrt.f32 %v636_v47  ;;  %vm711_vm4 = vcmp.eq.f32.partialorder %v3420_v38, inf  ;;  %v714_v20 = vand.u32 2147483648, %v3420_v38 }
 0x17e   : > { %v824_v24 = vpack.c.bf16 %v796_v4, %v795_v37  ;;  %2545 = vrsqrt.f32 %v637_v22  ;;  %v797_v19 = vmul.f32 %v3370_v16, %v775_v14  ;;  %vm713_vm5 = vcmp.eq.f32.partialorder %v3420_v38, 0.0 }
 0x17f   : > { %v776_v51 = vmul.f32 %v760_v15, %v3271_v7  ;;  %2547 = vrsqrt.f32 %v3455_v44  ;;  %v712_v7 = vsel %vm711_vm4, %v3420_v38, %v710_v33  ;;  %vm718_vm6 = vcmp.eq.f32.partialorder %v3422_v21, inf }
 0x180   : > { %832 = vst [vmem:[#allocation3 + $0x18] sm:$0xff] %v824_v24  ;;  %v715_v12 = vsel %vm713_vm5, %v714_v20, %v712_v7  ;;  %v721_v42 = vand.u32 2147483648, %v3422_v21  ;;  %vm720_vm7 = vcmp.eq.f32.partialorder %v3422_v21, 0.0  ;;  %vm725_vm8 = vcmp.eq.f32.partialorder %v3433_v59, inf }
 0x181   : > { %v798_v49 = vmul.f32 %v3370_v16, %v776_v51  ;;  %v2540_v34 = vpop.eup %2539  ;;  %v761_v2 = vadd.f32 0.0001, %v715_v12  ;;  %v728_v27 = vand.u32 2147483648, %v3433_v59  ;;  %vm727_vm9 = vcmp.eq.f32.partialorder %v3433_v59, 0.0 }
 0x182   : > { %v717_v23 = vmul.f32 %v2540_v34, %v3422_v21  ;;  %vm732_vm10 = vcmp.eq.f32.partialorder %v636_v47, inf  ;;  %vm734_vm11 = vcmp.eq.f32.partialorder %v636_v47, 0.0  ;;  %v735_v35 = vand.u32 2147483648, %v636_v47 }
 0x183   : > { %v825_v40 = vpack.c.bf16 %v798_v49, %v797_v19  ;;  %v2542_v39 = vpop.eup %2541  ;;  %v777_v56 = vmul.f32 %v761_v2, %v3290_v48  ;;  %vm739_vm12 = vcmp.eq.f32.partialorder %v637_v22, inf  ;;  %v742_v11 = vand.u32 2147483648, %v637_v22 }
 0x184   : > { %v719_v45 = vsel %vm718_vm6, %v3422_v21, %v717_v23  ;;  %v724_v18 = vmul.f32 %v2542_v39, %v3433_v59  ;;  %vm741_vm13 = vcmp.eq.f32.partialorder %v637_v22, 0.0  ;;  %vm746_vm14 = vcmp.eq.f32.partialorder %v3455_v44, inf }
 0x185   : > { %833 = vst [vmem:[#allocation3 + $0x20] sm:$0xff] %v825_v40  ;;  %v722_v57 = vsel %vm720_vm7, %v721_v42, %v719_v45  ;;  %v799_v46 = vmul.f32 %v3370_v16, %v777_v56  ;;  %v749_v25 = vand.u32 2147483648, %v3455_v44  ;;  %vm748_vm15 = vcmp.eq.f32.partialorder %v3455_v44, 0.0 }
 0x186   : > { %v762_v26 = vadd.f32 0.0001, %v722_v57  ;;  %v726_v29 = vsel %vm725_vm8, %v3433_v59, %v724_v18 }
 0x187   : > { %v2544_v43 = vpop.eup %2543  ;;  %v729_v38 = vsel %vm727_vm9, %v728_v27, %v726_v29 }
 0x188   : > { %v2546_v52 = vpop.eup %2545  ;;  %v778_v60 = vmul.f32 %v762_v26, %v3295_v61  ;;  %v763_v21 = vadd.f32 0.0001, %v729_v38  ;;  %v731_v53 = vmul.f32 %v2544_v43, %v636_v47 }
 0x189   : > { %v738_v54 = vmul.f32 %v2546_v52, %v637_v22  ;;  %v2548_v63 = vpop.eup %2547 }
 0x18a   : > { %v800_v48 = vmul.f32 %v3370_v16, %v778_v60  ;;  %v733_v32 = vsel %vm732_vm10, %v636_v47, %v731_v53  ;;  %v779_v61 = vmul.f32 %v763_v21, %v3313_v58  ;;  %v745_v6 = vmul.f32 %v2548_v63, %v3455_v44 }
 0x18b   : > { %v736_v59 = vsel %vm734_vm11, %v735_v35, %v733_v32  ;;  %v740_v31 = vsel %vm739_vm12, %v637_v22, %v738_v54 }
 0x18c   : > { %v826_v28 = vpack.c.bf16 %v800_v48, %v799_v46  ;;  %v764_v0 = vadd.f32 0.0001, %v736_v59  ;;  %v743_v1 = vsel %vm741_vm13, %v742_v11, %v740_v31  ;;  %v747_v9 = vsel %vm746_vm14, %v3455_v44, %v745_v6 }
 0x18d   : > { %v765_v3 = vadd.f32 0.0001, %v743_v1  ;;  %v801_v13 = vmul.f32 %v3370_v16, %v779_v61  ;;  %v750_v36 = vsel %vm748_vm15, %v749_v25, %v747_v9 }
 0x18e   : > { %834 = vst [vmem:[#allocation3 + $0x28] sm:$0xff] %v826_v28  ;;  %v780_v55 = vmul.f32 %v764_v0, %v3318_v62  ;;  %v766_v4 = vadd.f32 0.0001, %v750_v36 }
 0x18f   : > { %v781_v37 = vmul.f32 %v765_v3, %v3329_v8 }
 0x190   : > { %v802_v58 = vmul.f32 %v3370_v16, %v780_v55  ;;  %v782_v5 = vmul.f32 %v766_v4, %v3332_v10 }
 0x191   : > { %v803_v62 = vmul.f32 %v3370_v16, %v781_v37 }
 0x192   : > { %v827_v17 = vpack.c.bf16 %v802_v58, %v801_v13  ;;  %v804_v50 = vmul.f32 %v3370_v16, %v782_v5 }
 0x194   : > { %835 = vst [vmem:[#allocation3 + $0x30] sm:$0xff] %v827_v17  ;;  %v828_v47 = vpack.c.bf16 %v804_v50, %v803_v62 }
 0x196   : > { %836 = vst [vmem:[#allocation3 + $0x38] sm:$0xff] %v828_v47 }
 0x197 PF: > { %v2549_v24 = vld [vmem:[%s2991_s8 + $0x4] ss:$16 sps:$4 sm:$0xff]   ;;  %v2551_v8 = vld [vmem:[%s2991_s8] ss:$16 sps:$4 sm:$0xff]   ;;  %v2869_v14 = vmov 0   ;;  %v838_v18 = vld [vmem:[#allocation3 + $0x8] sm:$0xff] }
 0x198   : > { %1069 = vmatprep.mubr.bf16.mxu0 %v2869_v14  ;;  %1109 = vmatprep.mubr.bf16.mxu1 %v2869_v14  ;;  %v2552_v10 = vld [vmem:[%s2991_s8 + $0x24] ss:$16 sps:$4 sm:$0xff]   ;;  %v2554_v16 = vld [vmem:[%s2991_s8 + $0x20] ss:$16 sps:$4 sm:$0xff]   ;;  %v2575_v7 = vld [vmem:[%s2991_s8 + $0xc] ss:$16 sps:$4 sm:$0xff]  }
 0x199   : > { %1037 = vmatprep.subr.bf16.mxu0 %v2549_v24  ;;  %2395 = vmatprep.subr.bf16.mxu1 %v2549_v24  ;;  %v2555_v15 = vld [vmem:[%s2991_s8 + $0x44] ss:$16 sps:$4 sm:$0xff]   ;;  %v2557_v22 = vld [vmem:[%s2991_s8 + $0x40] ss:$16 sps:$4 sm:$0xff]   ;;  %v2573_v12 = vld [vmem:[%s2991_s8 + $0x8] ss:$16 sps:$4 sm:$0xff]  }
 0x19a   : > { %1038 = vmatpush1.bf16.msra.mxu0 %v2551_v8  ;;  %2403 = vmatpush1.bf16.msra.mxu1 %v2551_v8  ;;  %v2558_v41 = vld [vmem:[%s2991_s8 + $0x64] ss:$16 sps:$4 sm:$0xff]   ;;  %v2560_v51 = vld [vmem:[%s2991_s8 + $0x60] ss:$16 sps:$4 sm:$0xff]   ;;  %v2578_v42 = vld [vmem:[%s2991_s8 + $0x2c] ss:$16 sps:$4 sm:$0xff]  }
 0x19b   : > { %1039 = vmatprep.subr.bf16.mxu0 %v2552_v10  ;;  %2396 = vmatprep.subr.bf16.mxu1 %v2552_v10  ;;  %v2561_v30 = vld [vmem:[%s2991_s8 + $0x84] ss:$16 sps:$4 sm:$0xff]   ;;  %v2563_v44 = vld [vmem:[%s2991_s8 + $0x80] ss:$16 sps:$4 sm:$0xff]   ;;  %v2576_v2 = vld [vmem:[%s2991_s8 + $0x28] ss:$16 sps:$4 sm:$0xff]  }
 0x19c   : > { %v2564_v19 = vld [vmem:[%s2991_s8 + $0xa4] ss:$16 sps:$4 sm:$0xff]   ;;  %v2566_v49 = vld [vmem:[%s2991_s8 + $0xa0] ss:$16 sps:$4 sm:$0xff]   ;;  %v2581_v45 = vld [vmem:[%s2991_s8 + $0x4c] ss:$16 sps:$4 sm:$0xff]  }
 0x19d   : > { %v2567_v33 = vld [vmem:[%s2991_s8 + $0xc4] ss:$16 sps:$4 sm:$0xff]   ;;  %v2569_v34 = vld [vmem:[%s2991_s8 + $0xc0] ss:$16 sps:$4 sm:$0xff]   ;;  %v842_v57 = vld [vmem:[#allocation3 + $0x28] sm:$0xff]  ;;  %p2282_p1 = scmp.ne.s32.totalorder %s2851_s24, 1 }
 0x19e   : > { %1040 = vmatpush1.bf16.msra.mxu0 %v2554_v16  ;;  %2404 = vmatpush1.bf16.msra.mxu1 %v2554_v16  ;;  %v2570_v20 = vld [vmem:[%s2991_s8 + $0xe4] ss:$16 sps:$4 sm:$0xff]   ;;  %v2572_v40 = vld [vmem:[%s2991_s8 + $0xe0] ss:$16 sps:$4 sm:$0xff]   ;;  %v2579_v27 = vld [vmem:[%s2991_s8 + $0x48] ss:$16 sps:$4 sm:$0xff]  }
 0x19f   : > { %1041 = vmatprep.subr.bf16.mxu0 %v2555_v15  ;;  %2397 = vmatprep.subr.bf16.mxu1 %v2555_v15  ;;  %v837_v23 = vld [vmem:[#allocation3] sm:$0xff]  ;;  %v2584_v56 = vld [vmem:[%s2991_s8 + $0x6c] ss:$16 sps:$4 sm:$0xff]   ;;  %v2582_v26 = vld [vmem:[%s2991_s8 + $0x68] ss:$16 sps:$4 sm:$0xff]  }
 0x1a0   : > { %v841_v39 = vld [vmem:[#allocation3 + $0x20] sm:$0xff]  ;;  %v2587_v29 = vld [vmem:[%s2991_s8 + $0x8c] ss:$16 sps:$4 sm:$0xff]   ;;  %v839_v43 = vld [vmem:[#allocation3 + $0x10] sm:$0xff] }
 0x1a1   : > { %v843_v38 = vld [vmem:[#allocation3 + $0x30] sm:$0xff]  ;;  %v2585_v52 = vld [vmem:[%s2991_s8 + $0x88] ss:$16 sps:$4 sm:$0xff]   ;;  %v2590_v60 = vld [vmem:[%s2991_s8 + $0xac] ss:$16 sps:$4 sm:$0xff]  }
 0x1a2   : > { %1042 = vmatpush1.bf16.msra.mxu0 %v2557_v22  ;;  %2405 = vmatpush1.bf16.msra.mxu1 %v2557_v22  ;;  %v2588_v21 = vld [vmem:[%s2991_s8 + $0xa8] ss:$16 sps:$4 sm:$0xff]   ;;  %v2593_v53 = vld [vmem:[%s2991_s8 + $0xcc] ss:$16 sps:$4 sm:$0xff]   ;;  %v2597_v11 = vld [vmem:[%s2996_s14 + $0x40] sm:$0xff]  }
 0x1a3   : > { %1043 = vmatprep.subr.bf16.mxu0 %v2558_v41  ;;  %2398 = vmatprep.subr.bf16.mxu1 %v2558_v41  ;;  %v840_v35 = vld [vmem:[#allocation3 + $0x18] sm:$0xff]  ;;  %v2598_v63 = vld [vmem:[%s2996_s14] sm:$0xff]   ;;  %v2599_v59 = vld [vmem:[%s2996_s14 + $0x48] sm:$0xff]  }
 0x1a4   : > { %v844_v54 = vld [vmem:[#allocation3 + $0x38] sm:$0xff]  ;;  %v2600_v31 = vld [vmem:[%s2996_s14 + $0x8] sm:$0xff]   ;;  %v2601_v28 = vld [vmem:[%s2996_s14 + $0x50] sm:$0xff]  }
 0x1a5   : > { %v2591_v46 = vld [vmem:[%s2991_s8 + $0xc8] ss:$16 sps:$4 sm:$0xff]   ;;  %v2596_v48 = vld [vmem:[%s2991_s8 + $0xec] ss:$16 sps:$4 sm:$0xff]   ;;  %v2602_v61 = vld [vmem:[%s2996_s14 + $0x10] sm:$0xff]  }
 0x1a6   : > { %1044 = vmatpush1.bf16.msra.mxu0 %v2560_v51  ;;  %2406 = vmatpush1.bf16.msra.mxu1 %v2560_v51  ;;  %v2594_v32 = vld [vmem:[%s2991_s8 + $0xe8] ss:$16 sps:$4 sm:$0xff]   ;;  %v2605_v3 = vld [vmem:[%s2996_s14 + $0x60] sm:$0xff]   ;;  %v2609_v9 = vld [vmem:[%s2996_s14 + $0x70] sm:$0xff]  }
 0x1a7   : > { %1045 = vmatprep.subr.bf16.mxu0 %v2561_v30  ;;  %2399 = vmatprep.subr.bf16.mxu1 %v2561_v30  ;;  %v2603_v0 = vld [vmem:[%s2996_s14 + $0x58] sm:$0xff]   ;;  %v2606_v6 = vld [vmem:[%s2996_s14 + $0x20] sm:$0xff]   ;;  %v2607_v55 = vld [vmem:[%s2996_s14 + $0x68] sm:$0xff]  }
 0x1a8   : > { %v2604_v1 = vld [vmem:[%s2996_s14 + $0x18] sm:$0xff]   ;;  %v2608_v25 = vld [vmem:[%s2996_s14 + $0x28] sm:$0xff]   ;;  %v2610_v13 = vld [vmem:[%s2996_s14 + $0x30] sm:$0xff]  }
 0x1a9   : > { %v2611_v58 = vld [vmem:[%s2996_s14 + $0x78] sm:$0xff]  }
 0x1aa   : > { %1046 = vmatpush1.bf16.msra.mxu0 %v2563_v44  ;;  %2407 = vmatpush1.bf16.msra.mxu1 %v2563_v44  ;;  %v2612_v36 = vld [vmem:[%s2996_s14 + $0x38] sm:$0xff]  }
 0x1ab   : > { %1047 = vmatprep.subr.bf16.mxu0 %v2564_v19  ;;  %2400 = vmatprep.subr.bf16.mxu1 %v2564_v19 }
 0x1ae   : > { %1048 = vmatpush1.bf16.msra.mxu0 %v2566_v49  ;;  %2408 = vmatpush1.bf16.msra.mxu1 %v2566_v49 }
 0x1af   : > { %1049 = vmatprep.subr.bf16.mxu0 %v2567_v33  ;;  %2401 = vmatprep.subr.bf16.mxu1 %v2567_v33 }
 0x1b2   : > { %1050 = vmatpush1.bf16.msra.mxu0 %v2569_v34  ;;  %2409 = vmatpush1.bf16.msra.mxu1 %v2569_v34 }
 0x1b3   : > { %1051 = vmatprep.subr.bf16.mxu0 %v2570_v20  ;;  %2402 = vmatprep.subr.bf16.mxu1 %v2570_v20 }
 0x1b6   : > { %1052 = vmatpush1.bf16.msra.mxu0 %v2572_v40  ;;  %2410 = vmatpush1.bf16.msra.mxu1 %v2572_v40 }
 0x1b7   : > { %1150 = vmatprep.subr.bf16.mxu1 %v2575_v7  ;;  %2331 = vmatprep.subr.bf16.mxu0 %v2597_v11 }
 0x1b9   : > { %1070 = vmatmul.mubr.bf16.vlgmr.msra.gmra.mrb[0].mxu0 %v837_v23  ;;  %1110 = vmatmul.mubr.bf16.vlgmr.msra.gmra.mrb[0].mxu1 %v841_v39 }
 0x1ba   : > { %1151 = vmatpush1.bf16.msra.mxu1 %v2573_v12  ;;  %1079 = vmatprep.mubr.bf16.mxu0 %v2869_v14 }
 0x1bb   : > { %1152 = vmatprep.subr.bf16.mxu1 %v2578_v42  ;;  %1119 = vmatprep.mubr.bf16.mxu1 %v2869_v14 }
 0x1bc   : > { %2332 = vmatpush3.bf16.msra.mxu0 %v2598_v63 }
 0x1bd   : > { %2333 = vmatprep.subr.bf16.mxu0 %v2599_v59 }
 0x1be   : > { %1153 = vmatpush1.bf16.msra.mxu1 %v2576_v2 }
 0x1bf   : > { %1154 = vmatprep.subr.bf16.mxu1 %v2581_v45 }
 0x1c0   : > { %2334 = vmatpush3.bf16.msra.mxu0 %v2600_v31 }
 0x1c1   : > { %1080 = vmatmul.mubr.bf16.gmra.mrb[4].mxu0 %v838_v18  ;;  %1120 = vmatmul.mubr.bf16.gmra.mrb[4].mxu1 %v842_v57 }
 0x1c2   : > { %1155 = vmatpush1.bf16.msra.mxu1 %v2579_v27  ;;  %1089 = vmatprep.mubr.bf16.mxu0 %v2869_v14 }
 0x1c3   : > { %1156 = vmatprep.subr.bf16.mxu1 %v2584_v56  ;;  %1129 = vmatprep.mubr.bf16.mxu1 %v2869_v14 }
 0x1c4   : > { %2335 = vmatprep.subr.bf16.mxu0 %v2601_v28 }
 0x1c5   : > { %2336 = vmatpush3.bf16.msra.mxu0 %v2602_v61 }
 0x1c6   : > { %1157 = vmatpush1.bf16.msra.mxu1 %v2582_v26  ;;  %2337 = vmatprep.subr.bf16.mxu0 %v2603_v0 }
 0x1c7   : > { %1158 = vmatprep.subr.bf16.mxu1 %v2587_v29 }
 0x1c9   : > { %1090 = vmatmul.mubr.bf16.gmra.mrb[8].mxu0 %v839_v43  ;;  %1130 = vmatmul.mubr.bf16.gmra.mrb[8].mxu1 %v843_v38 }
 0x1ca   : > { %1159 = vmatpush1.bf16.msra.mxu1 %v2585_v52  ;;  %1099 = vmatprep.mubr.bf16.mxu0 %v2869_v14 }
 0x1cb   : > { %1160 = vmatprep.subr.bf16.mxu1 %v2590_v60  ;;  %1139 = vmatprep.mubr.bf16.mxu1 %v2869_v14 }
 0x1cc   : > { %2338 = vmatpush3.bf16.msra.mxu0 %v2604_v1 }
 0x1cd   : > { %2339 = vmatprep.subr.bf16.mxu0 %v2605_v3 }
 0x1ce   : > { %1161 = vmatpush1.bf16.msra.mxu1 %v2588_v21 }
 0x1cf   : > { %1162 = vmatprep.subr.bf16.mxu1 %v2593_v53 }
 0x1d0   : > { %2340 = vmatpush3.bf16.msra.mxu0 %v2606_v6 }
 0x1d1   : > { %1100 = vmatmul.mubr.bf16.gmra.mrb[12].mxu0 %v840_v35  ;;  %1140 = vmatmul.mubr.bf16.gmra.mrb[12].mxu1 %v844_v54 }
 0x1d2   : > { %1163 = vmatpush1.bf16.msra.mxu1 %v2591_v46  ;;  %1182 = vmatprep.mubr.bf16.mxu1 %v2869_v14 }
 0x1d3   : > { %1164 = vmatprep.subr.bf16.mxu1 %v2596_v48  ;;  %2341 = vmatprep.subr.bf16.mxu0 %v2607_v55 }
 0x1d4   : > { %2342 = vmatpush3.bf16.msra.mxu0 %v2608_v25 }
 0x1d5   : > { %2343 = vmatprep.subr.bf16.mxu0 %v2609_v9 }
 0x1d6   : > { %1165 = vmatpush1.bf16.msra.mxu1 %v2594_v32 }
 0x1d8   : > { %2344 = vmatpush3.bf16.msra.mxu0 %v2610_v13 }
 0x1d9   : > { %1183 = vmatmul.mubr.bf16.vlgmr.msra.gmra.mrb[16].mxu1 %v837_v23  ;;  %2345 = vmatprep.subr.bf16.mxu0 %v2611_v58 }
 0x1da   : > { %1192 = vmatprep.mubr.bf16.mxu1 %v2869_v14 }
 0x1dc   : > { %2346 = vmatpush3.bf16.msra.mxu0 %v2612_v36 }
 0x1e1   : > { %1193 = vmatmul.mubr.bf16.gmra.mrb[20].mxu1 %v838_v18 }
 0x1e2   : > { %1202 = vmatprep.mubr.bf16.mxu1 %v2869_v14 }
 0x1e9   : > { %1203 = vmatmul.mubr.bf16.gmra.mrb[24].mxu1 %v839_v43 }
 0x1ea   : > { %1212 = vmatprep.mubr.bf16.mxu1 %v2869_v14 }
 0x1f1   : > { %1213 = vmatmul.mubr.bf16.gmra.mrb[28].mxu1 %v840_v35 }
 0x1f2   : > { %1222 = vmatprep.mubr.bf16.mxu1 %v2869_v14 }
 0x1f9   : > { %1223 = vmatmul.mubr.bf16.gmra.mrb[32].mxu1 %v841_v39 }
 0x1fa   : > { %1232 = vmatprep.mubr.bf16.mxu1 %v2869_v14 }
 0x201   : > { %1233 = vmatmul.mubr.bf16.gmra.mrb[36].mxu1 %v842_v57 }
 0x202   : > { %1242 = vmatprep.mubr.bf16.mxu1 %v2869_v14 }
 0x209   : > { %1243 = vmatmul.mubr.bf16.gmra.mrb[40].mxu1 %v843_v38 }
 0x20a   : > { %1252 = vmatprep.mubr.bf16.mxu1 %v2869_v14 }
 0x211   : > { %1253 = vmatmul.mubr.bf16.gmra.mrb[44].mxu1 %v844_v54 }
 0x28c   : > { %v3556_v37 = vpop.f32.mrb[0].mxu0  ;;  %v3558_v4 = vpop.f32.mrb[0].mxu1 }
 0x28d   : > { %v2234_v17 = vmul.f32 -1.442695, %v3556_v37  ;;  %v3561_v5 = vpop.f32.mrb[1].mxu0  ;;  %v3563_v62 = vpop.f32.mrb[1].mxu1  ;;  %v2250_v15 = vmul.f32 -1.442695, %v3558_v4 }
 0x28e   : > { %v2235_v50 = vmul.f32 -1.442695, %v3561_v5  ;;  %v3566_v47 = vpop.f32.mrb[2].mxu0  ;;  %v3568_v24 = vpop.f32.mrb[2].mxu1  ;;  %v2251_v19 = vmul.f32 -1.442695, %v3563_v62 }
 0x28f   : > { %2613 = vpow2.f32 %v2234_v17  ;;  %v2236_v8 = vmul.f32 -1.442695, %v3566_v47  ;;  %v3571_v14 = vpop.f32.mrb[3].mxu0  ;;  %v3573_v10 = vpop.f32.mrb[3].mxu1  ;;  %v2252_v23 = vmul.f32 -1.442695, %v3568_v24 }
 0x290   : > { %2615 = vpow2.f32 %v2235_v50  ;;  %v2237_v16 = vmul.f32 -1.442695, %v3571_v14  ;;  %v2253_v12 = vmul.f32 -1.442695, %v3573_v10 }
 0x291   : > { %2617 = vpow2.f32 %v2236_v8 }
 0x292   : > { %2619 = vpow2.f32 %v2237_v16 }
 0x294   : > { %v3577_v22 = vpop.f32.mrb[4].mxu0  ;;  %v3579_v41 = vpop.f32.mrb[4].mxu1 }
 0x295   : > { %v2238_v51 = vmul.f32 -1.442695, %v3577_v22  ;;  %v3582_v30 = vpop.f32.mrb[5].mxu0  ;;  %v3584_v44 = vpop.f32.mrb[5].mxu1  ;;  %v2254_v56 = vmul.f32 -1.442695, %v3579_v41 }
 0x296   : > { %v2239_v49 = vmul.f32 -1.442695, %v3582_v30  ;;  %v3588_v33 = vpop.f32.mrb[6].mxu0  ;;  %v3590_v34 = vpop.f32.mrb[6].mxu1  ;;  %v2255_v53 = vmul.f32 -1.442695, %v3584_v44 }
 0x297   : > { %2621 = vpow2.f32 %v2238_v51  ;;  %v2240_v20 = vmul.f32 -1.442695, %v3588_v33  ;;  %v3593_v40 = vpop.f32.mrb[7].mxu0  ;;  %v3595_v7 = vpop.f32.mrb[7].mxu1 }
 0x298   : > { %2623 = vpow2.f32 %v2250_v15  ;;  %v2241_v55 = vmul.f32 -1.442695, %v3593_v40 }
 0x299   : > { %v2614_v39 = vpop.eup %2613  ;;  %2625 = vpow2.f32 %v2239_v49 }
 0x29a   : > { %v1359_v42 = vadd.f32 1.0, %v2614_v39  ;;  %2627 = vpow2.f32 %v2251_v19  ;;  %v2616_v2 = vpop.eup %2615 }
 0x29b   : > { %2629 = vpow2.f32 %v2240_v20  ;;  %v1360_v45 = vadd.f32 1.0, %v2616_v2  ;;  %v2618_v27 = vpop.eup %2617 }
 0x29c   : > { %2631 = vpow2.f32 %v2252_v23  ;;  %v3599_v18 = vpop.f32.mrb[8].mxu0  ;;  %v3601_v57 = vpop.f32.mrb[8].mxu1  ;;  %v1361_v29 = vadd.f32 1.0, %v2618_v27 }
 0x29d   : > { %2633 = vpow2.f32 %v2253_v12  ;;  %v3604_v26 = vpop.f32.mrb[9].mxu0  ;;  %v3606_v43 = vpop.f32.mrb[9].mxu1  ;;  %v2242_v8 = vmul.f32 -1.442695, %v3599_v18 }
 0x29e   : > { %2635 = vrcp.f32 %v1359_v42  ;;  %v3608_v38 = vpop.f32.mrb[10].mxu0  ;;  %v2620_v52 = vpop.eup %2619  ;;  %v2243_v49 = vmul.f32 -1.442695, %v3604_v26 }
 0x29f   : > { %2637 = vrcp.f32 %v1360_v45  ;;  %v3610_v60 = vpop.f32.mrb[10].mxu1  ;;  %v1362_v21 = vadd.f32 1.0, %v2620_v52  ;;  %v3613_v35 = vpop.f32.mrb[11].mxu0  ;;  %v2244_v2 = vmul.f32 -1.442695, %v3608_v38 }
 0x2a0   : > { %2639 = vrcp.f32 %v1361_v29  ;;  %v3615_v54 = vpop.f32.mrb[11].mxu1 }
 0x2a1   : > { %v2622_v46 = vpop.eup %2621  ;;  %2641 = vpow2.f32 %v2254_v56  ;;  %v2256_v56 = vmul.f32 -1.442695, %v3590_v34 }
 0x2a2   : > { %v2624_v48 = vpop.eup %2623  ;;  %2643 = vrcp.f32 %v1362_v21  ;;  %v1363_v32 = vadd.f32 1.0, %v2622_v46 }
 0x2a3   : > { %v2626_v11 = vpop.eup %2625  ;;  %2645 = vpow2.f32 %v2255_v53  ;;  %v1375_v0 = vadd.f32 1.0, %v2624_v48 }
 0x2a4   : > { %v2628_v63 = vpop.eup %2627  ;;  %v1364_v59 = vadd.f32 1.0, %v2626_v11  ;;  %v3617_v31 = vpop.f32.mrb[12].mxu0  ;;  %2647 = vrcp.f32 %v1363_v32 }
 0x2a5   : > { %v3619_v28 = vpop.f32.mrb[12].mxu1  ;;  %v2630_v61 = vpop.eup %2629  ;;  %v1376_v58 = vadd.f32 1.0, %v2628_v63 }
 0x2a6   : > { %v3621_v1 = vpop.f32.mrb[13].mxu0  ;;  %v2632_v3 = vpop.eup %2631  ;;  %v1365_v6 = vadd.f32 1.0, %v2630_v61  ;;  %2649 = vrcp.f32 %v1364_v59 }
 0x2a7   : > { %v3624_v25 = vpop.f32.mrb[13].mxu1  ;;  %v3626_v9 = vpop.f32.mrb[14].mxu0  ;;  %v1377_v51 = vadd.f32 1.0, %v2632_v3 }
 0x2a8   : > { %v2634_v13 = vpop.eup %2633  ;;  %v3628_v36 = vpop.f32.mrb[14].mxu1  ;;  %2651 = vrcp.f32 %v1365_v6 }
 0x2a9   : > { %v3630_v17 = vpop.f32.mrb[15].mxu0  ;;  %v2636_v50 = vpop.eup %2635  ;;  %2653 = vrcp.f32 %v1375_v0  ;;  %v1378_v39 = vadd.f32 1.0, %v2634_v13 }
 0x2aa   : > { %v3633_v16 = vpop.f32.mrb[15].mxu1  ;;  %v2638_v15 = vpop.eup %2637  ;;  %2655 = vpow2.f32 %v2241_v55  ;;  %v1455_v23 = vmul.f32 %v2636_v50, %v3556_v37  ;;  %v2245_v37 = vmul.f32 -1.442695, %v3613_v35 }
 0x2ab   : > { %v2640_v19 = vpop.eup %2639  ;;  %2657 = vrcp.f32 %v1376_v58  ;;  %v1456_v42 = vmul.f32 %v2638_v15, %v3561_v5  ;;  %v2258_v15 = vmul.f32 -1.442695, %v3601_v57 }
 0x2ac   : > { %v2642_v20 = vpop.eup %2641  ;;  %2659 = vpow2.f32 %v2242_v8  ;;  %v1184_v45 = vpop.f32.mrb[16].mxu1  ;;  %v1457_v27 = vmul.f32 %v2640_v19, %v3566_v47  ;;  %v2246_v47 = vmul.f32 -1.442695, %v3617_v31 }
 0x2ad   : > { %v2644_v12 = vpop.eup %2643  ;;  %2661 = vrcp.f32 %v1377_v51  ;;  %v1487_v29 = vmul.f32 %v1455_v23, %v1184_v45  ;;  %v1186_v52 = vpop.f32.mrb[17].mxu1  ;;  %v1379_v5 = vadd.f32 1.0, %v2642_v20 }
 0x2ae   : > { %v2646_v21 = vpop.eup %2645  ;;  %v1458_v53 = vmul.f32 %v2644_v12, %v3571_v14  ;;  %2663 = vpow2.f32 %v2243_v49  ;;  %v1488_v46 = vmul.f32 %v1456_v42, %v1186_v52  ;;  %v1188_v48 = vpop.f32.mrb[18].mxu1  ;;  %v2257_v14 = vmul.f32 -1.442695, %v3595_v7 }
 0x2af   : > { %2665 = vrcp.f32 %v1378_v39  ;;  %v1489_v32 = vmul.f32 %v1457_v27, %v1188_v48  ;;  %v1190_v11 = vpop.f32.mrb[19].mxu1  ;;  %v2648_v63 = vpop.eup %2647  ;;  %v1380_v0 = vadd.f32 1.0, %v2646_v21  ;;  %v2259_v12 = vmul.f32 -1.442695, %v3606_v43 }
 0x2b0   : > { %2667 = vpow2.f32 %v2244_v2  ;;  %v1490_v59 = vmul.f32 %v1458_v53, %v1190_v11  ;;  %v2650_v61 = vpop.eup %2649  ;;  %v1459_v58 = vmul.f32 %v2648_v63, %v3577_v22  ;;  %v2262_v11 = vmul.f32 -1.442695, %v3619_v28 }
 0x2b1   : > { %2669 = vpow2.f32 %v2256_v56  ;;  %v1535_v3 = vpack.c.bf16 %v1489_v32, %v1487_v29  ;;  %v1460_v8 = vmul.f32 %v2650_v61, %v3582_v30  ;;  %v2260_v29 = vmul.f32 -1.442695, %v3610_v60 }
 0x2b2   : > { %v2652_v6 = vpop.eup %2651  ;;  %2671 = vpow2.f32 %v2245_v37  ;;  %v1536_v55 = vpack.c.bf16 %v1490_v59, %v1488_v46  ;;  %v2261_v46 = vmul.f32 -1.442695, %v3615_v54 }
 0x2b3   : > { %v3645_v13 = vpop.eup %2653  ;;  %2673 = vrcp.f32 %v1379_v5  ;;  %v1461_v49 = vmul.f32 %v2652_v6, %v3588_v33 }
 0x2b4   : > { %v2656_v50 = vpop.eup %2655  ;;  %2675 = vpow2.f32 %v2246_v47  ;;  %v1194_v51 = vpop.f32.mrb[20].mxu1  ;;  %1711 = vmatprep.mubr.bf16.mxu0 %v1536_v55 }
 0x2b5   : > { %v3650_v19 = vpop.eup %2657  ;;  %2677 = vrcp.f32 %v1380_v0  ;;  %v1366_v20 = vadd.f32 1.0, %v2656_v50  ;;  %v3653_v23 = vmul.f32 %v1459_v58, %v1194_v51  ;;  %v1196_v39 = vpop.f32.mrb[21].mxu1  ;;  %1712 = vmatmul.mubr.bf16.vlgmr.msra.gmra.mrb[16].mxu0 %v1535_v3  ;;  %v2247_v58 = vmul.f32 -1.442695, %v3621_v1 }
 0x2b6   : > { %v2660_v22 = vpop.eup %2659  ;;  %2679 = vpow2.f32 %v2257_v14  ;;  %v3656_v30 = vmul.f32 %v1460_v8, %v1196_v39  ;;  %v1198_v42 = vpop.f32.mrb[22].mxu1 }
 0x2b7   : > { %v3658_v2 = vpop.eup %2661  ;;  %2681 = vrcp.f32 %v1366_v20  ;;  %v1367_v45 = vadd.f32 1.0, %v2660_v22  ;;  %v3660_v27 = vmul.f32 %v1461_v49, %v1198_v42  ;;  %v1200_v56 = vpop.f32.mrb[23].mxu1  ;;  %v2248_v49 = vmul.f32 -1.442695, %v3626_v9 }
 0x2b8   : > { %v2664_v33 = vpop.eup %2663  ;;  %2683 = vpow2.f32 %v2258_v15  ;;  %v2263_v15 = vmul.f32 -1.442695, %v3624_v25  ;;  %v2264_v22 = vmul.f32 -1.442695, %v3628_v36  ;;  %v2249_v42 = vmul.f32 -1.442695, %v3630_v17 }
 0x2b9   : > { %v3663_v52 = vpop.eup %2665  ;;  %2685 = vrcp.f32 %v1367_v45  ;;  %v1368_v21 = vadd.f32 1.0, %v2664_v33  ;;  %v1537_v53 = vpack.c.bf16 %v3660_v27, %v3653_v23 }
 0x2ba   : > { %v2668_v37 = vpop.eup %2667  ;;  %2687 = vpow2.f32 %v2259_v12 }
 0x2bb   : > { %v2670_v48 = vpop.eup %2669  ;;  %2689 = vrcp.f32 %v1368_v21  ;;  %v1369_v5 = vadd.f32 1.0, %v2668_v37 }
 0x2bc   : > { %v2672_v32 = vpop.eup %2671  ;;  %2691 = vpow2.f32 %v2260_v29  ;;  %v1204_v63 = vpop.f32.mrb[24].mxu1  ;;  %v1381_v3 = vadd.f32 1.0, %v2670_v48  ;;  %v2265_v29 = vmul.f32 -1.442695, %v3633_v16 }
 0x2bd   : > { %v3669_v47 = vpop.eup %2673  ;;  %2693 = vrcp.f32 %v1369_v5  ;;  %v1370_v59 = vadd.f32 1.0, %v2672_v32  ;;  %v1206_v61 = vpop.f32.mrb[25].mxu1 }
 0x2be   : > { %v2676_v0 = vpop.eup %2675  ;;  %2695 = vpow2.f32 %v2261_v46  ;;  %v1208_v6 = vpop.f32.mrb[26].mxu1 }
 0x2bf   : > { %v3671_v14 = vpop.eup %2677  ;;  %2697 = vrcp.f32 %v1370_v59  ;;  %v1371_v55 = vadd.f32 1.0, %v2676_v0  ;;  %v1210_v50 = vpop.f32.mrb[27].mxu1 }
 0x2c0   : > { %v2680_v8 = vpop.eup %2679  ;;  %2699 = vpow2.f32 %v2262_v11 }
 0x2c1   : > { %v2682_v51 = vpop.eup %2681  ;;  %2701 = vrcp.f32 %v1371_v55  ;;  %v1382_v48 = vadd.f32 1.0, %v2680_v8 }
 0x2c2   : > { %v2684_v20 = vpop.eup %2683  ;;  %2703 = vrcp.f32 %v1381_v3  ;;  %v1462_v39 = vmul.f32 %v2682_v51, %v3593_v40 }
 0x2c3   : > { %v2686_v12 = vpop.eup %2685  ;;  %2705 = vpow2.f32 %v2247_v58  ;;  %v1383_v55 = vadd.f32 1.0, %v2684_v20  ;;  %v1471_v20 = vmul.f32 %v3645_v13, %v3558_v4 }
 0x2c4   : > { %v2688_v45 = vpop.eup %2687  ;;  %v1463_v33 = vmul.f32 %v2686_v12, %v3599_v18  ;;  %2707 = vpow2.f32 %v2263_v15  ;;  %v1494_v21 = vmul.f32 %v1462_v39, %v1200_v56  ;;  %v1214_v37 = vpop.f32.mrb[28].mxu1 }
 0x2c5   : > { %v2690_v46 = vpop.eup %2689  ;;  %2709 = vpow2.f32 %v2248_v49  ;;  %v3681_v5 = vpop.f32.mrb[29].mxu1 }
 0x2c6   : > { %v2692_v40 = vpop.eup %2691  ;;  %v1464_v32 = vmul.f32 %v2690_v46, %v3604_v26  ;;  %2711 = vpow2.f32 %v2264_v22  ;;  %v1538_v11 = vpack.c.bf16 %v1494_v21, %v3656_v30  ;;  %v1495_v59 = vmul.f32 %v1463_v33, %v1204_v63  ;;  %v3685_v0 = vpop.f32.mrb[30].mxu1 }
 0x2c7   : > { %v2694_v18 = vpop.eup %2693  ;;  %2713 = vpow2.f32 %v2249_v42  ;;  %v3687_v3 = vpop.f32.mrb[31].mxu1  ;;  %v1384_v26 = vadd.f32 1.0, %v2688_v45  ;;  %v1385_v39 = vadd.f32 1.0, %v2692_v40 }
 0x2c8   : > { %v2696_v56 = vpop.eup %2695  ;;  %v1465_v58 = vmul.f32 %v2694_v18, %v3608_v38  ;;  %2715 = vpow2.f32 %v2265_v29  ;;  %1719 = vmatprep.mubr.bf16.mxu0 %v1538_v11  ;;  %v1496_v8 = vmul.f32 %v1464_v32, %v1206_v61  ;;  %v1472_v38 = vmul.f32 %v3650_v19, %v3563_v62 }
 0x2c9   : > { %v2698_v15 = vpop.eup %2697  ;;  %2717 = vrcp.f32 %v1382_v48  ;;  %1720 = vmatmul.mubr.bf16.gmra.mrb[20].mxu0 %v1537_v53  ;;  %v1473_v61 = vmul.f32 %v3658_v2, %v3568_v24  ;;  %v1386_v4 = vadd.f32 1.0, %v2696_v56  ;;  %v1475_v18 = vmul.f32 %v3669_v47, %v3579_v41 }
 0x2ca   : > { %v2700_v30 = vpop.eup %2699  ;;  %v1466_v63 = vmul.f32 %v2698_v15, %v3613_v35  ;;  %v1497_v51 = vmul.f32 %v1465_v58, %v1208_v6  ;;  %2719 = vrcp.f32 %v1383_v55  ;;  %v1474_v6 = vmul.f32 %v3663_v52, %v3573_v10 }
 0x2cb   : > { %v2702_v49 = vpop.eup %2701  ;;  %2721 = vrcp.f32 %v1384_v26  ;;  %v1387_v40 = vadd.f32 1.0, %v2700_v30  ;;  %v1476_v55 = vmul.f32 %v3671_v14, %v3584_v44 }
 0x2cc   : > { %v2704_v22 = vpop.eup %2703  ;;  %v1467_v23 = vmul.f32 %v2702_v49, %v3617_v31  ;;  %v1539_v27 = vpack.c.bf16 %v1497_v51, %v1495_v59  ;;  %v1498_v53 = vmul.f32 %v1466_v63, %v1210_v50  ;;  %v1224_v12 = vpop.f32.mrb[32].mxu1  ;;  %2723 = vrcp.f32 %v1385_v39 }
 0x2cd   : > { %v2706_v35 = vpop.eup %2705  ;;  %v3703_v13 = vmul.f32 %v1471_v20, %v1224_v12  ;;  %v1226_v62 = vpop.f32.mrb[33].mxu1  ;;  %v1477_v15 = vmul.f32 %v2704_v22, %v3590_v34 }
 0x2ce   : > { %v2708_v19 = vpop.eup %2707  ;;  %v1372_v42 = vadd.f32 1.0, %v2706_v35  ;;  %v1540_v24 = vpack.c.bf16 %v1498_v53, %v1496_v8  ;;  %v3705_v2 = vmul.f32 %v1467_v23, %v1214_v37  ;;  %v3707_v45 = vmul.f32 %v1472_v38, %v1226_v62  ;;  %v1228_v31 = vpop.f32.mrb[34].mxu1 }
 0x2cf   : > { %v2710_v33 = vpop.eup %2709  ;;  %v3709_v50 = vmul.f32 %v1473_v61, %v1228_v31  ;;  %v1230_v29 = vpop.f32.mrb[35].mxu1  ;;  %v1388_v56 = vadd.f32 1.0, %v2708_v19 }
 0x2d0   : > { %v2712_v21 = vpop.eup %2711  ;;  %2725 = vrcp.f32 %v1372_v42  ;;  %v1373_v10 = vadd.f32 1.0, %v2710_v33  ;;  %1727 = vmatprep.mubr.bf16.mxu0 %v1540_v24  ;;  %v3711_v52 = vmul.f32 %v1474_v6, %v1230_v29 }
 0x2d1   : > { %v2714_v46 = vpop.eup %2713  ;;  %2727 = vrcp.f32 %v1386_v4  ;;  %1728 = vmatmul.mubr.bf16.gmra.mrb[24].mxu0 %v1539_v27  ;;  %v1543_v37 = vpack.c.bf16 %v3709_v50, %v3703_v13  ;;  %v1389_v58 = vadd.f32 1.0, %v2712_v21  ;;  %v1521_v50 = vld [vmem:[#allocation2 + $0x10] sm:$0xff] }
 0x2d2   : > { %v2716_v48 = vpop.eup %2715  ;;  %2729 = vrcp.f32 %v1373_v10  ;;  %v1374_v32 = vadd.f32 1.0, %v2714_v46  ;;  %v1544_v11 = vpack.c.bf16 %v3711_v52, %v3707_v45 }
 0x2d3   : > { %v2718_v59 = vpop.eup %2717  ;;  %v1390_v26 = vadd.f32 1.0, %v2716_v48 }
 0x2d4   : > { %2731 = vrcp.f32 %v1374_v32  ;;  %v1234_v8 = vpop.f32.mrb[36].mxu1  ;;  %v2720_v51 = vpop.eup %2719  ;;  %v1478_v49 = vmul.f32 %v2718_v59, %v3595_v7 }
 0x2d5   : > { %v3722_v30 = vmul.f32 %v1475_v18, %v1234_v8  ;;  %v1236_v63 = vpop.f32.mrb[37].mxu1  ;;  %2733 = vrcp.f32 %v1387_v40  ;;  %v2722_v41 = vpop.eup %2721  ;;  %v1479_v27 = vmul.f32 %v2720_v51, %v3601_v57 }
 0x2d6   : > { %v1508_v20 = vmul.f32 %v1476_v55, %v1236_v63  ;;  %v1238_v38 = vpop.f32.mrb[38].mxu1  ;;  %2735 = vrcp.f32 %v1388_v56  ;;  %v2724_v14 = vpop.eup %2723  ;;  %v1480_v12 = vmul.f32 %v2722_v41, %v3606_v43 }
 0x2d7   : > { %v1509_v47 = vmul.f32 %v1477_v15, %v1238_v38  ;;  %v1240_v61 = vpop.f32.mrb[39].mxu1  ;;  %2737 = vrcp.f32 %v1389_v58  ;;  %v1481_v6 = vmul.f32 %v2724_v14, %v3610_v60 }
 0x2d8   : > { %v1510_v44 = vmul.f32 %v1478_v49, %v1240_v61  ;;  %2739 = vrcp.f32 %v1390_v26  ;;  %v1522_v61 = vld [vmem:[#allocation2 + $0x18] sm:$0xff] }
 0x2d9   : > { %v1545_v34 = vpack.c.bf16 %v1509_v47, %v3722_v30 }
 0x2da   : > { %v2726_v39 = vpop.eup %2725  ;;  %v1546_v22 = vpack.c.bf16 %v1510_v44, %v1508_v20 }
 0x2db   : > { %v2728_v23 = vpop.eup %2727  ;;  %v1468_v7 = vmul.f32 %v2726_v39, %v3621_v1 }
 0x2dc   : > { %v2730_v53 = vpop.eup %2729  ;;  %v1244_v35 = vpop.f32.mrb[40].mxu1  ;;  %v1482_v31 = vmul.f32 %v2728_v23, %v3615_v54  ;;  %v1523_v23 = vld [vmem:[#allocation2 + $0x20] sm:$0xff] }
 0x2dd   : > { %v1469_v4 = vmul.f32 %v2730_v53, %v3626_v9  ;;  %v1500_v62 = vmul.f32 %v1468_v7, %v3681_v5  ;;  %v1511_v19 = vmul.f32 %v1479_v27, %v1244_v35  ;;  %v1246_v42 = vpop.f32.mrb[41].mxu1 }
 0x2de   : > { %v2732_v24 = vpop.eup %2731  ;;  %v1512_v33 = vmul.f32 %v1480_v12, %v1246_v42  ;;  %v1248_v29 = vpop.f32.mrb[42].mxu1  ;;  %v1524_v12 = vld [vmem:[#allocation2 + $0x28] sm:$0xff]  ;;  %v1525_v42 = vld [vmem:[#allocation2 + $0x30] sm:$0xff] }
 0x2df   : > { %v1470_v57 = vmul.f32 %v2732_v24, %v3630_v17  ;;  %v1501_v1 = vmul.f32 %v1469_v4, %v3685_v0  ;;  %v1513_v21 = vmul.f32 %v1481_v6, %v1248_v29  ;;  %v1250_v43 = vpop.f32.mrb[43].mxu1  ;;  %v2734_v10 = vpop.eup %2733  ;;  %v1526_v29 = vld [vmem:[#allocation2 + $0x38] sm:$0xff] }
 0x2e0   : > { %v1514_v46 = vmul.f32 %v1482_v31, %v1250_v43  ;;  %v2736_v60 = vpop.eup %2735  ;;  %v1483_v54 = vmul.f32 %v2734_v10, %v3619_v28 }
 0x2e1   : > { %v1541_v9 = vpack.c.bf16 %v1501_v1, %v3705_v2  ;;  %v1502_v5 = vmul.f32 %v1470_v57, %v3687_v3  ;;  %v1547_v48 = vpack.c.bf16 %v1513_v21, %v1511_v19  ;;  %v2738_v40 = vpop.eup %2737  ;;  %v1484_v17 = vmul.f32 %v2736_v60, %v3624_v25 }
 0x2e2   : > { %v1548_v32 = vpack.c.bf16 %v1514_v46, %v1512_v33  ;;  %v2740_v59 = vpop.eup %2739  ;;  %v1485_v0 = vmul.f32 %v2738_v40, %v3628_v36  ;;  %v1527_v46 = vld [vmem:[#allocation2 + $0x40] sm:$0xff] }
 0x2e3   : > { %v1542_v18 = vpack.c.bf16 %v1502_v5, %v1500_v62  ;;  %v1486_v8 = vmul.f32 %v2740_v59, %v3633_v16  ;;  %v1519_v16 = vld [vmem:[#allocation2] sm:$0xff] }
 0x2e4   : > { %v1254_v56 = vpop.f32.mrb[44].mxu1 }
 0x2e5   : > { %1735 = vmatprep.mubr.bf16.mxu0 %v1542_v18  ;;  %v1515_v55 = vmul.f32 %v1483_v54, %v1254_v56  ;;  %v1256_v58 = vpop.f32.mrb[45].mxu1 }
 0x2e6   : > { %1736 = vmatmul.mubr.bf16.gmra.mrb[28].mxu0 %v1541_v9  ;;  %v1516_v2 = vmul.f32 %v1484_v17, %v1256_v58  ;;  %v1258_v3 = vpop.f32.mrb[46].mxu1  ;;  %v1529_v17 = vld [vmem:[#allocation2 + $0x50] sm:$0xff]  ;;  %v1530_v58 = vld [vmem:[#allocation2 + $0x58] sm:$0xff] }
 0x2e7   : > { %1743 = vmatprep.mubr.bf16.mxu0 %v1544_v11  ;;  %v1517_v15 = vmul.f32 %v1485_v0, %v1258_v3  ;;  %v1260_v28 = vpop.f32.mrb[47].mxu1  ;;  %v1520_v11 = vld [vmem:[#allocation2 + $0x8] sm:$0xff] }
 0x2e8   : > { %v1518_v26 = vmul.f32 %v1486_v8, %v1260_v28 }
 0x2e9   : > { %v1549_v30 = vpack.c.bf16 %v1517_v15, %v1515_v55 }
 0x2ea   : > { %v1550_v25 = vpack.c.bf16 %v1518_v26, %v1516_v2  ;;  %v1531_v26 = vld [vmem:[#allocation2 + $0x60] sm:$0xff] }
 0x2ee   : > { %1744 = vmatmul.mubr.bf16.gmra.mrb[32].mxu0 %v1543_v37 }
 0x2ef   : > { %1751 = vmatprep.mubr.bf16.mxu0 %v1546_v22 }
 0x2f6   : > { %1752 = vmatmul.mubr.bf16.gmra.mrb[36].mxu0 %v1545_v34 }
 0x2f7   : > { %1759 = vmatprep.mubr.bf16.mxu0 %v1548_v32 }
 0x2fe   : > { %1760 = vmatmul.mubr.bf16.gmra.mrb[40].mxu0 %v1547_v48  ;;  %v1528_v48 = vld [vmem:[#allocation2 + $0x48] sm:$0xff] }
 0x2ff   : > { %1767 = vmatprep.mubr.bf16.mxu0 %v1550_v25 }
 0x306   : > { %1768 = vmatmul.mubr.bf16.gmra.mrb[44].mxu0 %v1549_v30 }
 0x388   : > { %v2347_v36 = vpop.f32.mrb[16].mxu0 }
 0x389   : > { %v2348_v63 = vpop.f32.mrb[17].mxu0 }
 0x38a   : > { %v2349_v45 = vadd.f32 %v2348_v63, %v2347_v36  ;;  %v2350_v52 = vpop.f32.mrb[18].mxu0 }
 0x38b   : > { %v2351_v51 = vpop.f32.mrb[19].mxu0 }
 0x38c   : > { %v1776_v49 = vadd.f32 %v2349_v45, %v1519_v16  ;;  %v2352_v20 = vadd.f32 %v2351_v51, %v2350_v52  ;;  %v1532_v16 = vld [vmem:[#allocation2 + $0x68] sm:$0xff] }
 0x38e   : > { %1792 = vst [vmem:[#allocation2] sm:$0xff] %v1776_v49  ;;  %v1777_v38 = vadd.f32 %v2352_v20, %v1520_v11  ;;  %v1533_v49 = vld [vmem:[#allocation2 + $0x70] sm:$0xff] }
 0x390   : > { %1793 = vst [vmem:[#allocation2 + $0x8] sm:$0xff] %v1777_v38 }
 0x39c   : > { %v2353_v13 = vpop.f32.mrb[20].mxu0 }
 0x39d   : > { %v2354_v37 = vpop.f32.mrb[21].mxu0 }
 0x39e   : > { %v2355_v41 = vadd.f32 %v2354_v37, %v2353_v13  ;;  %v2356_v47 = vpop.f32.mrb[22].mxu0 }
 0x39f   : > { %v2357_v44 = vpop.f32.mrb[23].mxu0 }
 0x3a0   : > { %v1778_v14 = vadd.f32 %v2355_v41, %v1521_v50  ;;  %v2358_v34 = vadd.f32 %v2357_v44, %v2356_v47  ;;  %v1534_v50 = vld [vmem:[#allocation2 + $0x78] sm:$0xff] }
 0x3a2   : > { %1794 = vst [vmem:[#allocation2 + $0x10] sm:$0xff] %v1778_v14  ;;  %v1779_v39 = vadd.f32 %v2358_v34, %v1522_v61  ;;  %v3750_v14 = vld [vmem:[#allocation2] sm:$0xff] (!%p2282_p1) }
 0x3a4   : > { %1795 = vst [vmem:[#allocation2 + $0x18] sm:$0xff] %v1779_v39  ;;  %v2359_v22 = vpop.f32.mrb[24].mxu0 }
 0x3a5   : > { %v2360_v27 = vpop.f32.mrb[25].mxu0 }
 0x3a6   : > { %v2361_v7 = vadd.f32 %v2360_v27, %v2359_v22  ;;  %v2362_v53 = vpop.f32.mrb[26].mxu0  ;;  %v1829_v22 = vmul.f32 (!%p2282_p1), %v3750_v14, %v3750_v14 }
 0x3a7   : > { %v2363_v35 = vpop.f32.mrb[27].mxu0 }
 0x3a8   : > { %v1780_v6 = vadd.f32 %v2361_v7, %v1523_v23  ;;  %v2364_v4 = vadd.f32 %v2363_v35, %v2362_v53  ;;  %v3758_v23 = vld [vmem:[#allocation2 + $0x8] sm:$0xff] (!%p2282_p1)  ;;  %1845 = vadd.xlane.f32.xlu0 (!%p2282_p1), %v1829_v22 }
 0x3a9   : > { %v3748_v44 = vld [vmem:[#allocation2 + $0x10] sm:$0xff] (!%p2282_p1)  ;;  %v1830_v7 = vmul.f32 (!%p2282_p1), %v3758_v23, %v3758_v23 }
 0x3aa   : > { %1796 = vst [vmem:[#allocation2 + $0x20] sm:$0xff] %v1780_v6  ;;  %v1781_v62 = vadd.f32 %v2364_v4, %v1524_v12  ;;  %v1831_v39 = vmul.f32 (!%p2282_p1), %v3748_v44, %v3748_v44 }
 0x3ab   : > { %v3752_v34 = vld [vmem:[#allocation2 + $0x18] sm:$0xff] (!%p2282_p1) }
 0x3ac   : > { %1797 = vst [vmem:[#allocation2 + $0x28] sm:$0xff] %v1781_v62  ;;  %1849 = vadd.xlane.f32.xlu1 (!%p2282_p1), %v1831_v39  ;;  %v1832_v27 = vmul.f32 (!%p2282_p1), %v3752_v34, %v3752_v34  ;;  %1847 = vadd.xlane.f32.xlu0 (!%p2282_p1), %v1830_v7 }
 0x3b0   : > { %1851 = vadd.xlane.f32.xlu1 (!%p2282_p1), %v1832_v27 }
 0x3b1   : > { %v3766_v12 = vld [vmem:[#allocation2 + $0x20] sm:$0xff] (!%p2282_p1) }
 0x3b2   : > { %v1833_v6 = vmul.f32 (!%p2282_p1), %v3766_v12, %v3766_v12 }
 0x3b3   : > { %v3764_v53 = vld [vmem:[#allocation2 + $0x28] sm:$0xff] (!%p2282_p1) }
 0x3b4   : > { %v1834_v35 = vmul.f32 (!%p2282_p1), %v3764_v53, %v3764_v53  ;;  %1853 = vadd.xlane.f32.xlu0 (!%p2282_p1), %v1833_v6 }
 0x3b6   : > { %1855 = vadd.xlane.f32.xlu1 (!%p2282_p1), %v1834_v35  ;;  %v3844_v35 = vld [vmem:[%s4069_s5] ss:$0 sm:$0xff] (!%p2282_p1) }
 0x3b9   : > { %v2365_v19 = vpop.f32.mrb[28].mxu0 }
 0x3ba   : > { %v2366_v24 = vpop.f32.mrb[29].mxu0 }
 0x3bb   : > { %v2367_v31 = vadd.f32 %v2366_v24, %v2365_v19  ;;  %v2368_v33 = vpop.f32.mrb[30].mxu0 }
 0x3bc   : > { %v2369_v57 = vpop.f32.mrb[31].mxu0 }
 0x3bd   : > { %v1782_v1 = vadd.f32 %v2367_v31, %v1525_v42  ;;  %v2370_v21 = vadd.f32 %v2369_v57, %v2368_v33 }
 0x3bf   : > { %1798 = vst [vmem:[#allocation2 + $0x30] sm:$0xff] %v1782_v1  ;;  %v1783_v43 = vadd.f32 %v2370_v21, %v1526_v29 }
 0x3c1   : > { %1799 = vst [vmem:[#allocation2 + $0x38] sm:$0xff] %v1783_v43  ;;  %v2371_v10 = vpop.f32.mrb[32].mxu0 }
 0x3c2   : > { %v2372_v60 = vpop.f32.mrb[33].mxu0 }
 0x3c3   : > { %v2373_v9 = vadd.f32 %v2372_v60, %v2371_v10  ;;  %v2374_v5 = vpop.f32.mrb[34].mxu0 }
 0x3c4   : > { %v2375_v40 = vpop.f32.mrb[35].mxu0 }
 0x3c5   : > { %v1784_v32 = vadd.f32 %v2373_v9, %v1527_v46  ;;  %v2376_v59 = vadd.f32 %v2375_v40, %v2374_v5 }
 0x3c6   : > { %v3774_v62 = vld [vmem:[#allocation2 + $0x30] sm:$0xff] (!%p2282_p1) }
 0x3c7   : > { %1800 = vst [vmem:[#allocation2 + $0x40] sm:$0xff] %v1784_v32  ;;  %v1785_v54 = vadd.f32 %v2376_v59, %v1528_v48  ;;  %v1835_v42 = vmul.f32 (!%p2282_p1), %v3774_v62, %v3774_v62 }
 0x3c8   : > { %v3772_v4 = vld [vmem:[#allocation2 + $0x38] sm:$0xff] (!%p2282_p1) }
 0x3c9   : > { %1801 = vst [vmem:[#allocation2 + $0x48] sm:$0xff] %v1785_v54  ;;  %v2377_v18 = vpop.f32.mrb[36].mxu0  ;;  %v1836_v19 = vmul.f32 (!%p2282_p1), %v3772_v4, %v3772_v4  ;;  %1857 = vadd.xlane.f32.xlu0 (!%p2282_p1), %v1835_v42 }
 0x3ca   : > { %v2378_v56 = vpop.f32.mrb[37].mxu0 }
 0x3cb   : > { %v2379_v0 = vadd.f32 %v2378_v56, %v2377_v18  ;;  %v2380_v55 = vpop.f32.mrb[38].mxu0  ;;  %1859 = vadd.xlane.f32.xlu1 (!%p2282_p1), %v1836_v19 }
 0x3cc   : > { %v2381_v8 = vpop.f32.mrb[39].mxu0 }
 0x3cd   : > { %v1786_v2 = vadd.f32 %v2379_v0, %v1529_v17  ;;  %v2382_v3 = vadd.f32 %v2381_v8, %v2380_v55 }
 0x3ce   : > { %v3782_v31 = vld [vmem:[#allocation2 + $0x40] sm:$0xff] (!%p2282_p1) }
 0x3cf   : > { %1802 = vst [vmem:[#allocation2 + $0x50] sm:$0xff] %v1786_v2  ;;  %v1787_v15 = vadd.f32 %v2382_v3, %v1530_v58  ;;  %v1837_v29 = vmul.f32 (!%p2282_p1), %v3782_v31, %v3782_v31 }
 0x3d0   : > { %v3780_v24 = vld [vmem:[#allocation2 + $0x48] sm:$0xff] (!%p2282_p1) }
 0x3d1   : > { %1803 = vst [vmem:[#allocation2 + $0x58] sm:$0xff] %v1787_v15  ;;  %v2383_v28 = vpop.f32.mrb[40].mxu0  ;;  %v1838_v33 = vmul.f32 (!%p2282_p1), %v3780_v24, %v3780_v24  ;;  %1861 = vadd.xlane.f32.xlu0 (!%p2282_p1), %v1837_v29 }
 0x3d2   : > { %v2384_v30 = vpop.f32.mrb[41].mxu0 }
 0x3d3   : > { %v2385_v25 = vadd.f32 %v2384_v30, %v2383_v28  ;;  %v2386_v36 = vpop.f32.mrb[42].mxu0  ;;  %1863 = vadd.xlane.f32.xlu1 (!%p2282_p1), %v1838_v33 }
 0x3d4   : > { %v2387_v63 = vpop.f32.mrb[43].mxu0 }
 0x3d5   : > { %v1788_v45 = vadd.f32 %v2385_v25, %v1531_v26  ;;  %v2388_v52 = vadd.f32 %v2387_v63, %v2386_v36 }
 0x3d6   : > { %v3790_v1 = vld [vmem:[#allocation2 + $0x50] sm:$0xff] (!%p2282_p1) }
 0x3d7   : > { %1804 = vst [vmem:[#allocation2 + $0x60] sm:$0xff] %v1788_v45  ;;  %v1789_v11 = vadd.f32 %v2388_v52, %v1532_v16  ;;  %v1839_v43 = vmul.f32 (!%p2282_p1), %v3790_v1, %v3790_v1 }
 0x3d8   : > { %v3788_v57 = vld [vmem:[#allocation2 + $0x58] sm:$0xff] (!%p2282_p1) }
 0x3d9   : > { %1805 = vst [vmem:[#allocation2 + $0x68] sm:$0xff] %v1789_v11  ;;  %v2389_v51 = vpop.f32.mrb[44].mxu0  ;;  %v1840_v21 = vmul.f32 (!%p2282_p1), %v3788_v57, %v3788_v57  ;;  %1865 = vadd.xlane.f32.xlu0 (!%p2282_p1), %v1839_v43 }
 0x3da   : > { %v2390_v20 = vpop.f32.mrb[45].mxu0 }
 0x3db   : > { %v2391_v38 = vadd.f32 %v2390_v20, %v2389_v51  ;;  %v2392_v13 = vpop.f32.mrb[46].mxu0  ;;  %1811 = sbr.rel (%p2282_p1) target bundleno = 1170 (0x492), region = 52  ;;  %1867 = vadd.xlane.f32.xlu1 (!%p2282_p1), %v1840_v21 }
 0x3dc   : > { %v2393_v37 = vpop.f32.mrb[47].mxu0 }
 0x3dd   : > { %v1790_v41 = vadd.f32 %v2391_v38, %v1533_v49  ;;  %v2394_v47 = vadd.f32 %v2393_v37, %v2392_v13 }
 0x3de   : > { %v3798_v46 = vld [vmem:[#allocation2 + $0x60] sm:$0xff] (!%p2282_p1) }
 0x3df   : > { %1806 = vst [vmem:[#allocation2 + $0x70] sm:$0xff] %v1790_v41  ;;  %v1791_v61 = vadd.f32 %v2394_v47, %v1534_v50  ;;  %v1841_v9 = vmul.f32 (!%p2282_p1), %v3798_v46, %v3798_v46 }
 0x3e0   : > { %v3796_v10 = vld [vmem:[#allocation2 + $0x68] sm:$0xff] (!%p2282_p1) }
 0x3e1   : > { %1807 = vst [vmem:[#allocation2 + $0x78] sm:$0xff] %v1791_v61  ;;  %v1842_v60 = vmul.f32 (!%p2282_p1), %v3796_v10, %v3796_v10  ;;  %1869 = vadd.xlane.f32.xlu0 (!%p2282_p1), %v1841_v9 }
 0x3e3   : > { %1871 = vadd.xlane.f32.xlu1 %v1842_v60 }
 0x3e6   : > { %v3806_v48 = vld [vmem:[#allocation2 + $0x70] sm:$0xff] }
 0x3e7   : > { %v1843_v32 = vmul.f32 %v3806_v48, %v3806_v48 }
 0x3e8   : > { %v3804_v5 = vld [vmem:[#allocation2 + $0x78] sm:$0xff] }
 0x3e9   : > { %v1844_v40 = vmul.f32 %v3804_v5, %v3804_v5  ;;  %1873 = vadd.xlane.f32.xlu0 %v1843_v32 }
 0x3eb   : > { %1875 = vadd.xlane.f32.xlu1 %v1844_v40 }
 0x435   : > { %v1846_v54 = vpop.xlane.xlu0 %1845 }
 0x436   : > { %v1878_v17 = vmul.f32 0.0078125, %v1846_v54 }
 0x438   : > { %vm1896_vm2 = vcmp.eq.f32.partialorder %v1878_v17, inf  ;;  %vm1898_vm3 = vcmp.eq.f32.partialorder %v1878_v17, 0.0  ;;  %v1899_v26 = vand.u32 2147483648, %v1878_v17 }
 0x439   : > { %v1850_v59 = vpop.xlane.xlu1 %1849  ;;  %v1848_v0 = vpop.xlane.xlu0 %1847 }
 0x43a   : > { %v1880_v18 = vmul.f32 0.0078125, %v1850_v59  ;;  %v3812_v58 = vmul.f32 0.0078125, %v1848_v0 }
 0x43c   : > { %2741 = vrsqrt.f32 %v1880_v18  ;;  %vm1910_vm0 = vcmp.eq.f32.partialorder %v1880_v18, inf  ;;  %vm1912_vm1 = vcmp.eq.f32.partialorder %v1880_v18, 0.0  ;;  %v1913_v28 = vand.u32 2147483648, %v1880_v18 }
 0x43d   : > { %2743 = vrsqrt.f32 %v1878_v17  ;;  %v1852_v56 = vpop.xlane.xlu1 %1851  ;;  %vm1903_vm6 = vcmp.eq.f32.partialorder %v3812_v58, inf  ;;  %vm1905_vm7 = vcmp.eq.f32.partialorder %v3812_v58, 0.0  ;;  %v1906_v49 = vand.u32 2147483648, %v3812_v58 }
 0x43e   : > { %v1881_v55 = vmul.f32 0.0078125, %v1852_v56 }
 0x440   : > { %2745 = vrsqrt.f32 %v1881_v55  ;;  %vm1917_vm4 = vcmp.eq.f32.partialorder %v1881_v55, inf  ;;  %vm1919_vm5 = vcmp.eq.f32.partialorder %v1881_v55, 0.0  ;;  %v1920_v11 = vand.u32 2147483648, %v1881_v55 }
 0x441   : > { %2747 = vrsqrt.f32 %v3812_v58  ;;  %v1854_v2 = vpop.xlane.xlu0 %1853 }
 0x442   : > { %v3817_v15 = vmul.f32 0.0078125, %v1854_v2 }
 0x443   : > { %v1856_v8 = vpop.xlane.xlu1 %1855 }
 0x444   : > { %v3815_v3 = vmul.f32 0.0078125, %v1856_v8  ;;  %vm1924_vm10 = vcmp.eq.f32.partialorder %v3817_v15, inf  ;;  %vm1926_vm11 = vcmp.eq.f32.partialorder %v3817_v15, 0.0  ;;  %v1927_v42 = vand.u32 2147483648, %v3817_v15 }
 0x446   : > { %2749 = vrsqrt.f32 %v3815_v3  ;;  %v2742_v36 = vpop.eup %2741  ;;  %vm1931_vm8 = vcmp.eq.f32.partialorder %v3815_v3, inf  ;;  %vm1933_vm9 = vcmp.eq.f32.partialorder %v3815_v3, 0.0  ;;  %v1934_v38 = vand.u32 2147483648, %v3815_v3 }
 0x447   : > { %2751 = vrsqrt.f32 %v3817_v15  ;;  %v2744_v45 = vpop.eup %2743  ;;  %v1909_v52 = vmul.f32 %v2742_v36, %v1880_v18 }
 0x448   : > { %v1895_v51 = vmul.f32 %v2744_v45, %v1878_v17 }
 0x449   : > { %v1911_v20 = vsel %vm1910_vm0, %v1880_v18, %v1909_v52 }
 0x44a   : > { %v2746_v37 = vpop.eup %2745  ;;  %v1914_v41 = vsel %vm1912_vm1, %v1913_v28, %v1911_v20  ;;  %v1897_v47 = vsel %vm1896_vm2, %v1878_v17, %v1895_v51 }
 0x44b   : > { %v2748_v61 = vpop.eup %2747  ;;  %v2008_v39 = vadd.f32 0.0001, %v1914_v41  ;;  %v1900_v22 = vsel %vm1898_vm3, %v1899_v26, %v1897_v47  ;;  %v1916_v27 = vmul.f32 %v2746_v37, %v1881_v55 }
 0x44c   : > { %v2006_v6 = vadd.f32 0.0001, %v1900_v22  ;;  %v1902_v19 = vmul.f32 %v2748_v61, %v3812_v58 }
 0x44d   : > { %v2024_v33 = vmul.f32 %v2008_v39, %v3748_v44  ;;  %v1918_v29 = vsel %vm1917_vm4, %v1881_v55, %v1916_v27 }
 0x44e   : > { %v2022_v9 = vmul.f32 %v2006_v6, %v3750_v14  ;;  %v1921_v40 = vsel %vm1919_vm5, %v1920_v11, %v1918_v29  ;;  %v1904_v32 = vsel %vm1903_vm6, %v3812_v58, %v1902_v19 }
 0x44f   : > { %v2046_v59 = vmul.f32 %v3844_v35, %v2024_v33  ;;  %v2009_v54 = vadd.f32 0.0001, %v1921_v40  ;;  %v1907_v18 = vsel %vm1905_vm7, %v1906_v49, %v1904_v32 }
 0x450   : > { %v2750_v60 = vpop.eup %2749  ;;  %v2044_v14 = vmul.f32 %v3844_v35, %v2022_v9  ;;  %v2007_v0 = vadd.f32 0.0001, %v1907_v18 }
 0x451   : > { %v2752_v44 = vpop.eup %2751  ;;  %v1930_v17 = vmul.f32 %v2750_v60, %v3815_v3  ;;  %2062 = vst [vmem:[%s2998_s13 + $0x10] sm:$0xff] %v2046_v59  ;;  %v2025_v2 = vmul.f32 %v2009_v54, %v3752_v34 }
 0x452   : > { %v1923_v55 = vmul.f32 %v2752_v44, %v3817_v15  ;;  %2060 = vst [vmem:[%s2998_s13] sm:$0xff] %v2044_v14  ;;  %v2023_v26 = vmul.f32 %v2007_v0, %v3758_v23 }
 0x453   : > { %v1932_v28 = vsel %vm1931_vm8, %v3815_v3, %v1930_v17  ;;  %v2047_v36 = vmul.f32 %v3844_v35, %v2025_v2 }
 0x454   : > { %v1925_v34 = vsel %vm1924_vm10, %v3817_v15, %v1923_v55  ;;  %v2045_v3 = vmul.f32 %v3844_v35, %v2023_v26 }
 0x455   : > { %v1928_v52 = vsel %vm1926_vm11, %v1927_v42, %v1925_v34  ;;  %2063 = vst [vmem:[%s2998_s13 + $0x18] sm:$0xff] %v2047_v36 }
 0x456   : > { %v1858_v25 = vpop.xlane.xlu0 %1857  ;;  %v2010_v51 = vadd.f32 0.0001, %v1928_v52  ;;  %2061 = vst [vmem:[%s2998_s13 + $0x8] sm:$0xff] %v2045_v3 }
 0x457   : > { %v3823_v63 = vmul.f32 0.0078125, %v1858_v25 }
 0x458   : > { %v1860_v30 = vpop.xlane.xlu1 %1859  ;;  %v2026_v41 = vmul.f32 %v2010_v51, %v3766_v12 }
 0x459   : > { %v3821_v16 = vmul.f32 0.0078125, %v1860_v30  ;;  %vm1938_vm14 = vcmp.eq.f32.partialorder %v3823_v63, inf  ;;  %v1935_v30 = vsel %vm1933_vm9, %v1934_v38, %v1932_v28  ;;  %vm1940_vm15 = vcmp.eq.f32.partialorder %v3823_v63, 0.0 }
 0x45a   : > { %v2011_v45 = vadd.f32 0.0001, %v1935_v30  ;;  %v1941_v20 = vand.u32 2147483648, %v3823_v63  ;;  %v2048_v12 = vmul.f32 %v3844_v35, %v2026_v41 }
 0x45b   : > { %2753 = vrsqrt.f32 %v3821_v16  ;;  %vm1945_vm12 = vcmp.eq.f32.partialorder %v3821_v16, inf  ;;  %vm1947_vm13 = vcmp.eq.f32.partialorder %v3821_v16, 0.0  ;;  %v1948_v8 = vand.u32 2147483648, %v3821_v16 }
 0x45c   : > { %2755 = vrsqrt.f32 %v3823_v63  ;;  %v2027_v38 = vmul.f32 %v2011_v45, %v3764_v53  ;;  %2064 = vst [vmem:[%s2998_s13 + $0x20] sm:$0xff] %v2048_v12 }
 0x45e   : > { %v1862_v50 = vpop.xlane.xlu0 %1861  ;;  %v2049_v22 = vmul.f32 %v3844_v35, %v2027_v38 }
 0x45f   : > { %v3852_v21 = vmul.f32 0.0078125, %v1862_v50 }
 0x460   : > { %v1864_v13 = vpop.xlane.xlu1 %1863  ;;  %2065 = vst [vmem:[%s2998_s13 + $0x28] sm:$0xff] %v2049_v22 }
 0x461   : > { %v3839_v7 = vmul.f32 0.0078125, %v1864_v13  ;;  %vm1952_vm2 = vcmp.eq.f32.partialorder %v3852_v21, inf  ;;  %vm1954_vm3 = vcmp.eq.f32.partialorder %v3852_v21, 0.0 }
 0x463   : > { %2757 = vrsqrt.f32 %v3839_v7  ;;  %vm1959_vm0 = vcmp.eq.f32.partialorder %v3839_v7, inf  ;;  %v1962_v33 = vand.u32 2147483648, %v3839_v7  ;;  %vm1961_vm1 = vcmp.eq.f32.partialorder %v3839_v7, 0.0 }
 0x464   : > { %2759 = vrsqrt.f32 %v3852_v21 }
 0x465   : > { %v2754_v58 = vpop.eup %2753 }
 0x466   : > { %v1866_v56 = vpop.xlane.xlu0 %1865  ;;  %v2756_v25 = vpop.eup %2755  ;;  %v1944_v11 = vmul.f32 %v2754_v58, %v3821_v16 }
 0x467   : > { %v1937_v49 = vmul.f32 %v2756_v25, %v3823_v63  ;;  %v3896_v15 = vmul.f32 0.0078125, %v1866_v56 }
 0x468   : > { %v1868_v43 = vpop.xlane.xlu1 %1867  ;;  %v1946_v13 = vsel %vm1945_vm12, %v3821_v16, %v1944_v11 }
 0x469   : > { %v3894_v50 = vmul.f32 0.0078125, %v1868_v43  ;;  %v1949_v47 = vsel %vm1947_vm13, %v1948_v8, %v1946_v13  ;;  %v1939_v53 = vsel %vm1938_vm14, %v3823_v63, %v1937_v49  ;;  %vm1966_vm6 = vcmp.eq.f32.partialorder %v3896_v15, inf }
 0x46a   : > { %v2013_v27 = vadd.f32 0.0001, %v1949_v47  ;;  %v1942_v6 = vsel %vm1940_vm15, %v1941_v20, %v1939_v53  ;;  %vm1968_vm7 = vcmp.eq.f32.partialorder %v3896_v15, 0.0 }
 0x46b   : > { %2761 = vrsqrt.f32 %v3894_v50  ;;  %v2012_v16 = vadd.f32 0.0001, %v1942_v6  ;;  %vm1973_vm4 = vcmp.eq.f32.partialorder %v3894_v50, inf  ;;  %v1976_v28 = vand.u32 2147483648, %v3894_v50 }
 0x46c   : > { %v2029_v42 = vmul.f32 %v2013_v27, %v3772_v4  ;;  %2763 = vrsqrt.f32 %v3896_v15  ;;  %vm1975_vm5 = vcmp.eq.f32.partialorder %v3894_v50, 0.0 }
 0x46d   : > { %v2758_v39 = vpop.eup %2757  ;;  %v2028_v63 = vmul.f32 %v2012_v16, %v3774_v62  ;;  %v1955_v62 = vand.u32 2147483648, %v3852_v21 }
 0x46e   : > { %v1870_v37 = vpop.xlane.xlu0 %1869  ;;  %v1958_v19 = vmul.f32 %v2758_v39, %v3839_v7  ;;  %v2760_v60 = vpop.eup %2759  ;;  %v2051_v9 = vmul.f32 %v3844_v35, %v2029_v42 }
 0x46f   : > { %v2050_v32 = vmul.f32 %v3844_v35, %v2028_v63  ;;  %v1951_v59 = vmul.f32 %v2760_v60, %v3852_v21 }
 0x470   : > { %v1872_v23 = vpop.xlane.xlu1 %1871  ;;  %v1960_v29 = vsel %vm1959_vm0, %v3839_v7, %v1958_v19  ;;  %2067 = vst [vmem:[%s2998_s13 + $0x38] sm:$0xff] %v2051_v9  ;;  %v3929_v7 = vmul.f32 0.0078125, %v1870_v37 }
 0x471   : > { %v3905_v61 = vmul.f32 0.0078125, %v1872_v23  ;;  %v1963_v4 = vsel %vm1961_vm1, %v1962_v33, %v1960_v29  ;;  %2066 = vst [vmem:[%s2998_s13 + $0x30] sm:$0xff] %v2050_v32  ;;  %v1953_v17 = vsel %vm1952_vm2, %v3852_v21, %v1951_v59 }
 0x472   : > { %v2015_v44 = vadd.f32 0.0001, %v1963_v4  ;;  %v1956_v14 = vsel %vm1954_vm3, %v1955_v62, %v1953_v17  ;;  %vm1980_vm10 = vcmp.eq.f32.partialorder %v3929_v7, inf  ;;  %vm1982_vm11 = vcmp.eq.f32.partialorder %v3929_v7, 0.0 }
 0x473   : > { %2765 = vrsqrt.f32 %v3905_v61  ;;  %v2014_v55 = vadd.f32 0.0001, %v1956_v14  ;;  %vm1987_vm8 = vcmp.eq.f32.partialorder %v3905_v61, inf  ;;  %vm1989_vm9 = vcmp.eq.f32.partialorder %v3905_v61, 0.0 }
 0x474   : > { %v2031_v18 = vmul.f32 %v2015_v44, %v3780_v24  ;;  %2767 = vrsqrt.f32 %v3929_v7  ;;  %v1990_v23 = vand.u32 2147483648, %v3905_v61  ;;  %v1983_v13 = vand.u32 2147483648, %v3929_v7 }
 0x475   : > { %v2762_v8 = vpop.eup %2761  ;;  %v2030_v24 = vmul.f32 %v2014_v55, %v3782_v31  ;;  %v1969_v31 = vand.u32 2147483648, %v3896_v15 }
 0x476   : > { %v1874_v40 = vpop.xlane.xlu0 %1873  ;;  %v2053_v0 = vmul.f32 %v3844_v35, %v2031_v18  ;;  %v1972_v2 = vmul.f32 %v2762_v8, %v3894_v50  ;;  %v2764_v21 = vpop.eup %2763 }
 0x477   : > { %v3937_v56 = vmul.f32 0.0078125, %v1874_v40  ;;  %v2052_v58 = vmul.f32 %v3844_v35, %v2030_v24  ;;  %v1965_v30 = vmul.f32 %v2764_v21, %v3896_v15 }
 0x478   : > { %v1876_v43 = vpop.xlane.xlu1 %1875  ;;  %2069 = vst [vmem:[%s2998_s13 + $0x48] sm:$0xff] %v2053_v0  ;;  %v1974_v26 = vsel %vm1973_vm4, %v3894_v50, %v1972_v2 }
 0x479   : > { %v3931_v54 = vmul.f32 0.0078125, %v1876_v43  ;;  %v1977_v25 = vsel %vm1975_vm5, %v1976_v28, %v1974_v26  ;;  %2068 = vst [vmem:[%s2998_s13 + $0x40] sm:$0xff] %v2052_v58  ;;  %v1967_v45 = vsel %vm1966_vm6, %v3896_v15, %v1965_v30  ;;  %vm1994_vm14 = vcmp.eq.f32.partialorder %v3937_v56, inf }
 0x47a   : > { %v2017_v36 = vadd.f32 0.0001, %v1977_v25  ;;  %v1970_v11 = vsel %vm1968_vm7, %v1969_v31, %v1967_v45  ;;  %vm1996_vm15 = vcmp.eq.f32.partialorder %v3937_v56, 0.0  ;;  %v1997_v16 = vand.u32 2147483648, %v3937_v56 }
 0x47b   : > { %2769 = vrsqrt.f32 %v3931_v54  ;;  %v2016_v51 = vadd.f32 0.0001, %v1970_v11  ;;  %vm2001_vm12 = vcmp.eq.f32.partialorder %v3931_v54, inf  ;;  %vm2003_vm13 = vcmp.eq.f32.partialorder %v3931_v54, 0.0 }
 0x47c   : > { %2771 = vrsqrt.f32 %v3937_v56  ;;  %v2033_v3 = vmul.f32 %v2017_v36, %v3788_v57 }
 0x47d   : > { %v2766_v34 = vpop.eup %2765  ;;  %v2032_v37 = vmul.f32 %v2016_v51, %v3790_v1 }
 0x47e   : > { %v1986_v52 = vmul.f32 %v2766_v34, %v3905_v61  ;;  %v2768_v20 = vpop.eup %2767  ;;  %v2055_v15 = vmul.f32 %v3844_v35, %v2033_v3 }
 0x47f   : > { %v1979_v41 = vmul.f32 %v2768_v20, %v3929_v7  ;;  %v2054_v39 = vmul.f32 %v3844_v35, %v2032_v37 }
 0x480   : > { %v1988_v49 = vsel %vm1987_vm8, %v3905_v61, %v1986_v52  ;;  %v2004_v61 = vand.u32 2147483648, %v3931_v54  ;;  %2071 = vst [vmem:[%s2998_s13 + $0x58] sm:$0xff] %v2055_v15 }
 0x481   : > { %v1991_v38 = vsel %vm1989_vm9, %v1990_v23, %v1988_v49  ;;  %v1981_v1 = vsel %vm1980_vm10, %v3929_v7, %v1979_v41  ;;  %2070 = vst [vmem:[%s2998_s13 + $0x50] sm:$0xff] %v2054_v39 }
 0x482   : > { %v2019_v57 = vadd.f32 0.0001, %v1991_v38  ;;  %v1984_v6 = vsel %vm1982_vm11, %v1983_v13, %v1981_v1 }
 0x483   : > { %v2018_v19 = vadd.f32 0.0001, %v1984_v6 }
 0x484   : > { %v2035_v22 = vmul.f32 %v2019_v57, %v3796_v10 }
 0x485   : > { %v2770_v50 = vpop.eup %2769  ;;  %v2034_v43 = vmul.f32 %v2018_v19, %v3798_v46 }
 0x486   : > { %v2772_v47 = vpop.eup %2771  ;;  %v2000_v53 = vmul.f32 %v2770_v50, %v3931_v54  ;;  %v2057_v10 = vmul.f32 %v3844_v35, %v2035_v22 }
 0x487   : > { %v1993_v27 = vmul.f32 %v2772_v47, %v3937_v56  ;;  %v2056_v4 = vmul.f32 %v3844_v35, %v2034_v43 }
 0x488   : > { %v2002_v12 = vsel %vm2001_vm12, %v3931_v54, %v2000_v53  ;;  %2073 = vst [vmem:[%s2998_s13 + $0x68] sm:$0xff] %v2057_v10 }
 0x489   : > { %v2005_v42 = vsel %vm2003_vm13, %v2004_v61, %v2002_v12  ;;  %v1995_v33 = vsel %vm1994_vm14, %v3937_v56, %v1993_v27  ;;  %2072 = vst [vmem:[%s2998_s13 + $0x60] sm:$0xff] %v2056_v4 }
 0x48a   : > { %v2021_v63 = vadd.f32 0.0001, %v2005_v42  ;;  %v1998_v29 = vsel %vm1996_vm15, %v1997_v16, %v1995_v33 }
 0x48b   : > { %v2020_v60 = vadd.f32 0.0001, %v1998_v29 }
 0x48c   : > { %v2037_v9 = vmul.f32 %v2021_v63, %v3804_v5 }
 0x48d   : > { %v2036_v40 = vmul.f32 %v2020_v60, %v3806_v48 }
 0x48e   : > { %v2059_v32 = vmul.f32 %v3844_v35, %v2037_v9 }
 0x48f   : > { %v2058_v44 = vmul.f32 %v3844_v35, %v2036_v40 }
 0x490   : > { %2075 = vst [vmem:[%s2998_s13 + $0x78] sm:$0xff] %v2059_v32 }
 0x491   : > { %2074 = vst [vmem:[%s2998_s13 + $0x70] sm:$0xff] %v2058_v44 }
 0x492 PF: > { %s2291_s14 = sshll.u32 %s2855_s25, 11  ;;  %s2090_s19 = sshll.u32 %s2998_s13, 4  ;;  %s4008_s19 = int_to_ptr.vmem [resolvable:$true] %s2090_s19 }
 0x493   : > { %s4005_s18 = scalar_lea.hbm %s4070_s6, %s2291_s14  ;;  %s4082_s20 = sand.u32 1, %s2843_s22  }
 0x494   : > { %s4012_s29 = scalar_lea.sflag [#allocation5], %s4082_s20  ;;  %s2773_s30 = scalar_lea.vmem %s4008_s19, 2048 }
 0x495   : > { %p2774_p2 = scmp.ne.s32.totalorder %s4008_s19, %s2773_s30  ;;  %s2870_s25 = smov [#allocation4]  }
 0x496   : > { %s2777_s11 = sshll.u32 %s2870_s25, 4  ;;  %s2778_s11 = int_to_ptr.vmem [resolvable:$false] %s2777_s11 }
 0x497   : > { %p2775_p4 = pnand %p2774_p2, %p2957_p3  ;;  %s2779_s12 = scalar_lea.vmem %s2778_s11, 4096 }
 0x498   : > { %p2780_p6 = scmp.lt.s32.totalorder %s4008_s19, %s2778_s11  ;;  %p2781_p7 = scmp.lt.s32.totalorder %s2779_s12, %s2773_s30 }
 0x499   : > { %p2776_p5 = pneg %p2775_p4 }
 0x49a   : > { %p2782_p8 = por %p2781_p7, %p2780_p6 }
 0x49c   : > { %p2783_p10 = pnand %p2782_p8, %p2776_p5 }
 0x49e   : > { %2786 = shalt.err (!%p2783_p10)
}
 0x49f   : > { %s2787_s13 = scalar_lea.hbm %s4005_s18, 2048  ;;  %s2791_s7 = scalar_lea.hbm %s4070_s6, 4096 }
 0x4a0   : > { %p2788_p11 = scmp.ne.s32.totalorder %s4005_s18, %s2787_s13  ;;  %p2792_p0 = scmp.lt.u32.totalorder %s4005_s18, %s4070_s6 }
 0x4a1   : > { %p2793_p1 = scmp.lt.u32.totalorder %s2791_s7, %s2787_s13  ;;  %p2795_p4 = scmp.lt.u32.totalorder %s2787_s13, %s4005_s18 }
 0x4a2   : > { %p2789_p12 = pnand %p2788_p11, %p2957_p3 }
 0x4a3   : > { %p2794_p2 = por %p2793_p1, %p2792_p0 }
 0x4a4   : > { %p2790_p13 = pneg %p2789_p12 }
 0x4a5   : > { %p2796_p5 = por %p2795_p4, %p2794_p2 }
 0x4a7   : > { %p2797_p6 = pnand %p2796_p5, %p2790_p13 }
 0x4a9   : > { %2800 = shalt.err (!%p2797_p6)
}
 0x4aa   : > { %s2871_s8 = smov 128   ;;  %s2872_s14 = smov 8  }
 0x4ab   : > { %2411 = dma.vmem_to_hbm [thread:$0]  (%p2957_p3), %s4008_s19, 2048, %s4005_s18, %s4012_s29, %s2871_s8, %s2871_s8, %s2872_s14  }
 0x4ac PF: > { %p2417_p7 = scmp.ge.s32.totalorder %s2867_s28, 2  ;;  %s2105_s16 = sand.u32 1, %s2839_s21  }
 0x4ad   : > { %s2106_s17 = scalar_lea.sflag [#allocation5], %s2105_s16 }
 0x4ae   : > { %p2414_p8 = pnand %p2417_p7, %p2967_p9 }
 0x4b0   : > { %2834 = dma.done.wait (!%p2414_p8), %s2106_s17, 2048  }
 0x4b1   : > { %2836 = vsyncadd (!%p2414_p8), %s2106_s17, 4294965248  ;;  %s19_s28 = sadd.s32 1, %s2867_s28   ;;  %s4083_s20 = sld [smem:[#allocation11_spill]] }
 0x4b2   : > { %p16_p10 = scmp.ge.s32.totalorder %s19_s28, 6   ;;  %s4084_s24 = sld [smem:[#allocation7_spill]] }
 0x4b3   : > { %s4085_s25 = sld [smem:[#allocation8_spill]]  ;;  %s4086_s26 = sld [smem:[#allocation9_spill]] }
 0x4b4   : > { %s4087_s27 = sld [smem:[#allocation10_spill]]  ;;  %s4088_s21 = smov %s2843_s22 }
 0x4b5   : > { %s4089_s22 = smov %s2847_s23  ;;  %18 = sbr.rel (!%p16_p10) target bundleno = 5 (0x5), region = 93 }
 0x4b7   : > { %s4090_s23 = smov %s4083_s20 }
 0x4bc   :  { %2111 = vsyncpa [#allocation5], 1 }
 0x4bd   :  { %2113 = vsyncpa [#allocation5 + $0x1], 1 }

// kernel: model_forward.2
= control target key start
LH: loop header
LB: loop body
LE: loop exit
PB: predicated region body
PF: predicated region fallthrough
CT: control target
= control target key end

     0   :  { %s2642_s18 = smov 0   ;;  %s2644_s19 = smov 0   ;;  %s3467_s0 = inlined_call_operand.vmem [shape: bf16[256,128], index: 0, kind: input, shape index: {}]   ;;  %s3468_s1 = inlined_call_operand.vmem [shape: f32[1,128], index: 1, kind: input, shape index: {}]   ;;  %s3469_s2 = inlined_call_operand.vmem [shape: f32[1,128], index: 2, kind: input, shape index: {}]   ;;  %s3470_s3 = inlined_call_operand.vmem [shape: bf16[2,128,512], index: 3, kind: input, shape index: {}]   ;;  %s3471_s4 = inlined_call_operand.vmem [shape: bf16[2,256,128], index: 4, kind: input, shape index: {}]   ;;  %s3472_s5 = inlined_call_operand.vmem [shape: bf16[256,128], index: 5, kind: output, shape index: {}]  }
   0x1   :  { %s2646_s20 = smov 0   ;;  %s2648_s21 = smov 0  }
   0x2   :  { %s2650_s22 = smov 0  }
   0x3 LB: > { %s24_s23 = sadd.s32 1, %s2601_s20  ;;  %s27_s24 = sadd.s32 1, %s2605_s21  ;;  %s2609_s22 = sphi %s2650_s22, %s15_s22   ;;  %s2605_s21 = sphi %s2648_s21, %s3476_s21   ;;  %s2601_s20 = sphi %s2646_s20, %s3475_s20   ;;  %s2597_s19 = sphi %s2644_s19, %s3474_s19   ;;  %s2593_s18 = sphi %s2642_s18, %s3473_s18  }
   0x4   : > { %p25_p0 = scmp.ge.s32.totalorder %s24_s23, 2  ;;  %p1979_p1 = scmp.ge.s32.totalorder %s2609_s22, 1 }
   0x5   : > { %p220_p2 = scmp.lt.s32.totalorder %s2609_s22, 5 }
   0x6   : > { %s3478_s23 = smov (%p25_p0, %s24_s23), 0  ;;  %s3480_s24 = smov (!%p25_p0, %s27_s24), %s2605_s21 }
   0x7   : > { %p221_p3 = pnand %p1979_p1, %p220_p2  ;;  %p29_p4 = scmp.ge.s32.totalorder %s3480_s24, 2 }
   0x8   : > { %s1980_s25 = sshll.u32 (!%p221_p3), %s2597_s19, 4  ;;  %p264_p5 = scmp.lt.s32.totalorder (!%p221_p3), %s2593_s18, 1 }
   0x9   : > { %s3482_s24 = smov (%p29_p4, %s3480_s24), 0  ;;  %224 = sbr.rel (%p221_p3) target bundleno = 997 (0x3e5), region = 40 }
   0xa   : > { %p259_p6 = scmp.lt.s32.totalorder (!%p221_p3), %s1980_s25, 31  ;;  %p1988_p7 = scmp.ne.s32.totalorder (!%p221_p3), %s2593_s18, 0 }
  0x10   : > { %s265_s26 = scalar_select %p264_p5, %s2593_s18, 1 }
  0x11   : > { %s3484_s25 = smov (!%p259_p6, %s1980_s25), 31  ;;  %284 = sbr.rel (%p1988_p7) target bundleno = 400 (0x190), region = 44 }
  0x12   : > { %s2090_s27 = sshll.u32 %s265_s26, 8  ;;  %s2091_s28 = sshll.u32 %s265_s26, 7 }
  0x13   : > { %s1981_s29 = sshll.u32 %s3484_s25, 2  ;;  %s2679_s7 = scalar_lea.vmem %s3470_s3, %s2090_s27 }
  0x14   : > { %s2684_s10 = scalar_lea.vmem %s3467_s0, %s1981_s29  ;;  %s2689_s13 = scalar_lea.vmem %s3471_s4, %s2091_s28 }
  0x15   : > { %s2694_s16 = scalar_lea.vmem %s3472_s5, %s1981_s29  ;;  %v2180_v0 = vld [vmem:[%s2684_s10 + $0x8] sm:$0xff] (!%p1988_p7)   ;;  %v2109_v1 = vld [vmem:[%s2684_s10] sm:$0xff] (!%p1988_p7)   ;;  %v2181_v6 = vld [vmem:[%s2684_s10 + $0x10] sm:$0xff] (!%p1988_p7)  }
  0x16   : > { %v2699_v2 = vunpack.c.l.bf16 (!%p1988_p7), %v2180_v0  ;;  %v2701_v3 = vunpack.c.l.bf16 (!%p1988_p7), %v2109_v1  ;;  %v2703_v4 = vunpack.c.h.bf16 (!%p1988_p7), %v2180_v0  ;;  %v2705_v5 = vunpack.c.h.bf16 (!%p1988_p7), %v2109_v1  ;;  %v2182_v13 = vld [vmem:[%s2684_s10 + $0x18] sm:$0xff] (!%p1988_p7)   ;;  %v2183_v18 = vld [vmem:[%s2684_s10 + $0x20] sm:$0xff] (!%p1988_p7)   ;;  %v2184_v23 = vld [vmem:[%s2684_s10 + $0x28] sm:$0xff] (!%p1988_p7)  }
  0x17   : > { %v2716_v11 = vunpack.c.h.bf16 (!%p1988_p7), %v2181_v6  ;;  %v2718_v12 = vunpack.c.l.bf16 (!%p1988_p7), %v2181_v6  ;;  %v2725_v16 = vunpack.c.h.bf16 (!%p1988_p7), %v2182_v13  ;;  %v2727_v17 = vunpack.c.l.bf16 (!%p1988_p7), %v2182_v13  ;;  %v2185_v28 = vld [vmem:[%s2684_s10 + $0x30] sm:$0xff] (!%p1988_p7)   ;;  %v2186_v33 = vld [vmem:[%s2684_s10 + $0x38] sm:$0xff] (!%p1988_p7)  }
  0x18   : > { %v320_v7 = vmul.f32 %v2699_v2, %v2699_v2  ;;  %v318_v8 = vmul.f32 %v2701_v3, %v2701_v3  ;;  %v321_v9 = vmul.f32 %v2703_v4, %v2703_v4  ;;  %v319_v10 = vmul.f32 %v2705_v5, %v2705_v5 }
  0x19   : > { %v323_v14 = vmul.f32 %v2716_v11, %v2716_v11  ;;  %v322_v15 = vmul.f32 %v2718_v12, %v2718_v12  ;;  %v325_v19 = vmul.f32 %v2725_v16, %v2725_v16  ;;  %v324_v20 = vmul.f32 %v2727_v17, %v2727_v17 }
  0x1a   : > { %338 = vadd.xlane.f32.xlu1 %v320_v7  ;;  %334 = vadd.xlane.f32.xlu0 %v318_v8  ;;  %v2734_v21 = vunpack.c.h.bf16 %v2183_v18  ;;  %v2736_v22 = vunpack.c.l.bf16 %v2183_v18  ;;  %v2743_v26 = vunpack.c.h.bf16 %v2184_v23  ;;  %v2745_v27 = vunpack.c.l.bf16 %v2184_v23 }
  0x1b   : > { %v2752_v31 = vunpack.c.h.bf16 %v2185_v28  ;;  %v2754_v32 = vunpack.c.l.bf16 %v2185_v28  ;;  %v2761_v36 = vunpack.c.h.bf16 %v2186_v33  ;;  %v2763_v37 = vunpack.c.l.bf16 %v2186_v33 }
  0x1c   : > { %v327_v24 = vmul.f32 %v2734_v21, %v2734_v21  ;;  %v326_v25 = vmul.f32 %v2736_v22, %v2736_v22  ;;  %v329_v29 = vmul.f32 %v2743_v26, %v2743_v26  ;;  %v328_v30 = vmul.f32 %v2745_v27, %v2745_v27 }
  0x1d   : > { %v331_v34 = vmul.f32 %v2752_v31, %v2752_v31  ;;  %v330_v35 = vmul.f32 %v2754_v32, %v2754_v32  ;;  %v333_v38 = vmul.f32 %v2761_v36, %v2761_v36  ;;  %v332_v39 = vmul.f32 %v2763_v37, %v2763_v37 }
  0x1e   : > { %340 = vadd.xlane.f32.xlu1 %v321_v9  ;;  %336 = vadd.xlane.f32.xlu0 %v319_v10 }
  0x22   : > { %344 = vadd.xlane.f32.xlu1 %v323_v14  ;;  %342 = vadd.xlane.f32.xlu0 %v322_v15 }
  0x26   : > { %348 = vadd.xlane.f32.xlu1 %v325_v19  ;;  %346 = vadd.xlane.f32.xlu0 %v324_v20 }
  0x2a   : > { %352 = vadd.xlane.f32.xlu1 %v327_v24  ;;  %350 = vadd.xlane.f32.xlu0 %v326_v25  ;;  %v2812_v24 = vld [vmem:[%s3468_s1] ss:$0 sm:$0xff] }
  0x2e   : > { %356 = vadd.xlane.f32.xlu1 %v329_v29  ;;  %354 = vadd.xlane.f32.xlu0 %v328_v30 }
  0x32   : > { %360 = vadd.xlane.f32.xlu1 %v331_v34  ;;  %358 = vadd.xlane.f32.xlu0 %v330_v35 }
  0x36   : > { %364 = vadd.xlane.f32.xlu1 %v333_v38  ;;  %362 = vadd.xlane.f32.xlu0 %v332_v39 }
  0xa7   : > { %v339_v40 = vpop.xlane.xlu1 %338  ;;  %v335_v41 = vpop.xlane.xlu0 %334 }
  0xa8   : > { %v369_v42 = vmul.f32 0.0078125, %v339_v40  ;;  %v367_v43 = vmul.f32 0.0078125, %v335_v41 }
  0xaa   : > { %2315 = vrsqrt.f32 %v369_v42  ;;  %vm385_vm0 = vcmp.eq.f32.partialorder %v367_v43, inf  ;;  %vm387_vm1 = vcmp.eq.f32.partialorder %v367_v43, 0.0  ;;  %v388_v54 = vand.u32 2147483648, %v367_v43 }
  0xab   : > { %2317 = vrsqrt.f32 %v367_v43  ;;  %v341_v44 = vpop.xlane.xlu1 %340  ;;  %v337_v45 = vpop.xlane.xlu0 %336  ;;  %vm399_vm2 = vcmp.eq.f32.partialorder %v369_v42, inf  ;;  %vm401_vm3 = vcmp.eq.f32.partialorder %v369_v42, 0.0  ;;  %v402_v58 = vand.u32 2147483648, %v369_v42 }
  0xac   : > { %v2769_v46 = vmul.f32 0.0078125, %v341_v44  ;;  %v2771_v47 = vmul.f32 0.0078125, %v337_v45 }
  0xae   : > { %2319 = vrsqrt.f32 %v2769_v46  ;;  %vm392_vm4 = vcmp.eq.f32.partialorder %v2771_v47, inf  ;;  %vm394_vm5 = vcmp.eq.f32.partialorder %v2771_v47, 0.0  ;;  %v395_v61 = vand.u32 2147483648, %v2771_v47 }
  0xaf   : > { %2321 = vrsqrt.f32 %v2771_v47  ;;  %v345_v48 = vpop.xlane.xlu1 %344  ;;  %v343_v49 = vpop.xlane.xlu0 %342  ;;  %vm406_vm6 = vcmp.eq.f32.partialorder %v2769_v46, inf  ;;  %vm408_vm7 = vcmp.eq.f32.partialorder %v2769_v46, 0.0  ;;  %v409_v63 = vand.u32 2147483648, %v2769_v46 }
  0xb0   : > { %v2775_v50 = vmul.f32 0.0078125, %v345_v48  ;;  %v2777_v51 = vmul.f32 0.0078125, %v343_v49 }
  0xb2   : > { %2323 = vrsqrt.f32 %v2775_v50  ;;  %v416_v7 = vand.u32 2147483648, %v2777_v51  ;;  %vm420_vm8 = vcmp.eq.f32.partialorder %v2775_v50, inf  ;;  %vm413_vm9 = vcmp.eq.f32.partialorder %v2777_v51, inf }
  0xb3   : > { %2325 = vrsqrt.f32 %v2777_v51  ;;  %v349_v52 = vpop.xlane.xlu1 %348  ;;  %v347_v53 = vpop.xlane.xlu0 %346  ;;  %vm422_vm10 = vcmp.eq.f32.partialorder %v2775_v50, 0.0  ;;  %vm415_vm11 = vcmp.eq.f32.partialorder %v2777_v51, 0.0  ;;  %v423_v23 = vand.u32 2147483648, %v2775_v50 }
  0xb4   : > { %v2316_v55 = vpop.eup %2315  ;;  %v2781_v56 = vmul.f32 0.0078125, %v349_v52  ;;  %v2783_v57 = vmul.f32 0.0078125, %v347_v53 }
  0xb5   : > { %v2318_v59 = vpop.eup %2317  ;;  %v398_v60 = vmul.f32 %v2316_v55, %v369_v42 }
  0xb6   : > { %2327 = vrsqrt.f32 %v2781_v56  ;;  %v384_v62 = vmul.f32 %v2318_v59, %v367_v43  ;;  %v430_v29 = vand.u32 2147483648, %v2783_v57  ;;  %v437_v38 = vand.u32 2147483648, %v2781_v56 }
  0xb7   : > { %2329 = vrsqrt.f32 %v2783_v57  ;;  %v353_v0 = vpop.xlane.xlu1 %352  ;;  %v351_v1 = vpop.xlane.xlu0 %350  ;;  %v400_v6 = vsel %vm399_vm2, %v369_v42, %v398_v60  ;;  %vm427_vm12 = vcmp.eq.f32.partialorder %v2783_v57, inf  ;;  %vm434_vm13 = vcmp.eq.f32.partialorder %v2781_v56, inf }
  0xb8   : > { %v2320_v8 = vpop.eup %2319  ;;  %v2796_v9 = vmul.f32 0.0078125, %v353_v0  ;;  %v2798_v10 = vmul.f32 0.0078125, %v351_v1  ;;  %v386_v13 = vsel %vm385_vm0, %v367_v43, %v384_v62  ;;  %v403_v14 = vsel %vm401_vm3, %v402_v58, %v400_v6 }
  0xb9   : > { %v2322_v15 = vpop.eup %2321  ;;  %v389_v18 = vsel %vm387_vm1, %v388_v54, %v386_v13  ;;  %v497_v19 = vadd.f32 0.0001, %v403_v14  ;;  %v405_v20 = vmul.f32 %v2320_v8, %v2769_v46  ;;  %vm429_vm14 = vcmp.eq.f32.partialorder %v2783_v57, 0.0 }
  0xba   : > { %2331 = vrsqrt.f32 %v2796_v9  ;;  %v495_v25 = vadd.f32 0.0001, %v389_v18  ;;  %v391_v28 = vmul.f32 %v2322_v15, %v2771_v47  ;;  %vm436_vm15 = vcmp.eq.f32.partialorder %v2781_v56, 0.0 }
  0xbb   : > { %2333 = vrsqrt.f32 %v2798_v10  ;;  %v357_v30 = vpop.xlane.xlu1 %356  ;;  %v355_v33 = vpop.xlane.xlu0 %354  ;;  %v513_v34 = vmul.f32 %v2699_v2, %v497_v19  ;;  %v407_v35 = vsel %vm406_vm6, %v2769_v46, %v405_v20  ;;  %vm441_vm0 = vcmp.eq.f32.partialorder %v2798_v10, inf }
  0xbc   : > { %v2324_v39 = vpop.eup %2323  ;;  %v2822_v40 = vmul.f32 0.0078125, %v357_v30  ;;  %v2824_v41 = vmul.f32 0.0078125, %v355_v33  ;;  %v511_v42 = vmul.f32 %v2701_v3, %v495_v25  ;;  %v393_v43 = vsel %vm392_vm4, %v2771_v47, %v391_v28 }
  0xbd   : > { %v2326_v2 = vpop.eup %2325  ;;  %v2833_v44 = vmul.f32 %v2812_v24, %v513_v34  ;;  %v396_v45 = vsel %vm394_vm5, %v395_v61, %v393_v43  ;;  %v410_v48 = vsel %vm408_vm7, %v409_v63, %v407_v35  ;;  %v419_v3 = vmul.f32 %v2324_v39, %v2775_v50 }
  0xbe   : > { %2335 = vrsqrt.f32 %v2822_v40  ;;  %v2844_v49 = vmul.f32 %v2812_v24, %v511_v42  ;;  %v496_v52 = vadd.f32 0.0001, %v396_v45  ;;  %v498_v53 = vadd.f32 0.0001, %v410_v48 }
  0xbf   : > { %2337 = vrsqrt.f32 %v2824_v41  ;;  %v361_v47 = vpop.xlane.xlu1 %360  ;;  %v359_v54 = vpop.xlane.xlu0 %358  ;;  %v552_v46 = vmul.f32 %v2833_v44, %v2833_v44  ;;  %782 = vst [vmem:[#allocation2 + $0x10] sm:$0xff] %v2833_v44  ;;  %v412_v55 = vmul.f32 %v2326_v2, %v2777_v51  ;;  %v421_v58 = vsel %vm420_vm8, %v2775_v50, %v419_v3 }
  0xc0   : > { %v2328_v59 = vpop.eup %2327  ;;  %v2854_v60 = vmul.f32 0.0078125, %v361_v47  ;;  %v2856_v61 = vmul.f32 0.0078125, %v359_v54  ;;  %v550_v62 = vmul.f32 %v2844_v49, %v2844_v49  ;;  %780 = vst [vmem:[#allocation2] sm:$0xff] %v2844_v49  ;;  %v512_v63 = vmul.f32 %v2705_v5, %v496_v52 }
  0xc1   : > { %v2330_v0 = vpop.eup %2329  ;;  %v514_v1 = vmul.f32 %v2703_v4, %v498_v53  ;;  %v414_v6 = vsel %vm413_vm9, %v2777_v51, %v412_v55  ;;  %v424_v8 = vsel %vm422_vm10, %v423_v23, %v421_v58  ;;  %v433_v13 = vmul.f32 %v2328_v59, %v2781_v56 }
  0xc2   : > { %2339 = vrsqrt.f32 %v2854_v60  ;;  %566 = vadd.xlane.f32.xlu0 %v550_v62  ;;  %v2872_v14 = vmul.f32 %v2812_v24, %v512_v63  ;;  %v417_v4 = vsel %vm415_vm11, %v416_v7, %v414_v6  ;;  %v500_v5 = vadd.f32 0.0001, %v424_v8 }
  0xc3   : > { %2341 = vrsqrt.f32 %v2856_v61  ;;  %v365_v50 = vpop.xlane.xlu1 %364  ;;  %v363_v15 = vpop.xlane.xlu0 %362  ;;  %v2880_v18 = vmul.f32 %v2812_v24, %v514_v1  ;;  %v499_v19 = vadd.f32 0.0001, %v417_v4  ;;  %v426_v20 = vmul.f32 %v2330_v0, %v2783_v57 }
  0xc4   : > { %v2332_v23 = vpop.eup %2331  ;;  %v2883_v25 = vmul.f32 0.0078125, %v365_v50  ;;  %v2885_v28 = vmul.f32 0.0078125, %v363_v15  ;;  %v551_v51 = vmul.f32 %v2872_v14, %v2872_v14  ;;  %781 = vst [vmem:[#allocation2 + $0x8] sm:$0xff] %v2872_v14  ;;  %v516_v7 = vmul.f32 %v2716_v11, %v500_v5 }
  0xc5   : > { %v2334_v30 = vpop.eup %2333  ;;  %v553_v33 = vmul.f32 %v2880_v18, %v2880_v18  ;;  %783 = vst [vmem:[#allocation2 + $0x18] sm:$0xff] %v2880_v18  ;;  %v515_v34 = vmul.f32 %v2718_v12, %v499_v19  ;;  %v428_v35 = vsel %vm427_vm12, %v2783_v57, %v426_v20  ;;  %v435_v39 = vsel %vm434_vm13, %v2781_v56, %v433_v13 }
  0xc6   : > { %2343 = vrsqrt.f32 %v2883_v25  ;;  %570 = vadd.xlane.f32.xlu0 %v552_v46  ;;  %568 = vadd.xlane.f32.xlu1 %v551_v51  ;;  %v2903_v11 = vmul.f32 %v2812_v24, %v516_v7  ;;  %v431_v12 = vsel %vm429_vm14, %v430_v29, %v428_v35  ;;  %v438_v42 = vsel %vm436_vm15, %v437_v38, %v435_v39 }
  0xc7   : > { %2345 = vrsqrt.f32 %v2885_v28  ;;  %v2915_v43 = vmul.f32 %v2812_v24, %v515_v34  ;;  %v501_v2 = vadd.f32 0.0001, %v431_v12  ;;  %v502_v45 = vadd.f32 0.0001, %v438_v42 }
  0xc8   : > { %v2336_v48 = vpop.eup %2335  ;;  %v555_v3 = vmul.f32 %v2903_v11, %v2903_v11  ;;  %785 = vst [vmem:[#allocation2 + $0x28] sm:$0xff] %v2903_v11  ;;  %v440_v57 = vmul.f32 %v2334_v30, %v2798_v10  ;;  %vm443_vm1 = vcmp.eq.f32.partialorder %v2798_v10, 0.0  ;;  %v444_v56 = vand.u32 2147483648, %v2798_v10 }
  0xc9   : > { %v2338_v29 = vpop.eup %2337  ;;  %v554_v38 = vmul.f32 %v2915_v43, %v2915_v43  ;;  %784 = vst [vmem:[#allocation2 + $0x20] sm:$0xff] %v2915_v43  ;;  %v517_v52 = vmul.f32 %v2727_v17, %v501_v2  ;;  %v518_v53 = vmul.f32 %v2725_v16, %v502_v45  ;;  %v447_v47 = vmul.f32 %v2332_v23, %v2796_v9 }
  0xca   : > { %572 = vadd.xlane.f32.xlu1 %v553_v33  ;;  %v442_v54 = vsel %vm441_vm0, %v2798_v10, %v440_v57  ;;  %vm448_vm2 = vcmp.eq.f32.partialorder %v2796_v9, inf  ;;  %vm450_vm3 = vcmp.eq.f32.partialorder %v2796_v9, 0.0  ;;  %v451_v46 = vand.u32 2147483648, %v2796_v9 }
  0xcb   : > { %574 = vadd.xlane.f32.xlu0 %v554_v38  ;;  %v2936_v55 = vmul.f32 %v2812_v24, %v517_v52  ;;  %v2939_v17 = vmul.f32 %v2812_v24, %v518_v53  ;;  %v445_v16 = vsel %vm443_vm1, %v444_v56, %v442_v54  ;;  %v449_v58 = vsel %vm448_vm2, %v2796_v9, %v447_v47 }
  0xcc   : > { %v2340_v59 = vpop.eup %2339  ;;  %v503_v62 = vadd.f32 0.0001, %v445_v16  ;;  %v452_v63 = vsel %vm450_vm3, %v451_v46, %v449_v58  ;;  %v454_v0 = vmul.f32 %v2338_v29, %v2824_v41  ;;  %vm455_vm4 = vcmp.eq.f32.partialorder %v2824_v41, inf }
  0xcd   : > { %v2342_v1 = vpop.eup %2341  ;;  %v556_v6 = vmul.f32 %v2936_v55, %v2936_v55  ;;  %786 = vst [vmem:[#allocation2 + $0x30] sm:$0xff] %v2936_v55  ;;  %v557_v8 = vmul.f32 %v2939_v17, %v2939_v17  ;;  %787 = vst [vmem:[#allocation2 + $0x38] sm:$0xff] %v2939_v17  ;;  %v504_v10 = vadd.f32 0.0001, %v452_v63  ;;  %vm457_vm5 = vcmp.eq.f32.partialorder %v2824_v41, 0.0 }
  0xce   : > { %576 = vadd.xlane.f32.xlu1 %v555_v3  ;;  %v519_v9 = vmul.f32 %v2736_v22, %v503_v62  ;;  %v456_v13 = vsel %vm455_vm4, %v2824_v41, %v454_v0  ;;  %v458_v4 = vand.u32 2147483648, %v2824_v41  ;;  %v461_v5 = vmul.f32 %v2336_v48, %v2822_v40 }
  0xcf   : > { %578 = vadd.xlane.f32.xlu0 %v556_v6  ;;  %v520_v50 = vmul.f32 %v2734_v21, %v504_v10  ;;  %vm462_vm6 = vcmp.eq.f32.partialorder %v2822_v40, inf  ;;  %vm464_vm7 = vcmp.eq.f32.partialorder %v2822_v40, 0.0  ;;  %v465_v15 = vand.u32 2147483648, %v2822_v40 }
  0xd0   : > { %v2344_v19 = vpop.eup %2343  ;;  %v2962_v20 = vmul.f32 %v2812_v24, %v519_v9  ;;  %v459_v22 = vsel %vm457_vm5, %v458_v4, %v456_v13  ;;  %v463_v23 = vsel %vm462_vm6, %v2822_v40, %v461_v5  ;;  %v468_v41 = vmul.f32 %v2342_v1, %v2856_v61 }
  0xd1   : > { %v2346_v51 = vpop.eup %2345  ;;  %v2967_v7 = vmul.f32 %v2812_v24, %v520_v50  ;;  %v505_v21 = vadd.f32 0.0001, %v459_v22  ;;  %v466_v30 = vsel %vm464_vm7, %v465_v15, %v463_v23  ;;  %vm469_vm8 = vcmp.eq.f32.partialorder %v2856_v61, inf }
  0xd2   : > { %580 = vadd.xlane.f32.xlu1 %v557_v8  ;;  %v558_v33 = vmul.f32 %v2962_v20, %v2962_v20  ;;  %788 = vst [vmem:[#allocation2 + $0x40] sm:$0xff] %v2962_v20  ;;  %v506_v34 = vadd.f32 0.0001, %v466_v30  ;;  %v470_v35 = vsel %vm469_vm8, %v2856_v61, %v468_v41  ;;  %vm471_vm9 = vcmp.eq.f32.partialorder %v2856_v61, 0.0 }
  0xd3   : > { %v559_v40 = vmul.f32 %v2967_v7, %v2967_v7  ;;  %789 = vst [vmem:[#allocation2 + $0x48] sm:$0xff] %v2967_v7  ;;  %v521_v39 = vmul.f32 %v2745_v27, %v505_v21  ;;  %v472_v12 = vand.u32 2147483648, %v2856_v61  ;;  %v475_v42 = vmul.f32 %v2340_v59, %v2854_v60 }
  0xd4   : > { %582 = vadd.xlane.f32.xlu0 %v558_v33  ;;  %v522_v2 = vmul.f32 %v2743_v26, %v506_v34  ;;  %vm476_vm10 = vcmp.eq.f32.partialorder %v2854_v60, inf  ;;  %vm478_vm11 = vcmp.eq.f32.partialorder %v2854_v60, 0.0  ;;  %v479_v45 = vand.u32 2147483648, %v2854_v60 }
  0xd5   : > { %v2986_v48 = vmul.f32 %v2812_v24, %v521_v39  ;;  %v473_v3 = vsel %vm471_vm9, %v472_v12, %v470_v35  ;;  %v477_v57 = vsel %vm476_vm10, %v2854_v60, %v475_v42  ;;  %v482_v27 = vmul.f32 %v2346_v51, %v2885_v28 }
  0xd6   : > { %584 = vadd.xlane.f32.xlu1 %v559_v40  ;;  %v2991_v61 = vmul.f32 %v2812_v24, %v522_v2  ;;  %v507_v56 = vadd.f32 0.0001, %v473_v3  ;;  %v480_v26 = vsel %vm478_vm11, %v479_v45, %v477_v57  ;;  %vm483_vm12 = vcmp.eq.f32.partialorder %v2885_v28, inf }
  0xd7   : > { %v560_v29 = vmul.f32 %v2986_v48, %v2986_v48  ;;  %790 = vst [vmem:[#allocation2 + $0x50] sm:$0xff] %v2986_v48  ;;  %v508_v38 = vadd.f32 0.0001, %v480_v26  ;;  %v484_v52 = vsel %vm483_vm12, %v2885_v28, %v482_v27  ;;  %v486_v47 = vand.u32 2147483648, %v2885_v28 }
  0xd8   : > { %v561_v60 = vmul.f32 %v2991_v61, %v2991_v61  ;;  %791 = vst [vmem:[#allocation2 + $0x58] sm:$0xff] %v2991_v61  ;;  %v523_v53 = vmul.f32 %v2754_v32, %v507_v56  ;;  %v489_v54 = vmul.f32 %v2344_v19, %v2883_v25  ;;  %vm485_vm13 = vcmp.eq.f32.partialorder %v2885_v28, 0.0 }
  0xd9   : > { %586 = vadd.xlane.f32.xlu0 %v560_v29  ;;  %v524_v46 = vmul.f32 %v2752_v31, %v508_v38  ;;  %vm490_vm14 = vcmp.eq.f32.partialorder %v2883_v25, inf  ;;  %v493_v16 = vand.u32 2147483648, %v2883_v25  ;;  %v487_v59 = vsel %vm485_vm13, %v486_v47, %v484_v52 }
  0xda   : > { %588 = vadd.xlane.f32.xlu1 %v561_v60  ;;  %v3009_v58 = vmul.f32 %v2812_v24, %v523_v53  ;;  %v491_v32 = vsel %vm490_vm14, %v2883_v25, %v489_v54  ;;  %vm492_vm15 = vcmp.eq.f32.partialorder %v2883_v25, 0.0  ;;  %v509_v63 = vadd.f32 0.0001, %v487_v59 }
  0xdb   : > { %v3014_v62 = vmul.f32 %v2812_v24, %v524_v46  ;;  %v494_v31 = vsel %vm492_vm15, %v493_v16, %v491_v32  ;;  %v3066_v16 = vld [vmem:[%s3469_s2] ss:$0 sm:$0xff] }
  0xdc   : > { %v562_v28 = vmul.f32 %v3009_v58, %v3009_v58  ;;  %792 = vst [vmem:[#allocation2 + $0x60] sm:$0xff] %v3009_v58  ;;  %v510_v0 = vadd.f32 0.0001, %v494_v31  ;;  %v525_v6 = vmul.f32 %v2763_v37, %v509_v63 }
  0xdd   : > { %v563_v1 = vmul.f32 %v3014_v62, %v3014_v62  ;;  %793 = vst [vmem:[#allocation2 + $0x68] sm:$0xff] %v3014_v62 }
  0xde   : > { %590 = vadd.xlane.f32.xlu0 %v562_v28  ;;  %v526_v25 = vmul.f32 %v2761_v36, %v510_v0  ;;  %v3025_v8 = vmul.f32 %v2812_v24, %v525_v6 }
  0xdf   : > { %592 = vadd.xlane.f32.xlu1 %v563_v1 }
  0xe0   : > { %v3028_v10 = vmul.f32 %v2812_v24, %v526_v25  ;;  %v564_v9 = vmul.f32 %v3025_v8, %v3025_v8  ;;  %794 = vst [vmem:[#allocation2 + $0x70] sm:$0xff] %v3025_v8 }
  0xe2   : > { %v565_v13 = vmul.f32 %v3028_v10, %v3028_v10  ;;  %795 = vst [vmem:[#allocation2 + $0x78] sm:$0xff] %v3028_v10  ;;  %594 = vadd.xlane.f32.xlu0 %v564_v9 }
  0xe4   : > { %596 = vadd.xlane.f32.xlu1 %v565_v13 }
 0x14f   : > { %v567_v36 = vpop.xlane.xlu0 %566 }
 0x150   : > { %v598_v37 = vmul.f32 0.0078125, %v567_v36 }
 0x152   : > { %2347 = vrsqrt.f32 %v598_v37  ;;  %vm616_vm0 = vcmp.eq.f32.partialorder %v598_v37, inf  ;;  %vm618_vm1 = vcmp.eq.f32.partialorder %v598_v37, 0.0  ;;  %v619_v34 = vand.u32 2147483648, %v598_v37 }
 0x153   : > { %v569_v4 = vpop.xlane.xlu1 %568  ;;  %v571_v5 = vpop.xlane.xlu0 %570 }
 0x154   : > { %v599_v50 = vmul.f32 0.0078125, %v569_v4  ;;  %v600_v24 = vmul.f32 0.0078125, %v571_v5 }
 0x156   : > { %2349 = vrsqrt.f32 %v599_v50  ;;  %vm623_vm2 = vcmp.eq.f32.partialorder %v599_v50, inf  ;;  %vm625_vm3 = vcmp.eq.f32.partialorder %v599_v50, 0.0  ;;  %v626_v40 = vand.u32 2147483648, %v599_v50 }
 0x157   : > { %2351 = vrsqrt.f32 %v600_v24  ;;  %v573_v15 = vpop.xlane.xlu1 %572  ;;  %vm630_vm4 = vcmp.eq.f32.partialorder %v600_v24, inf  ;;  %vm632_vm5 = vcmp.eq.f32.partialorder %v600_v24, 0.0  ;;  %v633_v12 = vand.u32 2147483648, %v600_v24 }
 0x158   : > { %v3036_v19 = vmul.f32 0.0078125, %v573_v15  ;;  %v575_v22 = vpop.xlane.xlu0 %574 }
 0x159   : > { %v3038_v23 = vmul.f32 0.0078125, %v575_v22 }
 0x15a   : > { %2353 = vrsqrt.f32 %v3036_v19  ;;  %vm637_vm6 = vcmp.eq.f32.partialorder %v3036_v19, inf  ;;  %vm639_vm7 = vcmp.eq.f32.partialorder %v3036_v19, 0.0  ;;  %v640_v26 = vand.u32 2147483648, %v3036_v19 }
 0x15b   : > { %2355 = vrsqrt.f32 %v3038_v23  ;;  %v577_v41 = vpop.xlane.xlu1 %576  ;;  %vm644_vm8 = vcmp.eq.f32.partialorder %v3038_v23, inf  ;;  %vm646_vm9 = vcmp.eq.f32.partialorder %v3038_v23, 0.0  ;;  %v647_v52 = vand.u32 2147483648, %v3038_v23 }
 0x15c   : > { %v2348_v51 = vpop.eup %2347  ;;  %v3042_v21 = vmul.f32 0.0078125, %v577_v41  ;;  %v579_v30 = vpop.xlane.xlu0 %578 }
 0x15d   : > { %v615_v33 = vmul.f32 %v2348_v51, %v598_v37  ;;  %v3044_v35 = vmul.f32 0.0078125, %v579_v30 }
 0x15e   : > { %2357 = vrsqrt.f32 %v3042_v21  ;;  %vm651_vm10 = vcmp.eq.f32.partialorder %v3042_v21, inf  ;;  %vm653_vm11 = vcmp.eq.f32.partialorder %v3042_v21, 0.0  ;;  %v654_v1 = vand.u32 2147483648, %v3042_v21 }
 0x15f   : > { %v617_v39 = vsel %vm616_vm0, %v598_v37, %v615_v33  ;;  %2359 = vrsqrt.f32 %v3044_v35  ;;  %v581_v42 = vpop.xlane.xlu1 %580  ;;  %vm658_vm12 = vcmp.eq.f32.partialorder %v3044_v35, inf  ;;  %vm660_vm13 = vcmp.eq.f32.partialorder %v3044_v35, 0.0 }
 0x160   : > { %v2350_v2 = vpop.eup %2349  ;;  %v620_v45 = vsel %vm618_vm1, %v619_v34, %v617_v39  ;;  %v3051_v3 = vmul.f32 0.0078125, %v581_v42 }
 0x161   : > { %v2352_v57 = vpop.eup %2351  ;;  %v726_v27 = vadd.f32 0.0001, %v620_v45  ;;  %v622_v56 = vmul.f32 %v2350_v2, %v599_v50  ;;  %v583_v29 = vpop.xlane.xlu0 %582 }
 0x162   : > { %v629_v38 = vmul.f32 %v2352_v57, %v600_v24  ;;  %2361 = vrsqrt.f32 %v3051_v3  ;;  %v3061_v47 = vmul.f32 0.0078125, %v583_v29  ;;  %vm665_vm14 = vcmp.eq.f32.partialorder %v3051_v3, inf }
 0x163   : > { %v742_v60 = vmul.f32 %v726_v27, %v2844_v49  ;;  %v624_v53 = vsel %vm623_vm2, %v599_v50, %v622_v56  ;;  %v585_v54 = vpop.xlane.xlu1 %584  ;;  %vm667_vm15 = vcmp.eq.f32.partialorder %v3051_v3, 0.0 }
 0x164   : > { %v2354_v46 = vpop.eup %2353  ;;  %v627_v59 = vsel %vm625_vm3, %v626_v40, %v624_v53  ;;  %v631_v32 = vsel %vm630_vm4, %v600_v24, %v629_v38  ;;  %v3071_v49 = vmul.f32 0.0078125, %v585_v54  ;;  %2363 = vrsqrt.f32 %v3061_v47 }
 0x165   : > { %v2356_v63 = vpop.eup %2355  ;;  %v727_v31 = vadd.f32 0.0001, %v627_v59  ;;  %v634_v28 = vsel %vm632_vm5, %v633_v12, %v631_v32  ;;  %v636_v0 = vmul.f32 %v2354_v46, %v3036_v19  ;;  %v764_v9 = vmul.f32 %v3066_v16, %v742_v60 }
 0x166   : > { %v728_v6 = vadd.f32 0.0001, %v634_v28  ;;  %v643_v25 = vmul.f32 %v2356_v63, %v3038_v23  ;;  %v587_v37 = vpop.xlane.xlu0 %586  ;;  %2365 = vrsqrt.f32 %v3071_v49  ;;  %vm672_vm0 = vcmp.eq.f32.partialorder %v3061_v47, inf }
 0x167   : > { %v743_v13 = vmul.f32 %v727_v31, %v2872_v14  ;;  %v638_v36 = vsel %vm637_vm6, %v3036_v19, %v636_v0  ;;  %v661_v19 = vand.u32 2147483648, %v3044_v35  ;;  %v3116_v38 = vmul.f32 0.0078125, %v587_v37 }
 0x168   : > { %v2358_v4 = vpop.eup %2357  ;;  %v744_v5 = vmul.f32 %v728_v6, %v2833_v44  ;;  %v641_v50 = vsel %vm639_vm7, %v640_v26, %v638_v36  ;;  %v645_v24 = vsel %vm644_vm8, %v3038_v23, %v643_v25  ;;  %v589_v23 = vpop.xlane.xlu1 %588  ;;  %vm674_vm1 = vcmp.eq.f32.partialorder %v3061_v47, 0.0 }
 0x169   : > { %v2360_v14 = vpop.eup %2359  ;;  %v765_v15 = vmul.f32 %v3066_v16, %v743_v13  ;;  %v729_v22 = vadd.f32 0.0001, %v641_v50  ;;  %v648_v41 = vsel %vm646_vm9, %v647_v52, %v645_v24  ;;  %v650_v51 = vmul.f32 %v2358_v4, %v3042_v21 }
 0x16a   : > { %v730_v30 = vadd.f32 0.0001, %v648_v41  ;;  %v657_v44 = vmul.f32 %v2360_v14, %v3044_v35  ;;  %v766_v12 = vmul.f32 %v3066_v16, %v744_v5  ;;  %2367 = vrsqrt.f32 %v3116_v38 }
 0x16b   : > { %v796_v33 = vpack.c.bf16 %v765_v15, %v764_v9  ;;  %v745_v34 = vmul.f32 %v729_v22, %v2880_v18  ;;  %v652_v40 = vsel %vm651_vm10, %v3042_v21, %v650_v51  ;;  %v591_v26 = vpop.xlane.xlu0 %590  ;;  %v3118_v21 = vmul.f32 0.0078125, %v589_v23 }
 0x16c   : > { %v2362_v39 = vpop.eup %2361  ;;  %v746_v42 = vmul.f32 %v730_v30, %v2915_v43  ;;  %v655_v2 = vsel %vm653_vm11, %v654_v1, %v652_v40  ;;  %v659_v45 = vsel %vm658_vm12, %v3044_v35, %v657_v44  ;;  %v668_v43 = vand.u32 2147483648, %v3051_v3  ;;  %v593_v28 = vpop.xlane.xlu1 %592 }
 0x16d   : > { %804 = vst [vmem:[#allocation3] sm:$0xff] %v796_v33  ;;  %v767_v18 = vmul.f32 %v3066_v16, %v745_v34  ;;  %v731_v57 = vadd.f32 0.0001, %v655_v2  ;;  %v662_v27 = vsel %vm660_vm13, %v661_v19, %v659_v45  ;;  %v664_v56 = vmul.f32 %v2362_v39, %v3051_v3 }
 0x16e   : > { %v732_v29 = vadd.f32 0.0001, %v662_v27  ;;  %v2364_v35 = vpop.eup %2363  ;;  %v768_v54 = vmul.f32 %v3066_v16, %v746_v42  ;;  %v3129_v59 = vmul.f32 0.0078125, %v591_v26  ;;  %v675_v1 = vand.u32 2147483648, %v3061_v47 }
 0x16f   : > { %v797_v52 = vpack.c.bf16 %v767_v18, %v766_v12  ;;  %v747_v60 = vmul.f32 %v731_v57, %v2903_v11  ;;  %v666_v53 = vsel %vm665_vm14, %v3051_v3, %v664_v56  ;;  %v671_v31 = vmul.f32 %v2364_v35, %v3061_v47  ;;  %v595_v36 = vpop.xlane.xlu0 %594 }
 0x170   : > { %v669_v46 = vsel %vm667_vm15, %v668_v43, %v666_v53  ;;  %v748_v11 = vmul.f32 %v732_v29, %v2936_v55  ;;  %v2366_v0 = vpop.eup %2365  ;;  %vm679_vm2 = vcmp.eq.f32.partialorder %v3071_v49, inf  ;;  %2369 = vrsqrt.f32 %v3118_v21 }
 0x171   : > { %805 = vst [vmem:[#allocation3 + $0x8] sm:$0xff] %v797_v52  ;;  %v769_v32 = vmul.f32 %v3066_v16, %v747_v60  ;;  %v733_v63 = vadd.f32 0.0001, %v669_v46  ;;  %v673_v55 = vsel %vm672_vm0, %v3061_v47, %v671_v31  ;;  %v678_v25 = vmul.f32 %v2366_v0, %v3071_v49  ;;  %v597_v41 = vpop.xlane.xlu1 %596 }
 0x172   : > { %v676_v9 = vsel %vm674_vm1, %v675_v1, %v673_v55  ;;  %vm681_vm3 = vcmp.eq.f32.partialorder %v3071_v49, 0.0  ;;  %v682_v13 = vand.u32 2147483648, %v3071_v49  ;;  %2371 = vrsqrt.f32 %v3129_v59 }
 0x173   : > { %v798_v3 = vpack.c.bf16 %v769_v32, %v768_v54  ;;  %v749_v6 = vmul.f32 %v733_v63, %v2939_v17  ;;  %v770_v37 = vmul.f32 %v3066_v16, %v748_v11  ;;  %v734_v17 = vadd.f32 0.0001, %v676_v9 }
 0x174   : > { %v680_v5 = vsel %vm679_vm2, %v3071_v49, %v678_v25  ;;  %v611_v47 = vmul.f32 0.0078125, %v593_v28  ;;  %v612_v22 = vmul.f32 0.0078125, %v595_v36  ;;  %v2368_v30 = vpop.eup %2367  ;;  %v3151_v44 = vmul.f32 0.0078125, %v597_v41 }
 0x175   : > { %806 = vst [vmem:[#allocation3 + $0x10] sm:$0xff] %v798_v3  ;;  %v771_v4 = vmul.f32 %v3066_v16, %v749_v6  ;;  %v683_v50 = vsel %vm681_vm3, %v682_v13, %v680_v5  ;;  %v750_v14 = vmul.f32 %v734_v17, %v2962_v20  ;;  %v685_v33 = vmul.f32 %v2368_v30, %v3116_v38 }
 0x176   : > { %v735_v15 = vadd.f32 0.0001, %v683_v50  ;;  %2373 = vrsqrt.f32 %v611_v47  ;;  %vm686_vm4 = vcmp.eq.f32.partialorder %v3116_v38, inf  ;;  %v689_v20 = vand.u32 2147483648, %v3116_v38 }
 0x177   : > { %v799_v24 = vpack.c.bf16 %v771_v4, %v770_v37  ;;  %2375 = vrsqrt.f32 %v612_v22  ;;  %v772_v19 = vmul.f32 %v3066_v16, %v750_v14  ;;  %vm688_vm5 = vcmp.eq.f32.partialorder %v3116_v38, 0.0 }
 0x178   : > { %v751_v51 = vmul.f32 %v735_v15, %v2967_v7  ;;  %2377 = vrsqrt.f32 %v3151_v44  ;;  %v687_v7 = vsel %vm686_vm4, %v3116_v38, %v685_v33  ;;  %vm693_vm6 = vcmp.eq.f32.partialorder %v3118_v21, inf }
 0x179   : > { %807 = vst [vmem:[#allocation3 + $0x18] sm:$0xff] %v799_v24  ;;  %v690_v12 = vsel %vm688_vm5, %v689_v20, %v687_v7  ;;  %v696_v42 = vand.u32 2147483648, %v3118_v21  ;;  %vm695_vm7 = vcmp.eq.f32.partialorder %v3118_v21, 0.0  ;;  %vm700_vm8 = vcmp.eq.f32.partialorder %v3129_v59, inf }
 0x17a   : > { %v773_v49 = vmul.f32 %v3066_v16, %v751_v51  ;;  %v2370_v34 = vpop.eup %2369  ;;  %v736_v2 = vadd.f32 0.0001, %v690_v12  ;;  %v703_v27 = vand.u32 2147483648, %v3129_v59  ;;  %vm702_vm9 = vcmp.eq.f32.partialorder %v3129_v59, 0.0 }
 0x17b   : > { %v692_v23 = vmul.f32 %v2370_v34, %v3118_v21  ;;  %vm707_vm10 = vcmp.eq.f32.partialorder %v611_v47, inf  ;;  %vm709_vm11 = vcmp.eq.f32.partialorder %v611_v47, 0.0  ;;  %v710_v35 = vand.u32 2147483648, %v611_v47 }
 0x17c   : > { %v800_v40 = vpack.c.bf16 %v773_v49, %v772_v19  ;;  %v2372_v39 = vpop.eup %2371  ;;  %v752_v56 = vmul.f32 %v736_v2, %v2986_v48  ;;  %vm714_vm12 = vcmp.eq.f32.partialorder %v612_v22, inf  ;;  %v717_v11 = vand.u32 2147483648, %v612_v22 }
 0x17d   : > { %v694_v45 = vsel %vm693_vm6, %v3118_v21, %v692_v23  ;;  %v699_v18 = vmul.f32 %v2372_v39, %v3129_v59  ;;  %vm716_vm13 = vcmp.eq.f32.partialorder %v612_v22, 0.0  ;;  %vm721_vm14 = vcmp.eq.f32.partialorder %v3151_v44, inf }
 0x17e   : > { %808 = vst [vmem:[#allocation3 + $0x20] sm:$0xff] %v800_v40  ;;  %v697_v57 = vsel %vm695_vm7, %v696_v42, %v694_v45  ;;  %v774_v46 = vmul.f32 %v3066_v16, %v752_v56  ;;  %v724_v25 = vand.u32 2147483648, %v3151_v44  ;;  %vm723_vm15 = vcmp.eq.f32.partialorder %v3151_v44, 0.0 }
 0x17f   : > { %v737_v26 = vadd.f32 0.0001, %v697_v57  ;;  %v701_v29 = vsel %vm700_vm8, %v3129_v59, %v699_v18 }
 0x180   : > { %v2374_v43 = vpop.eup %2373  ;;  %v704_v38 = vsel %vm702_vm9, %v703_v27, %v701_v29 }
 0x181   : > { %v2376_v52 = vpop.eup %2375  ;;  %v753_v60 = vmul.f32 %v737_v26, %v2991_v61  ;;  %v738_v21 = vadd.f32 0.0001, %v704_v38  ;;  %v706_v53 = vmul.f32 %v2374_v43, %v611_v47 }
 0x182   : > { %v713_v54 = vmul.f32 %v2376_v52, %v612_v22  ;;  %v2378_v63 = vpop.eup %2377 }
 0x183   : > { %v775_v48 = vmul.f32 %v3066_v16, %v753_v60  ;;  %v708_v32 = vsel %vm707_vm10, %v611_v47, %v706_v53  ;;  %v754_v61 = vmul.f32 %v738_v21, %v3009_v58  ;;  %v720_v6 = vmul.f32 %v2378_v63, %v3151_v44 }
 0x184   : > { %v711_v59 = vsel %vm709_vm11, %v710_v35, %v708_v32  ;;  %v715_v31 = vsel %vm714_vm12, %v612_v22, %v713_v54 }
 0x185   : > { %v801_v28 = vpack.c.bf16 %v775_v48, %v774_v46  ;;  %v739_v0 = vadd.f32 0.0001, %v711_v59  ;;  %v718_v1 = vsel %vm716_vm13, %v717_v11, %v715_v31  ;;  %v722_v9 = vsel %vm721_vm14, %v3151_v44, %v720_v6 }
 0x186   : > { %v740_v3 = vadd.f32 0.0001, %v718_v1  ;;  %v776_v13 = vmul.f32 %v3066_v16, %v754_v61  ;;  %v725_v36 = vsel %vm723_vm15, %v724_v25, %v722_v9 }
 0x187   : > { %809 = vst [vmem:[#allocation3 + $0x28] sm:$0xff] %v801_v28  ;;  %v755_v55 = vmul.f32 %v739_v0, %v3014_v62  ;;  %v741_v4 = vadd.f32 0.0001, %v725_v36 }
 0x188   : > { %v756_v37 = vmul.f32 %v740_v3, %v3025_v8 }
 0x189   : > { %v777_v58 = vmul.f32 %v3066_v16, %v755_v55  ;;  %v757_v5 = vmul.f32 %v741_v4, %v3028_v10 }
 0x18a   : > { %v778_v62 = vmul.f32 %v3066_v16, %v756_v37 }
 0x18b   : > { %v802_v17 = vpack.c.bf16 %v777_v58, %v776_v13  ;;  %v779_v50 = vmul.f32 %v3066_v16, %v757_v5 }
 0x18d   : > { %810 = vst [vmem:[#allocation3 + $0x30] sm:$0xff] %v802_v17  ;;  %v803_v47 = vpack.c.bf16 %v779_v50, %v778_v62 }
 0x18f   : > { %811 = vst [vmem:[#allocation3 + $0x38] sm:$0xff] %v803_v47 }
 0x190 PF: > { %v2379_v24 = vld [vmem:[%s2679_s7 + $0x4] ss:$16 sps:$4 sm:$0xff]   ;;  %v2381_v8 = vld [vmem:[%s2679_s7] ss:$16 sps:$4 sm:$0xff]   ;;  %v2611_v14 = vmov 0   ;;  %v813_v18 = vld [vmem:[#allocation3 + $0x8] sm:$0xff] }
 0x191   : > { %1044 = vmatprep.mubr.bf16.mxu0 %v2611_v14  ;;  %1084 = vmatprep.mubr.bf16.mxu1 %v2611_v14  ;;  %v2382_v10 = vld [vmem:[%s2679_s7 + $0x24] ss:$16 sps:$4 sm:$0xff]   ;;  %v2384_v16 = vld [vmem:[%s2679_s7 + $0x20] ss:$16 sps:$4 sm:$0xff]   ;;  %v2405_v7 = vld [vmem:[%s2679_s7 + $0xc] ss:$16 sps:$4 sm:$0xff]  }
 0x192   : > { %1012 = vmatprep.subr.bf16.mxu0 %v2379_v24  ;;  %2258 = vmatprep.subr.bf16.mxu1 %v2379_v24  ;;  %v2385_v15 = vld [vmem:[%s2679_s7 + $0x44] ss:$16 sps:$4 sm:$0xff]   ;;  %v2387_v22 = vld [vmem:[%s2679_s7 + $0x40] ss:$16 sps:$4 sm:$0xff]   ;;  %v2403_v12 = vld [vmem:[%s2679_s7 + $0x8] ss:$16 sps:$4 sm:$0xff]  }
 0x193   : > { %1013 = vmatpush1.bf16.msra.mxu0 %v2381_v8  ;;  %2266 = vmatpush1.bf16.msra.mxu1 %v2381_v8  ;;  %v2388_v41 = vld [vmem:[%s2679_s7 + $0x64] ss:$16 sps:$4 sm:$0xff]   ;;  %v2390_v51 = vld [vmem:[%s2679_s7 + $0x60] ss:$16 sps:$4 sm:$0xff]   ;;  %v2408_v42 = vld [vmem:[%s2679_s7 + $0x2c] ss:$16 sps:$4 sm:$0xff]  }
 0x194   : > { %1014 = vmatprep.subr.bf16.mxu0 %v2382_v10  ;;  %2259 = vmatprep.subr.bf16.mxu1 %v2382_v10  ;;  %v2391_v30 = vld [vmem:[%s2679_s7 + $0x84] ss:$16 sps:$4 sm:$0xff]   ;;  %v2393_v44 = vld [vmem:[%s2679_s7 + $0x80] ss:$16 sps:$4 sm:$0xff]   ;;  %v2406_v2 = vld [vmem:[%s2679_s7 + $0x28] ss:$16 sps:$4 sm:$0xff]  }
 0x195   : > { %v2394_v19 = vld [vmem:[%s2679_s7 + $0xa4] ss:$16 sps:$4 sm:$0xff]   ;;  %v2396_v49 = vld [vmem:[%s2679_s7 + $0xa0] ss:$16 sps:$4 sm:$0xff]   ;;  %v2411_v45 = vld [vmem:[%s2679_s7 + $0x4c] ss:$16 sps:$4 sm:$0xff]  }
 0x196   : > { %v2397_v33 = vld [vmem:[%s2679_s7 + $0xc4] ss:$16 sps:$4 sm:$0xff]   ;;  %v2399_v34 = vld [vmem:[%s2679_s7 + $0xc0] ss:$16 sps:$4 sm:$0xff]   ;;  %v817_v57 = vld [vmem:[#allocation3 + $0x28] sm:$0xff]  ;;  %p2071_p8 = scmp.ne.s32.totalorder %s2593_s18, 1 }
 0x197   : > { %1015 = vmatpush1.bf16.msra.mxu0 %v2384_v16  ;;  %2267 = vmatpush1.bf16.msra.mxu1 %v2384_v16  ;;  %v2400_v20 = vld [vmem:[%s2679_s7 + $0xe4] ss:$16 sps:$4 sm:$0xff]   ;;  %v2402_v40 = vld [vmem:[%s2679_s7 + $0xe0] ss:$16 sps:$4 sm:$0xff]   ;;  %v2409_v27 = vld [vmem:[%s2679_s7 + $0x48] ss:$16 sps:$4 sm:$0xff]  }
 0x198   : > { %1016 = vmatprep.subr.bf16.mxu0 %v2385_v15  ;;  %2260 = vmatprep.subr.bf16.mxu1 %v2385_v15  ;;  %v812_v23 = vld [vmem:[#allocation3] sm:$0xff]  ;;  %v2414_v56 = vld [vmem:[%s2679_s7 + $0x6c] ss:$16 sps:$4 sm:$0xff]   ;;  %v2412_v26 = vld [vmem:[%s2679_s7 + $0x68] ss:$16 sps:$4 sm:$0xff]  }
 0x199   : > { %v816_v39 = vld [vmem:[#allocation3 + $0x20] sm:$0xff]  ;;  %v2417_v29 = vld [vmem:[%s2679_s7 + $0x8c] ss:$16 sps:$4 sm:$0xff]   ;;  %v814_v43 = vld [vmem:[#allocation3 + $0x10] sm:$0xff] }
 0x19a   : > { %v818_v38 = vld [vmem:[#allocation3 + $0x30] sm:$0xff]  ;;  %v2415_v52 = vld [vmem:[%s2679_s7 + $0x88] ss:$16 sps:$4 sm:$0xff]   ;;  %v2420_v60 = vld [vmem:[%s2679_s7 + $0xac] ss:$16 sps:$4 sm:$0xff]  }
 0x19b   : > { %1017 = vmatpush1.bf16.msra.mxu0 %v2387_v22  ;;  %2268 = vmatpush1.bf16.msra.mxu1 %v2387_v22  ;;  %v2418_v21 = vld [vmem:[%s2679_s7 + $0xa8] ss:$16 sps:$4 sm:$0xff]   ;;  %v2423_v53 = vld [vmem:[%s2679_s7 + $0xcc] ss:$16 sps:$4 sm:$0xff]   ;;  %v2427_v11 = vld [vmem:[%s2689_s13 + $0x40] sm:$0xff]  }
 0x19c   : > { %1018 = vmatprep.subr.bf16.mxu0 %v2388_v41  ;;  %2261 = vmatprep.subr.bf16.mxu1 %v2388_v41  ;;  %v815_v35 = vld [vmem:[#allocation3 + $0x18] sm:$0xff]  ;;  %v2428_v63 = vld [vmem:[%s2689_s13] sm:$0xff]   ;;  %v2429_v59 = vld [vmem:[%s2689_s13 + $0x48] sm:$0xff]  }
 0x19d   : > { %v819_v54 = vld [vmem:[#allocation3 + $0x38] sm:$0xff]  ;;  %v2430_v31 = vld [vmem:[%s2689_s13 + $0x8] sm:$0xff]   ;;  %v2431_v28 = vld [vmem:[%s2689_s13 + $0x50] sm:$0xff]  }
 0x19e   : > { %v2421_v46 = vld [vmem:[%s2679_s7 + $0xc8] ss:$16 sps:$4 sm:$0xff]   ;;  %v2426_v48 = vld [vmem:[%s2679_s7 + $0xec] ss:$16 sps:$4 sm:$0xff]   ;;  %v2432_v61 = vld [vmem:[%s2689_s13 + $0x10] sm:$0xff]  }
 0x19f   : > { %1019 = vmatpush1.bf16.msra.mxu0 %v2390_v51  ;;  %2269 = vmatpush1.bf16.msra.mxu1 %v2390_v51  ;;  %v2424_v32 = vld [vmem:[%s2679_s7 + $0xe8] ss:$16 sps:$4 sm:$0xff]   ;;  %v2435_v3 = vld [vmem:[%s2689_s13 + $0x60] sm:$0xff]   ;;  %v2439_v9 = vld [vmem:[%s2689_s13 + $0x70] sm:$0xff]  }
 0x1a0   : > { %1020 = vmatprep.subr.bf16.mxu0 %v2391_v30  ;;  %2262 = vmatprep.subr.bf16.mxu1 %v2391_v30  ;;  %v2433_v0 = vld [vmem:[%s2689_s13 + $0x58] sm:$0xff]   ;;  %v2436_v6 = vld [vmem:[%s2689_s13 + $0x20] sm:$0xff]   ;;  %v2437_v55 = vld [vmem:[%s2689_s13 + $0x68] sm:$0xff]  }
 0x1a1   : > { %v2434_v1 = vld [vmem:[%s2689_s13 + $0x18] sm:$0xff]   ;;  %v2438_v25 = vld [vmem:[%s2689_s13 + $0x28] sm:$0xff]   ;;  %v2440_v13 = vld [vmem:[%s2689_s13 + $0x30] sm:$0xff]  }
 0x1a2   : > { %v2441_v58 = vld [vmem:[%s2689_s13 + $0x78] sm:$0xff]  }
 0x1a3   : > { %1021 = vmatpush1.bf16.msra.mxu0 %v2393_v44  ;;  %2270 = vmatpush1.bf16.msra.mxu1 %v2393_v44  ;;  %v2442_v36 = vld [vmem:[%s2689_s13 + $0x38] sm:$0xff]  }
 0x1a4   : > { %1022 = vmatprep.subr.bf16.mxu0 %v2394_v19  ;;  %2263 = vmatprep.subr.bf16.mxu1 %v2394_v19 }
 0x1a7   : > { %1023 = vmatpush1.bf16.msra.mxu0 %v2396_v49  ;;  %2271 = vmatpush1.bf16.msra.mxu1 %v2396_v49 }
 0x1a8   : > { %1024 = vmatprep.subr.bf16.mxu0 %v2397_v33  ;;  %2264 = vmatprep.subr.bf16.mxu1 %v2397_v33 }
 0x1ab   : > { %1025 = vmatpush1.bf16.msra.mxu0 %v2399_v34  ;;  %2272 = vmatpush1.bf16.msra.mxu1 %v2399_v34 }
 0x1ac   : > { %1026 = vmatprep.subr.bf16.mxu0 %v2400_v20  ;;  %2265 = vmatprep.subr.bf16.mxu1 %v2400_v20 }
 0x1af   : > { %1027 = vmatpush1.bf16.msra.mxu0 %v2402_v40  ;;  %2273 = vmatpush1.bf16.msra.mxu1 %v2402_v40 }
 0x1b0   : > { %1125 = vmatprep.subr.bf16.mxu1 %v2405_v7  ;;  %2194 = vmatprep.subr.bf16.mxu0 %v2427_v11 }
 0x1b2   : > { %1045 = vmatmul.mubr.bf16.vlgmr.msra.gmra.mrb[0].mxu0 %v812_v23  ;;  %1085 = vmatmul.mubr.bf16.vlgmr.msra.gmra.mrb[0].mxu1 %v816_v39 }
 0x1b3   : > { %1126 = vmatpush1.bf16.msra.mxu1 %v2403_v12  ;;  %1054 = vmatprep.mubr.bf16.mxu0 %v2611_v14 }
 0x1b4   : > { %1127 = vmatprep.subr.bf16.mxu1 %v2408_v42  ;;  %1094 = vmatprep.mubr.bf16.mxu1 %v2611_v14 }
 0x1b5   : > { %2195 = vmatpush3.bf16.msra.mxu0 %v2428_v63 }
 0x1b6   : > { %2196 = vmatprep.subr.bf16.mxu0 %v2429_v59 }
 0x1b7   : > { %1128 = vmatpush1.bf16.msra.mxu1 %v2406_v2 }
 0x1b8   : > { %1129 = vmatprep.subr.bf16.mxu1 %v2411_v45 }
 0x1b9   : > { %2197 = vmatpush3.bf16.msra.mxu0 %v2430_v31 }
 0x1ba   : > { %1055 = vmatmul.mubr.bf16.gmra.mrb[4].mxu0 %v813_v18  ;;  %1095 = vmatmul.mubr.bf16.gmra.mrb[4].mxu1 %v817_v57 }
 0x1bb   : > { %1130 = vmatpush1.bf16.msra.mxu1 %v2409_v27  ;;  %1064 = vmatprep.mubr.bf16.mxu0 %v2611_v14 }
 0x1bc   : > { %1131 = vmatprep.subr.bf16.mxu1 %v2414_v56  ;;  %1104 = vmatprep.mubr.bf16.mxu1 %v2611_v14 }
 0x1bd   : > { %2198 = vmatprep.subr.bf16.mxu0 %v2431_v28 }
 0x1be   : > { %2199 = vmatpush3.bf16.msra.mxu0 %v2432_v61 }
 0x1bf   : > { %1132 = vmatpush1.bf16.msra.mxu1 %v2412_v26  ;;  %2200 = vmatprep.subr.bf16.mxu0 %v2433_v0 }
 0x1c0   : > { %1133 = vmatprep.subr.bf16.mxu1 %v2417_v29 }
 0x1c2   : > { %1065 = vmatmul.mubr.bf16.gmra.mrb[8].mxu0 %v814_v43  ;;  %1105 = vmatmul.mubr.bf16.gmra.mrb[8].mxu1 %v818_v38 }
 0x1c3   : > { %1134 = vmatpush1.bf16.msra.mxu1 %v2415_v52  ;;  %1074 = vmatprep.mubr.bf16.mxu0 %v2611_v14 }
 0x1c4   : > { %1135 = vmatprep.subr.bf16.mxu1 %v2420_v60  ;;  %1114 = vmatprep.mubr.bf16.mxu1 %v2611_v14 }
 0x1c5   : > { %2201 = vmatpush3.bf16.msra.mxu0 %v2434_v1 }
 0x1c6   : > { %2202 = vmatprep.subr.bf16.mxu0 %v2435_v3 }
 0x1c7   : > { %1136 = vmatpush1.bf16.msra.mxu1 %v2418_v21 }
 0x1c8   : > { %1137 = vmatprep.subr.bf16.mxu1 %v2423_v53 }
 0x1c9   : > { %2203 = vmatpush3.bf16.msra.mxu0 %v2436_v6 }
 0x1ca   : > { %1075 = vmatmul.mubr.bf16.gmra.mrb[12].mxu0 %v815_v35  ;;  %1115 = vmatmul.mubr.bf16.gmra.mrb[12].mxu1 %v819_v54 }
 0x1cb   : > { %1138 = vmatpush1.bf16.msra.mxu1 %v2421_v46  ;;  %1157 = vmatprep.mubr.bf16.mxu1 %v2611_v14 }
 0x1cc   : > { %1139 = vmatprep.subr.bf16.mxu1 %v2426_v48  ;;  %2204 = vmatprep.subr.bf16.mxu0 %v2437_v55 }
 0x1cd   : > { %2205 = vmatpush3.bf16.msra.mxu0 %v2438_v25 }
 0x1ce   : > { %2206 = vmatprep.subr.bf16.mxu0 %v2439_v9 }
 0x1cf   : > { %1140 = vmatpush1.bf16.msra.mxu1 %v2424_v32 }
 0x1d1   : > { %2207 = vmatpush3.bf16.msra.mxu0 %v2440_v13 }
 0x1d2   : > { %1158 = vmatmul.mubr.bf16.vlgmr.msra.gmra.mrb[16].mxu1 %v812_v23  ;;  %2208 = vmatprep.subr.bf16.mxu0 %v2441_v58 }
 0x1d3   : > { %1167 = vmatprep.mubr.bf16.mxu1 %v2611_v14 }
 0x1d5   : > { %2209 = vmatpush3.bf16.msra.mxu0 %v2442_v36 }
 0x1da   : > { %1168 = vmatmul.mubr.bf16.gmra.mrb[20].mxu1 %v813_v18 }
 0x1db   : > { %1177 = vmatprep.mubr.bf16.mxu1 %v2611_v14 }
 0x1e2   : > { %1178 = vmatmul.mubr.bf16.gmra.mrb[24].mxu1 %v814_v43 }
 0x1e3   : > { %1187 = vmatprep.mubr.bf16.mxu1 %v2611_v14 }
 0x1ea   : > { %1188 = vmatmul.mubr.bf16.gmra.mrb[28].mxu1 %v815_v35 }
 0x1eb   : > { %1197 = vmatprep.mubr.bf16.mxu1 %v2611_v14 }
 0x1f2   : > { %1198 = vmatmul.mubr.bf16.gmra.mrb[32].mxu1 %v816_v39 }
 0x1f3   : > { %1207 = vmatprep.mubr.bf16.mxu1 %v2611_v14 }
 0x1fa   : > { %1208 = vmatmul.mubr.bf16.gmra.mrb[36].mxu1 %v817_v57 }
 0x1fb   : > { %1217 = vmatprep.mubr.bf16.mxu1 %v2611_v14 }
 0x202   : > { %1218 = vmatmul.mubr.bf16.gmra.mrb[40].mxu1 %v818_v38 }
 0x203   : > { %1227 = vmatprep.mubr.bf16.mxu1 %v2611_v14 }
 0x20a   : > { %1228 = vmatmul.mubr.bf16.gmra.mrb[44].mxu1 %v819_v54 }
 0x285   : > { %v3252_v37 = vpop.f32.mrb[0].mxu0  ;;  %v3254_v4 = vpop.f32.mrb[0].mxu1 }
 0x286   : > { %v2023_v17 = vmul.f32 -1.442695, %v3252_v37  ;;  %v3257_v5 = vpop.f32.mrb[1].mxu0  ;;  %v3259_v62 = vpop.f32.mrb[1].mxu1  ;;  %v2039_v15 = vmul.f32 -1.442695, %v3254_v4 }
 0x287   : > { %v2024_v50 = vmul.f32 -1.442695, %v3257_v5  ;;  %v3262_v47 = vpop.f32.mrb[2].mxu0  ;;  %v3264_v24 = vpop.f32.mrb[2].mxu1  ;;  %v2040_v19 = vmul.f32 -1.442695, %v3259_v62 }
 0x288   : > { %2443 = vpow2.f32 %v2023_v17  ;;  %v2025_v8 = vmul.f32 -1.442695, %v3262_v47  ;;  %v3267_v14 = vpop.f32.mrb[3].mxu0  ;;  %v3269_v10 = vpop.f32.mrb[3].mxu1  ;;  %v2041_v23 = vmul.f32 -1.442695, %v3264_v24 }
 0x289   : > { %2445 = vpow2.f32 %v2024_v50  ;;  %v2026_v16 = vmul.f32 -1.442695, %v3267_v14  ;;  %v2042_v12 = vmul.f32 -1.442695, %v3269_v10 }
 0x28a   : > { %2447 = vpow2.f32 %v2025_v8 }
 0x28b   : > { %2449 = vpow2.f32 %v2026_v16 }
 0x28d   : > { %v3273_v22 = vpop.f32.mrb[4].mxu0  ;;  %v3275_v41 = vpop.f32.mrb[4].mxu1 }
 0x28e   : > { %v2027_v51 = vmul.f32 -1.442695, %v3273_v22  ;;  %v3278_v30 = vpop.f32.mrb[5].mxu0  ;;  %v3280_v44 = vpop.f32.mrb[5].mxu1  ;;  %v2043_v56 = vmul.f32 -1.442695, %v3275_v41 }
 0x28f   : > { %v2028_v49 = vmul.f32 -1.442695, %v3278_v30  ;;  %v3284_v33 = vpop.f32.mrb[6].mxu0  ;;  %v3286_v34 = vpop.f32.mrb[6].mxu1  ;;  %v2044_v53 = vmul.f32 -1.442695, %v3280_v44 }
 0x290   : > { %2451 = vpow2.f32 %v2027_v51  ;;  %v2029_v20 = vmul.f32 -1.442695, %v3284_v33  ;;  %v3289_v40 = vpop.f32.mrb[7].mxu0  ;;  %v3291_v7 = vpop.f32.mrb[7].mxu1 }
 0x291   : > { %2453 = vpow2.f32 %v2039_v15  ;;  %v2030_v55 = vmul.f32 -1.442695, %v3289_v40 }
 0x292   : > { %v2444_v39 = vpop.eup %2443  ;;  %2455 = vpow2.f32 %v2028_v49 }
 0x293   : > { %v1334_v42 = vadd.f32 1.0, %v2444_v39  ;;  %2457 = vpow2.f32 %v2040_v19  ;;  %v2446_v2 = vpop.eup %2445 }
 0x294   : > { %2459 = vpow2.f32 %v2029_v20  ;;  %v1335_v45 = vadd.f32 1.0, %v2446_v2  ;;  %v2448_v27 = vpop.eup %2447 }
 0x295   : > { %2461 = vpow2.f32 %v2041_v23  ;;  %v3295_v18 = vpop.f32.mrb[8].mxu0  ;;  %v3297_v57 = vpop.f32.mrb[8].mxu1  ;;  %v1336_v29 = vadd.f32 1.0, %v2448_v27 }
 0x296   : > { %2463 = vpow2.f32 %v2042_v12  ;;  %v3300_v26 = vpop.f32.mrb[9].mxu0  ;;  %v3302_v43 = vpop.f32.mrb[9].mxu1  ;;  %v2031_v8 = vmul.f32 -1.442695, %v3295_v18 }
 0x297   : > { %2465 = vrcp.f32 %v1334_v42  ;;  %v3304_v38 = vpop.f32.mrb[10].mxu0  ;;  %v2450_v52 = vpop.eup %2449  ;;  %v2032_v49 = vmul.f32 -1.442695, %v3300_v26 }
 0x298   : > { %2467 = vrcp.f32 %v1335_v45  ;;  %v3306_v60 = vpop.f32.mrb[10].mxu1  ;;  %v1337_v21 = vadd.f32 1.0, %v2450_v52  ;;  %v3309_v35 = vpop.f32.mrb[11].mxu0  ;;  %v2033_v2 = vmul.f32 -1.442695, %v3304_v38 }
 0x299   : > { %2469 = vrcp.f32 %v1336_v29  ;;  %v3311_v54 = vpop.f32.mrb[11].mxu1 }
 0x29a   : > { %v2452_v46 = vpop.eup %2451  ;;  %2471 = vpow2.f32 %v2043_v56  ;;  %v2045_v56 = vmul.f32 -1.442695, %v3286_v34 }
 0x29b   : > { %v2454_v48 = vpop.eup %2453  ;;  %2473 = vrcp.f32 %v1337_v21  ;;  %v1338_v32 = vadd.f32 1.0, %v2452_v46 }
 0x29c   : > { %v2456_v11 = vpop.eup %2455  ;;  %2475 = vpow2.f32 %v2044_v53  ;;  %v1350_v0 = vadd.f32 1.0, %v2454_v48 }
 0x29d   : > { %v2458_v63 = vpop.eup %2457  ;;  %v1339_v59 = vadd.f32 1.0, %v2456_v11  ;;  %v3313_v31 = vpop.f32.mrb[12].mxu0  ;;  %2477 = vrcp.f32 %v1338_v32 }
 0x29e   : > { %v3315_v28 = vpop.f32.mrb[12].mxu1  ;;  %v2460_v61 = vpop.eup %2459  ;;  %v1351_v58 = vadd.f32 1.0, %v2458_v63 }
 0x29f   : > { %v3317_v1 = vpop.f32.mrb[13].mxu0  ;;  %v2462_v3 = vpop.eup %2461  ;;  %v1340_v6 = vadd.f32 1.0, %v2460_v61  ;;  %2479 = vrcp.f32 %v1339_v59 }
 0x2a0   : > { %v3320_v25 = vpop.f32.mrb[13].mxu1  ;;  %v3322_v9 = vpop.f32.mrb[14].mxu0  ;;  %v1352_v51 = vadd.f32 1.0, %v2462_v3 }
 0x2a1   : > { %v2464_v13 = vpop.eup %2463  ;;  %v3324_v36 = vpop.f32.mrb[14].mxu1  ;;  %2481 = vrcp.f32 %v1340_v6 }
 0x2a2   : > { %v3326_v17 = vpop.f32.mrb[15].mxu0  ;;  %v2466_v50 = vpop.eup %2465  ;;  %2483 = vrcp.f32 %v1350_v0  ;;  %v1353_v39 = vadd.f32 1.0, %v2464_v13 }
 0x2a3   : > { %v3329_v16 = vpop.f32.mrb[15].mxu1  ;;  %v2468_v15 = vpop.eup %2467  ;;  %2485 = vpow2.f32 %v2030_v55  ;;  %v1430_v23 = vmul.f32 %v2466_v50, %v3252_v37  ;;  %v2034_v37 = vmul.f32 -1.442695, %v3309_v35 }
 0x2a4   : > { %v2470_v19 = vpop.eup %2469  ;;  %2487 = vrcp.f32 %v1351_v58  ;;  %v1431_v42 = vmul.f32 %v2468_v15, %v3257_v5  ;;  %v2047_v15 = vmul.f32 -1.442695, %v3297_v57 }
 0x2a5   : > { %v2472_v20 = vpop.eup %2471  ;;  %2489 = vpow2.f32 %v2031_v8  ;;  %v1159_v45 = vpop.f32.mrb[16].mxu1  ;;  %v1432_v27 = vmul.f32 %v2470_v19, %v3262_v47  ;;  %v2035_v47 = vmul.f32 -1.442695, %v3313_v31 }
 0x2a6   : > { %v2474_v12 = vpop.eup %2473  ;;  %2491 = vrcp.f32 %v1352_v51  ;;  %v1462_v29 = vmul.f32 %v1430_v23, %v1159_v45  ;;  %v1161_v52 = vpop.f32.mrb[17].mxu1  ;;  %v1354_v5 = vadd.f32 1.0, %v2472_v20 }
 0x2a7   : > { %v2476_v21 = vpop.eup %2475  ;;  %v1433_v53 = vmul.f32 %v2474_v12, %v3267_v14  ;;  %2493 = vpow2.f32 %v2032_v49  ;;  %v1463_v46 = vmul.f32 %v1431_v42, %v1161_v52  ;;  %v1163_v48 = vpop.f32.mrb[18].mxu1  ;;  %v2046_v14 = vmul.f32 -1.442695, %v3291_v7 }
 0x2a8   : > { %2495 = vrcp.f32 %v1353_v39  ;;  %v1464_v32 = vmul.f32 %v1432_v27, %v1163_v48  ;;  %v1165_v11 = vpop.f32.mrb[19].mxu1  ;;  %v2478_v63 = vpop.eup %2477  ;;  %v1355_v0 = vadd.f32 1.0, %v2476_v21  ;;  %v2048_v12 = vmul.f32 -1.442695, %v3302_v43 }
 0x2a9   : > { %2497 = vpow2.f32 %v2033_v2  ;;  %v1465_v59 = vmul.f32 %v1433_v53, %v1165_v11  ;;  %v2480_v61 = vpop.eup %2479  ;;  %v1434_v58 = vmul.f32 %v2478_v63, %v3273_v22  ;;  %v2051_v11 = vmul.f32 -1.442695, %v3315_v28 }
 0x2aa   : > { %2499 = vpow2.f32 %v2045_v56  ;;  %v1510_v3 = vpack.c.bf16 %v1464_v32, %v1462_v29  ;;  %v1435_v8 = vmul.f32 %v2480_v61, %v3278_v30  ;;  %v2049_v29 = vmul.f32 -1.442695, %v3306_v60 }
 0x2ab   : > { %v2482_v6 = vpop.eup %2481  ;;  %2501 = vpow2.f32 %v2034_v37  ;;  %v1511_v55 = vpack.c.bf16 %v1465_v59, %v1463_v46  ;;  %v2050_v46 = vmul.f32 -1.442695, %v3311_v54 }
 0x2ac   : > { %v3341_v13 = vpop.eup %2483  ;;  %2503 = vrcp.f32 %v1354_v5  ;;  %v1436_v49 = vmul.f32 %v2482_v6, %v3284_v33 }
 0x2ad   : > { %v2486_v50 = vpop.eup %2485  ;;  %2505 = vpow2.f32 %v2035_v47  ;;  %v1169_v51 = vpop.f32.mrb[20].mxu1  ;;  %1686 = vmatprep.mubr.bf16.mxu0 %v1511_v55 }
 0x2ae   : > { %v3346_v19 = vpop.eup %2487  ;;  %2507 = vrcp.f32 %v1355_v0  ;;  %v1341_v20 = vadd.f32 1.0, %v2486_v50  ;;  %v3349_v23 = vmul.f32 %v1434_v58, %v1169_v51  ;;  %v1171_v39 = vpop.f32.mrb[21].mxu1  ;;  %1687 = vmatmul.mubr.bf16.vlgmr.msra.gmra.mrb[16].mxu0 %v1510_v3  ;;  %v2036_v58 = vmul.f32 -1.442695, %v3317_v1 }
 0x2af   : > { %v2490_v22 = vpop.eup %2489  ;;  %2509 = vpow2.f32 %v2046_v14  ;;  %v3352_v30 = vmul.f32 %v1435_v8, %v1171_v39  ;;  %v1173_v42 = vpop.f32.mrb[22].mxu1 }
 0x2b0   : > { %v3354_v2 = vpop.eup %2491  ;;  %2511 = vrcp.f32 %v1341_v20  ;;  %v1342_v45 = vadd.f32 1.0, %v2490_v22  ;;  %v3356_v27 = vmul.f32 %v1436_v49, %v1173_v42  ;;  %v1175_v56 = vpop.f32.mrb[23].mxu1  ;;  %v2037_v49 = vmul.f32 -1.442695, %v3322_v9 }
 0x2b1   : > { %v2494_v33 = vpop.eup %2493  ;;  %2513 = vpow2.f32 %v2047_v15  ;;  %v2052_v15 = vmul.f32 -1.442695, %v3320_v25  ;;  %v2053_v22 = vmul.f32 -1.442695, %v3324_v36  ;;  %v2038_v42 = vmul.f32 -1.442695, %v3326_v17 }
 0x2b2   : > { %v3359_v52 = vpop.eup %2495  ;;  %2515 = vrcp.f32 %v1342_v45  ;;  %v1343_v21 = vadd.f32 1.0, %v2494_v33  ;;  %v1512_v53 = vpack.c.bf16 %v3356_v27, %v3349_v23 }
 0x2b3   : > { %v2498_v37 = vpop.eup %2497  ;;  %2517 = vpow2.f32 %v2048_v12 }
 0x2b4   : > { %v2500_v48 = vpop.eup %2499  ;;  %2519 = vrcp.f32 %v1343_v21  ;;  %v1344_v5 = vadd.f32 1.0, %v2498_v37 }
 0x2b5   : > { %v2502_v32 = vpop.eup %2501  ;;  %2521 = vpow2.f32 %v2049_v29  ;;  %v1179_v63 = vpop.f32.mrb[24].mxu1  ;;  %v1356_v3 = vadd.f32 1.0, %v2500_v48  ;;  %v2054_v29 = vmul.f32 -1.442695, %v3329_v16 }
 0x2b6   : > { %v3365_v47 = vpop.eup %2503  ;;  %2523 = vrcp.f32 %v1344_v5  ;;  %v1345_v59 = vadd.f32 1.0, %v2502_v32  ;;  %v1181_v61 = vpop.f32.mrb[25].mxu1 }
 0x2b7   : > { %v2506_v0 = vpop.eup %2505  ;;  %2525 = vpow2.f32 %v2050_v46  ;;  %v1183_v6 = vpop.f32.mrb[26].mxu1 }
 0x2b8   : > { %v3367_v14 = vpop.eup %2507  ;;  %2527 = vrcp.f32 %v1345_v59  ;;  %v1346_v55 = vadd.f32 1.0, %v2506_v0  ;;  %v1185_v50 = vpop.f32.mrb[27].mxu1 }
 0x2b9   : > { %v2510_v8 = vpop.eup %2509  ;;  %2529 = vpow2.f32 %v2051_v11 }
 0x2ba   : > { %v2512_v51 = vpop.eup %2511  ;;  %2531 = vrcp.f32 %v1346_v55  ;;  %v1357_v48 = vadd.f32 1.0, %v2510_v8 }
 0x2bb   : > { %v2514_v20 = vpop.eup %2513  ;;  %2533 = vrcp.f32 %v1356_v3  ;;  %v1437_v39 = vmul.f32 %v2512_v51, %v3289_v40 }
 0x2bc   : > { %v2516_v12 = vpop.eup %2515  ;;  %2535 = vpow2.f32 %v2036_v58  ;;  %v1358_v55 = vadd.f32 1.0, %v2514_v20  ;;  %v1446_v20 = vmul.f32 %v3341_v13, %v3254_v4 }
 0x2bd   : > { %v2518_v45 = vpop.eup %2517  ;;  %v1438_v33 = vmul.f32 %v2516_v12, %v3295_v18  ;;  %2537 = vpow2.f32 %v2052_v15  ;;  %v1469_v21 = vmul.f32 %v1437_v39, %v1175_v56  ;;  %v1189_v37 = vpop.f32.mrb[28].mxu1 }
 0x2be   : > { %v2520_v46 = vpop.eup %2519  ;;  %2539 = vpow2.f32 %v2037_v49  ;;  %v3377_v5 = vpop.f32.mrb[29].mxu1 }
 0x2bf   : > { %v2522_v40 = vpop.eup %2521  ;;  %v1439_v32 = vmul.f32 %v2520_v46, %v3300_v26  ;;  %2541 = vpow2.f32 %v2053_v22  ;;  %v1513_v11 = vpack.c.bf16 %v1469_v21, %v3352_v30  ;;  %v1470_v59 = vmul.f32 %v1438_v33, %v1179_v63  ;;  %v3381_v0 = vpop.f32.mrb[30].mxu1 }
 0x2c0   : > { %v2524_v18 = vpop.eup %2523  ;;  %2543 = vpow2.f32 %v2038_v42  ;;  %v3383_v3 = vpop.f32.mrb[31].mxu1  ;;  %v1359_v26 = vadd.f32 1.0, %v2518_v45  ;;  %v1360_v39 = vadd.f32 1.0, %v2522_v40 }
 0x2c1   : > { %v2526_v56 = vpop.eup %2525  ;;  %v1440_v58 = vmul.f32 %v2524_v18, %v3304_v38  ;;  %2545 = vpow2.f32 %v2054_v29  ;;  %1694 = vmatprep.mubr.bf16.mxu0 %v1513_v11  ;;  %v1471_v8 = vmul.f32 %v1439_v32, %v1181_v61  ;;  %v1447_v38 = vmul.f32 %v3346_v19, %v3259_v62 }
 0x2c2   : > { %v2528_v15 = vpop.eup %2527  ;;  %2547 = vrcp.f32 %v1357_v48  ;;  %1695 = vmatmul.mubr.bf16.gmra.mrb[20].mxu0 %v1512_v53  ;;  %v1448_v61 = vmul.f32 %v3354_v2, %v3264_v24  ;;  %v1361_v4 = vadd.f32 1.0, %v2526_v56  ;;  %v1450_v18 = vmul.f32 %v3365_v47, %v3275_v41 }
 0x2c3   : > { %v2530_v30 = vpop.eup %2529  ;;  %v1441_v63 = vmul.f32 %v2528_v15, %v3309_v35  ;;  %v1472_v51 = vmul.f32 %v1440_v58, %v1183_v6  ;;  %2549 = vrcp.f32 %v1358_v55  ;;  %v1449_v6 = vmul.f32 %v3359_v52, %v3269_v10 }
 0x2c4   : > { %v2532_v49 = vpop.eup %2531  ;;  %2551 = vrcp.f32 %v1359_v26  ;;  %v1362_v40 = vadd.f32 1.0, %v2530_v30  ;;  %v1451_v55 = vmul.f32 %v3367_v14, %v3280_v44 }
 0x2c5   : > { %v2534_v22 = vpop.eup %2533  ;;  %v1442_v23 = vmul.f32 %v2532_v49, %v3313_v31  ;;  %v1514_v27 = vpack.c.bf16 %v1472_v51, %v1470_v59  ;;  %v1473_v53 = vmul.f32 %v1441_v63, %v1185_v50  ;;  %v1199_v12 = vpop.f32.mrb[32].mxu1  ;;  %2553 = vrcp.f32 %v1360_v39 }
 0x2c6   : > { %v2536_v35 = vpop.eup %2535  ;;  %v3399_v13 = vmul.f32 %v1446_v20, %v1199_v12  ;;  %v1201_v62 = vpop.f32.mrb[33].mxu1  ;;  %v1452_v15 = vmul.f32 %v2534_v22, %v3286_v34 }
 0x2c7   : > { %v2538_v19 = vpop.eup %2537  ;;  %v1347_v42 = vadd.f32 1.0, %v2536_v35  ;;  %v1515_v24 = vpack.c.bf16 %v1473_v53, %v1471_v8  ;;  %v3401_v2 = vmul.f32 %v1442_v23, %v1189_v37  ;;  %v3403_v45 = vmul.f32 %v1447_v38, %v1201_v62  ;;  %v1203_v31 = vpop.f32.mrb[34].mxu1 }
 0x2c8   : > { %v2540_v33 = vpop.eup %2539  ;;  %v3405_v50 = vmul.f32 %v1448_v61, %v1203_v31  ;;  %v1205_v29 = vpop.f32.mrb[35].mxu1  ;;  %v1363_v56 = vadd.f32 1.0, %v2538_v19 }
 0x2c9   : > { %v2542_v21 = vpop.eup %2541  ;;  %2555 = vrcp.f32 %v1347_v42  ;;  %v1348_v10 = vadd.f32 1.0, %v2540_v33  ;;  %1702 = vmatprep.mubr.bf16.mxu0 %v1515_v24  ;;  %v3407_v52 = vmul.f32 %v1449_v6, %v1205_v29 }
 0x2ca   : > { %v2544_v46 = vpop.eup %2543  ;;  %2557 = vrcp.f32 %v1361_v4  ;;  %1703 = vmatmul.mubr.bf16.gmra.mrb[24].mxu0 %v1514_v27  ;;  %v1518_v37 = vpack.c.bf16 %v3405_v50, %v3399_v13  ;;  %v1364_v58 = vadd.f32 1.0, %v2542_v21  ;;  %v1496_v50 = vld [vmem:[#allocation2 + $0x10] sm:$0xff] }
 0x2cb   : > { %v2546_v48 = vpop.eup %2545  ;;  %2559 = vrcp.f32 %v1348_v10  ;;  %v1349_v32 = vadd.f32 1.0, %v2544_v46  ;;  %v1519_v11 = vpack.c.bf16 %v3407_v52, %v3403_v45 }
 0x2cc   : > { %v2548_v59 = vpop.eup %2547  ;;  %v1365_v26 = vadd.f32 1.0, %v2546_v48 }
 0x2cd   : > { %2561 = vrcp.f32 %v1349_v32  ;;  %v1209_v8 = vpop.f32.mrb[36].mxu1  ;;  %v2550_v51 = vpop.eup %2549  ;;  %v1453_v49 = vmul.f32 %v2548_v59, %v3291_v7 }
 0x2ce   : > { %v3418_v30 = vmul.f32 %v1450_v18, %v1209_v8  ;;  %v1211_v63 = vpop.f32.mrb[37].mxu1  ;;  %2563 = vrcp.f32 %v1362_v40  ;;  %v2552_v41 = vpop.eup %2551  ;;  %v1454_v27 = vmul.f32 %v2550_v51, %v3297_v57 }
 0x2cf   : > { %v1483_v20 = vmul.f32 %v1451_v55, %v1211_v63  ;;  %v1213_v38 = vpop.f32.mrb[38].mxu1  ;;  %2565 = vrcp.f32 %v1363_v56  ;;  %v2554_v14 = vpop.eup %2553  ;;  %v1455_v12 = vmul.f32 %v2552_v41, %v3302_v43 }
 0x2d0   : > { %v1484_v47 = vmul.f32 %v1452_v15, %v1213_v38  ;;  %v1215_v61 = vpop.f32.mrb[39].mxu1  ;;  %2567 = vrcp.f32 %v1364_v58  ;;  %v1456_v6 = vmul.f32 %v2554_v14, %v3306_v60 }
 0x2d1   : > { %v1485_v44 = vmul.f32 %v1453_v49, %v1215_v61  ;;  %2569 = vrcp.f32 %v1365_v26  ;;  %v1497_v61 = vld [vmem:[#allocation2 + $0x18] sm:$0xff] }
 0x2d2   : > { %v1520_v34 = vpack.c.bf16 %v1484_v47, %v3418_v30 }
 0x2d3   : > { %v2556_v39 = vpop.eup %2555  ;;  %v1521_v22 = vpack.c.bf16 %v1485_v44, %v1483_v20 }
 0x2d4   : > { %v2558_v23 = vpop.eup %2557  ;;  %v1443_v7 = vmul.f32 %v2556_v39, %v3317_v1 }
 0x2d5   : > { %v2560_v53 = vpop.eup %2559  ;;  %v1219_v35 = vpop.f32.mrb[40].mxu1  ;;  %v1457_v31 = vmul.f32 %v2558_v23, %v3311_v54  ;;  %v1498_v23 = vld [vmem:[#allocation2 + $0x20] sm:$0xff] }
 0x2d6   : > { %v1444_v4 = vmul.f32 %v2560_v53, %v3322_v9  ;;  %v1475_v62 = vmul.f32 %v1443_v7, %v3377_v5  ;;  %v1486_v19 = vmul.f32 %v1454_v27, %v1219_v35  ;;  %v1221_v42 = vpop.f32.mrb[41].mxu1 }
 0x2d7   : > { %v2562_v24 = vpop.eup %2561  ;;  %v1487_v33 = vmul.f32 %v1455_v12, %v1221_v42  ;;  %v1223_v29 = vpop.f32.mrb[42].mxu1  ;;  %v1499_v12 = vld [vmem:[#allocation2 + $0x28] sm:$0xff]  ;;  %v1500_v42 = vld [vmem:[#allocation2 + $0x30] sm:$0xff] }
 0x2d8   : > { %v1445_v57 = vmul.f32 %v2562_v24, %v3326_v17  ;;  %v1476_v1 = vmul.f32 %v1444_v4, %v3381_v0  ;;  %v1488_v21 = vmul.f32 %v1456_v6, %v1223_v29  ;;  %v1225_v43 = vpop.f32.mrb[43].mxu1  ;;  %v2564_v10 = vpop.eup %2563  ;;  %v1501_v29 = vld [vmem:[#allocation2 + $0x38] sm:$0xff] }
 0x2d9   : > { %v1489_v46 = vmul.f32 %v1457_v31, %v1225_v43  ;;  %v2566_v60 = vpop.eup %2565  ;;  %v1458_v54 = vmul.f32 %v2564_v10, %v3315_v28 }
 0x2da   : > { %v1516_v9 = vpack.c.bf16 %v1476_v1, %v3401_v2  ;;  %v1477_v5 = vmul.f32 %v1445_v57, %v3383_v3  ;;  %v1522_v48 = vpack.c.bf16 %v1488_v21, %v1486_v19  ;;  %v2568_v40 = vpop.eup %2567  ;;  %v1459_v17 = vmul.f32 %v2566_v60, %v3320_v25 }
 0x2db   : > { %v1523_v32 = vpack.c.bf16 %v1489_v46, %v1487_v33  ;;  %v2570_v59 = vpop.eup %2569  ;;  %v1460_v0 = vmul.f32 %v2568_v40, %v3324_v36  ;;  %v1502_v46 = vld [vmem:[#allocation2 + $0x40] sm:$0xff] }
 0x2dc   : > { %v1517_v18 = vpack.c.bf16 %v1477_v5, %v1475_v62  ;;  %v1461_v8 = vmul.f32 %v2570_v59, %v3329_v16  ;;  %v1494_v16 = vld [vmem:[#allocation2] sm:$0xff] }
 0x2dd   : > { %v1229_v56 = vpop.f32.mrb[44].mxu1 }
 0x2de   : > { %1710 = vmatprep.mubr.bf16.mxu0 %v1517_v18  ;;  %v1490_v55 = vmul.f32 %v1458_v54, %v1229_v56  ;;  %v1231_v58 = vpop.f32.mrb[45].mxu1 }
 0x2df   : > { %1711 = vmatmul.mubr.bf16.gmra.mrb[28].mxu0 %v1516_v9  ;;  %v1491_v2 = vmul.f32 %v1459_v17, %v1231_v58  ;;  %v1233_v3 = vpop.f32.mrb[46].mxu1  ;;  %v1504_v17 = vld [vmem:[#allocation2 + $0x50] sm:$0xff]  ;;  %v1505_v58 = vld [vmem:[#allocation2 + $0x58] sm:$0xff] }
 0x2e0   : > { %1718 = vmatprep.mubr.bf16.mxu0 %v1519_v11  ;;  %v1492_v15 = vmul.f32 %v1460_v0, %v1233_v3  ;;  %v1235_v28 = vpop.f32.mrb[47].mxu1  ;;  %v1495_v11 = vld [vmem:[#allocation2 + $0x8] sm:$0xff] }
 0x2e1   : > { %v1493_v26 = vmul.f32 %v1461_v8, %v1235_v28 }
 0x2e2   : > { %v1524_v30 = vpack.c.bf16 %v1492_v15, %v1490_v55 }
 0x2e3   : > { %v1525_v25 = vpack.c.bf16 %v1493_v26, %v1491_v2  ;;  %v1506_v26 = vld [vmem:[#allocation2 + $0x60] sm:$0xff] }
 0x2e7   : > { %1719 = vmatmul.mubr.bf16.gmra.mrb[32].mxu0 %v1518_v37 }
 0x2e8   : > { %1726 = vmatprep.mubr.bf16.mxu0 %v1521_v22 }
 0x2ef   : > { %1727 = vmatmul.mubr.bf16.gmra.mrb[36].mxu0 %v1520_v34 }
 0x2f0   : > { %1734 = vmatprep.mubr.bf16.mxu0 %v1523_v32 }
 0x2f7   : > { %1735 = vmatmul.mubr.bf16.gmra.mrb[40].mxu0 %v1522_v48  ;;  %v1503_v48 = vld [vmem:[#allocation2 + $0x48] sm:$0xff] }
 0x2f8   : > { %1742 = vmatprep.mubr.bf16.mxu0 %v1525_v25 }
 0x2ff   : > { %1743 = vmatmul.mubr.bf16.gmra.mrb[44].mxu0 %v1524_v30 }
 0x381   : > { %v2210_v36 = vpop.f32.mrb[16].mxu0 }
 0x382   : > { %v2211_v63 = vpop.f32.mrb[17].mxu0 }
 0x383   : > { %v2212_v45 = vadd.f32 %v2211_v63, %v2210_v36  ;;  %v2213_v52 = vpop.f32.mrb[18].mxu0 }
 0x384   : > { %v2214_v51 = vpop.f32.mrb[19].mxu0 }
 0x385   : > { %v1751_v49 = vadd.f32 %v2212_v45, %v1494_v16  ;;  %v2215_v20 = vadd.f32 %v2214_v51, %v2213_v52  ;;  %v1507_v16 = vld [vmem:[#allocation2 + $0x68] sm:$0xff] }
 0x387   : > { %1767 = vst [vmem:[#allocation2] sm:$0xff] %v1751_v49  ;;  %v1752_v38 = vadd.f32 %v2215_v20, %v1495_v11  ;;  %v1508_v49 = vld [vmem:[#allocation2 + $0x70] sm:$0xff] }
 0x389   : > { %1768 = vst [vmem:[#allocation2 + $0x8] sm:$0xff] %v1752_v38 }
 0x395   : > { %v2216_v13 = vpop.f32.mrb[20].mxu0 }
 0x396   : > { %v2217_v37 = vpop.f32.mrb[21].mxu0 }
 0x397   : > { %v2218_v41 = vadd.f32 %v2217_v37, %v2216_v13  ;;  %v2219_v47 = vpop.f32.mrb[22].mxu0 }
 0x398   : > { %v2220_v44 = vpop.f32.mrb[23].mxu0 }
 0x399   : > { %v1753_v14 = vadd.f32 %v2218_v41, %v1496_v50  ;;  %v2221_v34 = vadd.f32 %v2220_v44, %v2219_v47  ;;  %v1509_v50 = vld [vmem:[#allocation2 + $0x78] sm:$0xff]  ;;  %v1787_v44 = vld [vmem:[#allocation2] sm:$0xff] (!%p2071_p8) }
 0x39b   : > { %1769 = vst [vmem:[#allocation2 + $0x10] sm:$0xff] %v1753_v14  ;;  %v1754_v39 = vadd.f32 %v2221_v34, %v1497_v61  ;;  %v1788_v14 = vld [vmem:[#allocation2 + $0x8] sm:$0xff] (!%p2071_p8) }
 0x39d   : > { %1770 = vst [vmem:[#allocation2 + $0x18] sm:$0xff] %v1754_v39  ;;  %v2222_v22 = vpop.f32.mrb[24].mxu0  ;;  %v2143_v39 = vpack.c.bf16 (!%p2071_p8), %v1788_v14, %v1787_v44 }
 0x39e   : > { %v2223_v27 = vpop.f32.mrb[25].mxu0 }
 0x39f   : > { %v2224_v7 = vadd.f32 %v2223_v27, %v2222_v22  ;;  %v2225_v53 = vpop.f32.mrb[26].mxu0  ;;  %2144 = vst [vmem:[%s2694_s16] sm:$0xff] (!%p2071_p8), %v2143_v39  }
 0x3a0   : > { %v2226_v35 = vpop.f32.mrb[27].mxu0 }
 0x3a1   : > { %v1755_v6 = vadd.f32 %v2224_v7, %v1498_v23  ;;  %v2227_v4 = vadd.f32 %v2226_v35, %v2225_v53 }
 0x3a2   : > { %v1789_v34 = vld [vmem:[#allocation2 + $0x10] sm:$0xff] (!%p2071_p8) }
 0x3a3   : > { %1771 = vst [vmem:[#allocation2 + $0x20] sm:$0xff] %v1755_v6  ;;  %v1756_v62 = vadd.f32 %v2227_v4, %v1499_v12 }
 0x3a4   : > { %v1790_v22 = vld [vmem:[#allocation2 + $0x18] sm:$0xff] (!%p2071_p8) }
 0x3a5   : > { %1772 = vst [vmem:[#allocation2 + $0x28] sm:$0xff] %v1756_v62  ;;  %v2148_v7 = vpack.c.bf16 (!%p2071_p8), %v1790_v22, %v1789_v34 }
 0x3a7   : > { %2187 = vst [vmem:[%s2694_s16 + $0x8] sm:$0xff] (!%p2071_p8), %v2148_v7  }
 0x3aa   : > { %v1791_v23 = vld [vmem:[#allocation2 + $0x20] sm:$0xff] (!%p2071_p8) }
 0x3ac   : > { %v1792_v27 = vld [vmem:[#allocation2 + $0x28] sm:$0xff] (!%p2071_p8) }
 0x3ad   : > { %v2153_v53 = vpack.c.bf16 (!%p2071_p8), %v1792_v27, %v1791_v23 }
 0x3af   : > { %2188 = vst [vmem:[%s2694_s16 + $0x10] sm:$0xff] (!%p2071_p8), %v2153_v53  }
 0x3b2   : > { %v2228_v19 = vpop.f32.mrb[28].mxu0 }
 0x3b3   : > { %v2229_v24 = vpop.f32.mrb[29].mxu0 }
 0x3b4   : > { %v2230_v31 = vadd.f32 %v2229_v24, %v2228_v19  ;;  %v2231_v33 = vpop.f32.mrb[30].mxu0 }
 0x3b5   : > { %v2232_v57 = vpop.f32.mrb[31].mxu0 }
 0x3b6   : > { %v1757_v1 = vadd.f32 %v2230_v31, %v1500_v42  ;;  %v2233_v21 = vadd.f32 %v2232_v57, %v2231_v33 }
 0x3b8   : > { %1773 = vst [vmem:[#allocation2 + $0x30] sm:$0xff] %v1757_v1  ;;  %v1758_v43 = vadd.f32 %v2233_v21, %v1501_v29 }
 0x3ba   : > { %1774 = vst [vmem:[#allocation2 + $0x38] sm:$0xff] %v1758_v43  ;;  %v2234_v10 = vpop.f32.mrb[32].mxu0 }
 0x3bb   : > { %v2235_v60 = vpop.f32.mrb[33].mxu0 }
 0x3bc   : > { %v2236_v9 = vadd.f32 %v2235_v60, %v2234_v10  ;;  %v2237_v5 = vpop.f32.mrb[34].mxu0 }
 0x3bd   : > { %v2238_v40 = vpop.f32.mrb[35].mxu0 }
 0x3be   : > { %v1759_v32 = vadd.f32 %v2236_v9, %v1502_v46  ;;  %v2239_v59 = vadd.f32 %v2238_v40, %v2237_v5 }
 0x3bf   : > { %v1793_v12 = vld [vmem:[#allocation2 + $0x30] sm:$0xff] (!%p2071_p8) }
 0x3c0   : > { %1775 = vst [vmem:[#allocation2 + $0x40] sm:$0xff] %v1759_v32  ;;  %v1760_v54 = vadd.f32 %v2239_v59, %v1503_v48 }
 0x3c1   : > { %v1794_v35 = vld [vmem:[#allocation2 + $0x38] sm:$0xff] (!%p2071_p8) }
 0x3c2   : > { %1776 = vst [vmem:[#allocation2 + $0x48] sm:$0xff] %v1760_v54  ;;  %v2240_v18 = vpop.f32.mrb[36].mxu0  ;;  %v2158_v4 = vpack.c.bf16 (!%p2071_p8), %v1794_v35, %v1793_v12 }
 0x3c3   : > { %v2241_v56 = vpop.f32.mrb[37].mxu0 }
 0x3c4   : > { %v2242_v0 = vadd.f32 %v2241_v56, %v2240_v18  ;;  %v2243_v55 = vpop.f32.mrb[38].mxu0  ;;  %2189 = vst [vmem:[%s2694_s16 + $0x18] sm:$0xff] (!%p2071_p8), %v2158_v4  }
 0x3c5   : > { %v2244_v8 = vpop.f32.mrb[39].mxu0 }
 0x3c6   : > { %v1761_v2 = vadd.f32 %v2242_v0, %v1504_v17  ;;  %v2245_v3 = vadd.f32 %v2244_v8, %v2243_v55 }
 0x3c7   : > { %v1795_v6 = vld [vmem:[#allocation2 + $0x40] sm:$0xff] (!%p2071_p8) }
 0x3c8   : > { %1777 = vst [vmem:[#allocation2 + $0x50] sm:$0xff] %v1761_v2  ;;  %v1762_v15 = vadd.f32 %v2245_v3, %v1505_v58 }
 0x3c9   : > { %v1796_v62 = vld [vmem:[#allocation2 + $0x48] sm:$0xff] (!%p2071_p8) }
 0x3ca   : > { %1778 = vst [vmem:[#allocation2 + $0x58] sm:$0xff] %v1762_v15  ;;  %v2246_v28 = vpop.f32.mrb[40].mxu0  ;;  %v2163_v24 = vpack.c.bf16 (!%p2071_p8), %v1796_v62, %v1795_v6 }
 0x3cb   : > { %v2247_v30 = vpop.f32.mrb[41].mxu0 }
 0x3cc   : > { %v2248_v25 = vadd.f32 %v2247_v30, %v2246_v28  ;;  %v2249_v36 = vpop.f32.mrb[42].mxu0  ;;  %2190 = vst [vmem:[%s2694_s16 + $0x20] sm:$0xff] (!%p2071_p8), %v2163_v24  }
 0x3cd   : > { %v2250_v63 = vpop.f32.mrb[43].mxu0 }
 0x3ce   : > { %v1763_v45 = vadd.f32 %v2248_v25, %v1506_v26  ;;  %v2251_v52 = vadd.f32 %v2250_v63, %v2249_v36 }
 0x3cf   : > { %v1797_v19 = vld [vmem:[#allocation2 + $0x50] sm:$0xff] (!%p2071_p8) }
 0x3d0   : > { %1779 = vst [vmem:[#allocation2 + $0x60] sm:$0xff] %v1763_v45  ;;  %v1764_v11 = vadd.f32 %v2251_v52, %v1507_v16 }
 0x3d1   : > { %v1798_v42 = vld [vmem:[#allocation2 + $0x58] sm:$0xff] (!%p2071_p8) }
 0x3d2   : > { %1780 = vst [vmem:[#allocation2 + $0x68] sm:$0xff] %v1764_v11  ;;  %v2252_v51 = vpop.f32.mrb[44].mxu0  ;;  %v2168_v31 = vpack.c.bf16 (!%p2071_p8), %v1798_v42, %v1797_v19 }
 0x3d3   : > { %v2253_v20 = vpop.f32.mrb[45].mxu0 }
 0x3d4   : > { %v2254_v38 = vadd.f32 %v2253_v20, %v2252_v51  ;;  %v2255_v13 = vpop.f32.mrb[46].mxu0  ;;  %1786 = sbr.rel (%p2071_p8) target bundleno = 997 (0x3e5), region = 48  ;;  %2191 = vst [vmem:[%s2694_s16 + $0x28] sm:$0xff] (!%p2071_p8), %v2168_v31  }
 0x3d5   : > { %v2256_v37 = vpop.f32.mrb[47].mxu0 }
 0x3d6   : > { %v1765_v41 = vadd.f32 %v2254_v38, %v1508_v49  ;;  %v2257_v47 = vadd.f32 %v2256_v37, %v2255_v13 }
 0x3d7   : > { %v1799_v33 = vld [vmem:[#allocation2 + $0x60] sm:$0xff] (!%p2071_p8) }
 0x3d8   : > { %1781 = vst [vmem:[#allocation2 + $0x70] sm:$0xff] %v1765_v41  ;;  %v1766_v61 = vadd.f32 %v2257_v47, %v1509_v50 }
 0x3d9   : > { %v1800_v29 = vld [vmem:[#allocation2 + $0x68] sm:$0xff] (!%p2071_p8) }
 0x3da   : > { %1782 = vst [vmem:[#allocation2 + $0x78] sm:$0xff] %v1766_v61  ;;  %v2173_v1 = vpack.c.bf16 (!%p2071_p8), %v1800_v29, %v1799_v33 }
 0x3dc   : > { %2192 = vst [vmem:[%s2694_s16 + $0x30] sm:$0xff] %v2173_v1  }
 0x3df   : > { %v1801_v57 = vld [vmem:[#allocation2 + $0x70] sm:$0xff] }
 0x3e1   : > { %v1802_v21 = vld [vmem:[#allocation2 + $0x78] sm:$0xff] }
 0x3e2   : > { %v2178_v43 = vpack.c.bf16 %v1802_v21, %v1801_v57 }
 0x3e4   : > { %2193 = vst [vmem:[%s2694_s16 + $0x38] sm:$0xff] %v2178_v43  }
 0x3e5 PF: > { %s15_s22 = sadd.s32 1, %s2609_s22   ;;  %s3473_s18 = smov %s2601_s20 }
 0x3e6   : > { %p12_p9 = scmp.ge.s32.totalorder %s15_s22, 6   ;;  %s3474_s19 = smov %s2605_s21 }
 0x3e7   : > { %s3475_s20 = smov %s3478_s23  ;;  %s3476_s21 = smov %s3482_s24 }
 0x3e8   :  { %14 = sbr.rel (!%p12_p9) target bundleno = 3 (0x3), region = 84 }

</bundles_post_ra>
